<compile_context>
chip_gen: v7x
topology: tpu7x:2x2x1
jax: 0.10.0
libtpu: 0.0.40
codegen_flags: <defaults>
</compile_context>

<pallas_src>
import functools
import math

import jax
import jax.numpy as jnp
from jax.experimental import pallas as pl
from jax.experimental.pallas import tpu as pltpu

MIN_NORM = 1e-15
EPS = 1e-7          # HGCN eps for float32
MAX_NORM = 1e6      # HGCN max_norm clamp on tangent norms


def _hyp_linear_kernel(x_ref, wt_ref, b_ref, sc_ref, o_ref, *, k):
    f32 = jnp.float32
    sqrt_k = k ** 0.5
    inv_sqrt_k = 1.0 / sqrt_k

    x = x_ref[...]
    if x.dtype != f32:
        x = x.astype(f32)
    wt = wt_ref[...]        # (d_in, d_out), f32, row 0 and column 0 pre-zeroed
    b_sp = b_ref[...]       # (1, d_out),   f32, lane 0 pre-zeroed

    cosh_e = sc_ref[0]      # hoisted bias-branch constants (SMEM scalars)
    g = sc_ref[1]
    bsq = sc_ref[2]

    d_out = b_sp.shape[-1]

    # ---------------- logmap0 on the input manifold ----------------
    # No time-lane masking needed: the time lane of u multiplies a zeroed wt row.
    x0 = x[:, 0:1]
    y_sq = jnp.maximum(jnp.sum(x * x, axis=-1, keepdims=True) - x0 * x0, 0.0)
    y_norm = jnp.maximum(jnp.sqrt(y_sq), MIN_NORM)
    theta = jnp.maximum(x0 * inv_sqrt_k, 1.0 + EPS)
    arcosh = jnp.log(theta + jnp.sqrt(theta * theta - 1.0))
    u = (sqrt_k * arcosh / y_norm) * x                     # tangent at origin (time lane unused)

    # ---------------- W @ u  (MXU) ----------------
    z = jnp.dot(u, wt, preferred_element_type=f32,
                precision=jax.lax.Precision.HIGHEST)       # (tm, d_out); lane 0 == 0

    # ---------------- expmap0 + proj on the output manifold ----------------
    z_nsq = jnp.sum(z * z, axis=-1, keepdims=True)         # cross-lane reduction #1
    z_norm = jnp.maximum(jnp.sqrt(z_nsq), MIN_NORM)
    inv_z = 1.0 / z_norm                                   # single divide, reused 3x
    th = z_norm * inv_sqrt_k
    # sinh/cosh with a small-angle Taylor guard (avoids 0.5*(e - 1/e) cancellation)
    e = jnp.exp(th)
    inv_e = 1.0 / e
    th2 = th * th
    small = th < 0.1
    sinh_th = jnp.where(small, th * (1.0 + th2 * (1.0 / 6.0)), 0.5 * (e - inv_e))
    cosh_th = jnp.where(small, 1.0 + 0.5 * th2, 0.5 * (e + inv_e))
    h0 = sqrt_k * cosh_th              # == proj time coord sqrt(K + ||h_sp||^2)
    s_over_z = sqrt_k * sinh_th * inv_z  # ||h_sp|| / ||z||   (h_sp = s_over_z * z)

    # -------- bias: ptransp0(h, b) then expmap(h, .) then proj --------
    zb = jnp.sum(z * b_sp, axis=-1, keepdims=True)         # cross-lane reduction #2
    alpha = zb * inv_z * inv_sqrt_k                        # <y_hat, b_sp> / sqrtK
    q = alpha * (sqrt_k - h0) * inv_z                      # pt_sp = b_sp - q * z
    a_row = cosh_e * s_over_z - g * q                      # per-row (tm,1) scalar
    out_sp = a_row * z + g * b_sp                          # single fused tile op; lane 0 == 0

    # Final proj time coordinate sqrt(max(K + ||out_sp||^2, EPS)), expanded exactly:
    r_sq = (a_row * a_row) * z_nsq + (2.0 * g) * a_row * zb + (g * g) * bsq
    out0 = jnp.sqrt(jnp.maximum(k + r_sq, EPS))

    lane0 = jax.lax.broadcasted_iota(jnp.int32, (1, d_out), 1) == 0
    o_ref[...] = jnp.where(lane0, out0, out_sp).astype(o_ref.dtype)


def _vmem_limit_bytes():
    """Generation-aware scoped-VMEM request (v5e/v6e: 128 MiB phys, v7x: 64 MiB)."""
    cap = 64 * 1024 * 1024  # conservative fallback (works on every generation)
    try:
        cap = int(pltpu.get_tpu_info().vmem_capacity_bytes)
    except Exception:
        pass
    return min(cap * 3 // 4, 100 * 1024 * 1024)


def _pick_row_tile(n, d_in, d_out, vmem_limit_bytes, tm_max=2048):
    """Row tile: as large as the VMEM budget allows, capped, multiple of 8,
    and small enough that the grid keeps >= 2 steps (megacore sharding)."""
    # double-buffered x/out blocks + ~3x f32 full-width temporaries
    bytes_per_row = 4 * (2 * d_in + 2 * d_out + 3 * (d_in + d_out))
    fixed = 4 * 2 * (d_in * d_out + d_out)                 # wt + bias buffers
    budget = max(int(vmem_limit_bytes * 0.75) - fixed, bytes_per_row * 8)
    tm = min(budget // bytes_per_row, tm_max)
    if n > 8:
        half = ((n + 1) // 2 + 7) // 8 * 8                 # ceil(n/2), rounded up to 8
        tm = min(tm, max(8, half))                         # keep at least 2 grid steps
    tm = int(tm) - int(tm) % 8
    return max(tm, 8)


def hyperbolic_linear(x, w, b, *, k=1.0, dropout_rate=0.0, training=False, rng=None,
                      tm_max=2048):
    """x: (N, in_dim) points on the curvature-K hyperboloid; w: (out_dim, in_dim); b: (out_dim,)."""
    n, d_in = x.shape
    d_out, d_in_w = w.shape
    assert d_in_w == d_in and b.shape == (d_out,)
    assert d_in >= 2 and d_out >= 2

    f32 = jnp.float32
    k = float(k)
    sqrt_k = math.sqrt(k)

    # Weight dropout (F.dropout(self.W, p, training)) on the small parameter, wrapper-side.
    w = jnp.asarray(w, f32)
    if training and dropout_rate > 0.0:
        keep = jax.random.bernoulli(rng, 1.0 - dropout_rate, w.shape)
        w = jnp.where(keep, w / (1.0 - dropout_rate), 0.0)

    # Pre-mask the time lanes of the tiny parameters so the kernel needs no full-tile
    # iota/where: row 0 of W^T multiplies the (ignored) time lane of the tangent
    # vector; column 0 of W^T produces the (ignored) time coordinate of Wx.
    wt = w.T.at[0, :].set(0.0).at[:, 0].set(0.0)           # (d_in, d_out)
    b_sp = jnp.asarray(b, f32).reshape(1, d_out).at[:, 0].set(0.0)

    # Row-independent bias-branch constants, hoisted out of the kernel.
    # Parallel transport is a Minkowski isometry, so |pt|_L == ||b_sp||.
    bsq = jnp.sum(b_sp * b_sp)
    normu = jnp.minimum(jnp.sqrt(jnp.maximum(bsq, EPS)), MAX_NORM)
    theta_e = jnp.maximum(normu / sqrt_k, MIN_NORM)
    cosh_e = jnp.cosh(theta_e)
    g = jnp.sinh(theta_e) / theta_e
    scalars = jnp.stack([cosh_e, g, bsq]).astype(f32)      # (3,) -> SMEM

    vmem_limit = _vmem_limit_bytes()
    tm = _pick_row_tile(n, d_in, d_out, vmem_limit, tm_max=tm_max)
    grid = (pl.cdiv(n, tm),)                               # no pad / slice round-trips

    kernel = functools.partial(_hyp_linear_kernel, k=k)
    flops = 2 * n * d_in * d_out + 20 * n * (d_in + d_out)
    transcendentals = 2 * n
    bytes_accessed = 4 * (n * d_in + n * d_out + d_in * d_out + d_out + 3)

    out = pl.pallas_call(
        kernel,
        out_shape=jax.ShapeDtypeStruct((n, d_out), x.dtype),
        grid_spec=pltpu.PrefetchScalarGridSpec(
            num_scalar_prefetch=0,
            grid=grid,
            in_specs=[
                pl.BlockSpec((tm, d_in), lambda i: (i, 0)),
                pl.BlockSpec((d_in, d_out), lambda i: (0, 0)),   # weights resident across grid
                pl.BlockSpec((1, d_out), lambda i: (0, 0)),
                pl.BlockSpec(memory_space=pltpu.MemorySpace.SMEM),
            ],
            out_specs=pl.BlockSpec((tm, d_out), lambda i: (i, 0)),
        ),
        compiler_params=pltpu.CompilerParams(
            dimension_semantics=("parallel",),
            vmem_limit_bytes=int(vmem_limit),
        ),
        cost_estimate=pl.CostEstimate(
            flops=int(flops),
            transcendentals=int(transcendentals),
            bytes_accessed=int(bytes_accessed),
        ),
    )(x, wt, b_sp, scalars)
    return out


def _reference(x, w, b, k):
    """Literal HGCN-hyperboloid math for the same forward pass (independent check)."""
    sqrt_k = jnp.sqrt(jnp.float32(k))
    # logmap0
    y = x[:, 1:]
    y_norm = jnp.maximum(jnp.linalg.norm(y, axis=-1, keepdims=True), MIN_NORM)
    theta = jnp.maximum(x[:, 0:1] / sqrt_k, 1.0 + EPS)
    arcosh = jnp.log(theta + jnp.sqrt(theta * theta - 1.0))
    u = jnp.concatenate([jnp.zeros_like(x[:, :1]), sqrt_k * arcosh * y / y_norm], axis=-1)
    # matvec
    mu = jnp.dot(u, w.T, precision=jax.lax.Precision.HIGHEST)
    # expmap0
    z = mu[:, 1:]
    z_norm = jnp.maximum(jnp.linalg.norm(z, axis=-1, keepdims=True), MIN_NORM)
    th = z_norm / sqrt_k
    h = jnp.concatenate([sqrt_k * jnp.cosh(th), sqrt_k * jnp.sinh(th) * z / z_norm], axis=-1)
    # proj
    h_sp = h[:, 1:]
    h0 = jnp.sqrt(jnp.maximum(k + jnp.sum(h_sp * h_sp, axis=-1, keepdims=True), EPS))
    h = jnp.concatenate([h0, h_sp], axis=-1)
    # parallel transport of b from the origin to h
    yh = h[:, 1:]
    yh_norm = jnp.maximum(jnp.linalg.norm(yh, axis=-1, keepdims=True), MIN_NORM)
    y_hat = yh / yh_norm
    b_sp = b[1:][None, :]
    alpha = jnp.sum(y_hat * b_sp, axis=-1, keepdims=True) / sqrt_k
    v_sp = (sqrt_k - h[:, 0:1]) * y_hat
    res_sp = b_sp - alpha * v_sp
    # proj_tan at h
    pt0 = jnp.sum(yh * res_sp, axis=-1, keepdims=True) / jnp.maximum(h[:, 0:1], EPS)
    pt = jnp.concatenate([pt0, res_sp], axis=-1)
    # expmap at h
    mdot = jnp.sum(pt * pt, axis=-1, keepdims=True) - 2.0 * pt[:, 0:1] ** 2
    normu = jnp.minimum(jnp.sqrt(jnp.maximum(mdot, EPS)), MAX_NORM)
    theta_e = jnp.maximum(normu / sqrt_k, MIN_NORM)
    result = jnp.cosh(theta_e) * h + (jnp.sinh(theta_e) / theta_e) * pt
    # proj
    r_sp = result[:, 1:]
    r0 = jnp.sqrt(jnp.maximum(k + jnp.sum(r_sp * r_sp, axis=-1, keepdims=True), EPS))
    return jnp.concatenate([r0, r_sp], axis=-1)


if __name__ == "__main__":
    key = jax.random.PRNGKey(0)
    N, D_IN, D_OUT = 512, 64, 128          # lane-dense (128-wide) output
    K = 1.0
    k_sp, k_w, k_b = jax.random.split(key, 3)

    # Valid points on the curvature-K hyperboloid: time = sqrt(K + ||spatial||^2).
    spatial = 0.5 * jax.random.normal(k_sp, (N, D_IN - 1), dtype=jnp.float32)
    time = jnp.sqrt(K + jnp.sum(spatial * spatial, axis=-1, keepdims=True))
    x = jnp.concatenate([time, spatial], axis=-1)

    # xavier_uniform with gain sqrt(2), matching the torch init.
    limit = float(jnp.sqrt(2.0) * jnp.sqrt(6.0 / (D_IN + D_OUT)))
    w = jax.random.uniform(k_w, (D_OUT, D_IN), jnp.float32, -limit, limit)
    # torch init sets b = 0 (bias step then ~no-op); use a small nonzero b so the
    # transport / expmap path is actually exercised.
    b = 0.1 * jax.random.normal(k_b, (D_OUT,), dtype=jnp.float32)

    out = hyperbolic_linear(x, w, b, k=K, dropout_rate=0.5, training=False)
    jax.block_until_ready(out)

    ref = _reference(x, w, b, K)
    assert out.shape == (N, D_OUT)
    assert bool(jnp.all(jnp.isfinite(out)))
    assert jnp.allclose(out, ref, atol=2e-3, rtol=2e-3), float(
        jnp.max(jnp.abs(out - ref) / (jnp.abs(ref) + 1.0)))
    print("KERNEL_OK")
</pallas_src>

<mosaic_0001>
module attributes {stable_mosaic.version = 11 : i64} {
  func.func @_hyp_linear_kernel(%arg0: i32, %arg1: memref<256x64xf32, #tpu.memory_space<vmem>>, %arg2: memref<64x128xf32, #tpu.memory_space<vmem>>, %arg3: memref<1x128xf32, #tpu.memory_space<vmem>>, %arg4: memref<3xf32, #tpu.memory_space<smem>>, %arg5: memref<256x128xf32, #tpu.memory_space<vmem>>) attributes {dimension_semantics = [#tpu.dimension_semantics<parallel>], iteration_bounds = array<i64: 2>, scalar_prefetch = 0 : i64, scratch_operands = 0 : i64, tpu.core_type = #tpu.core_type<tc>, window_params = [{transform_indices = @transform_0, window_bounds = array<i64: 256, 64>}, {pipeline_mode = #tpu.pipeline_mode<synchronous>, transform_indices = @transform_1, window_bounds = array<i64: 64, 128>}, {pipeline_mode = #tpu.pipeline_mode<synchronous>, transform_indices = @transform_2, window_bounds = array<i64: 1, 128>}, {transform_indices = @transform_3, window_bounds = array<i64: 3>}, {transform_indices = @transform_4, window_bounds = array<i64: 256, 128>}]} {
    %c0 = arith.constant 0 : index
    %c0_0 = arith.constant 0 : index
    %0 = vector.load %arg1[%c0, %c0_0] : memref<256x64xf32, #tpu.memory_space<vmem>>, vector<256x64xf32>
    %c0_1 = arith.constant 0 : index
    %c0_2 = arith.constant 0 : index
    %1 = vector.load %arg2[%c0_1, %c0_2] : memref<64x128xf32, #tpu.memory_space<vmem>>, vector<64x128xf32>
    %c0_3 = arith.constant 0 : index
    %c0_4 = arith.constant 0 : index
    %2 = vector.load %arg3[%c0_3, %c0_4] : memref<1x128xf32, #tpu.memory_space<vmem>>, vector<1x128xf32>
    %c0_5 = arith.constant 0 : index
    %3 = memref.load %arg4[%c0_5] : memref<3xf32, #tpu.memory_space<smem>>
    %c1 = arith.constant 1 : index
    %4 = memref.load %arg4[%c1] : memref<3xf32, #tpu.memory_space<smem>>
    %c2 = arith.constant 2 : index
    %5 = memref.load %arg4[%c2] : memref<3xf32, #tpu.memory_space<smem>>
    %6 = vector.extract_strided_slice %0 {offsets = [0, 0], sizes = [256, 1], strides = [1, 1]} : vector<256x64xf32> to vector<256x1xf32>
    %7 = arith.mulf %0, %0 : vector<256x64xf32>
    %cst = arith.constant dense<0.000000e+00> : vector<256xf32>
    %8 = vector.multi_reduction <add>, %7, %cst [1] : vector<256x64xf32> to vector<256xf32>
    %9 = vector.shape_cast %8 : vector<256xf32> to vector<256x1xf32>
    %10 = arith.mulf %6, %6 : vector<256x1xf32>
    %11 = arith.subf %9, %10 : vector<256x1xf32>
    %cst_6 = arith.constant 0.000000e+00 : f32
    %12 = vector.broadcast %cst_6 : f32 to vector<256x1xf32>
    %13 = arith.maximumf %11, %12 : vector<256x1xf32>
    %14 = math.sqrt %13 : vector<256x1xf32>
    %cst_7 = arith.constant 1.000000e-15 : f32
    %15 = vector.broadcast %cst_7 : f32 to vector<256x1xf32>
    %16 = arith.maximumf %14, %15 : vector<256x1xf32>
    %cst_8 = arith.constant 1.000000e+00 : f32
    %17 = vector.broadcast %cst_8 : f32 to vector<256x1xf32>
    %18 = arith.mulf %6, %17 : vector<256x1xf32>
    %cst_9 = arith.constant 1.00000012 : f32
    %19 = vector.broadcast %cst_9 : f32 to vector<256x1xf32>
    %20 = arith.maximumf %18, %19 : vector<256x1xf32>
    %21 = arith.mulf %20, %20 : vector<256x1xf32>
    %cst_10 = arith.constant 1.000000e+00 : f32
    %22 = vector.broadcast %cst_10 : f32 to vector<256x1xf32>
    %23 = arith.subf %21, %22 : vector<256x1xf32>
    %24 = math.sqrt %23 : vector<256x1xf32>
    %25 = arith.addf %20, %24 : vector<256x1xf32>
    %26 = math.log %25 : vector<256x1xf32>
    %cst_11 = arith.constant 1.000000e+00 : f32
    %27 = vector.broadcast %cst_11 : f32 to vector<256x1xf32>
    %28 = arith.mulf %27, %26 : vector<256x1xf32>
    %29 = arith.divf %28, %16 : vector<256x1xf32>
    %30 = vector.broadcast %29 : vector<256x1xf32> to vector<256x64xf32>
    %31 = arith.mulf %30, %0 : vector<256x64xf32>
    %cst_12 = arith.constant dense<0.000000e+00> : vector<256x128xf32>
    %32 = tpu.matmul %31, %1, %cst_12 {dimension_numbers = #tpu.dot_dimension_numbers<[1], [0], [0], [1], [0, 0, 1, 1], [], []>, precision = #tpu.contract_precision<fp32>} : vector<256x64xf32>, vector<64x128xf32>, vector<256x128xf32> -> vector<256x128xf32>
    %33 = arith.mulf %32, %32 : vector<256x128xf32>
    %cst_13 = arith.constant dense<0.000000e+00> : vector<256xf32>
    %34 = vector.multi_reduction <add>, %33, %cst_13 [1] : vector<256x128xf32> to vector<256xf32>
    %35 = vector.shape_cast %34 : vector<256xf32> to vector<256x1xf32>
    %36 = math.sqrt %35 : vector<256x1xf32>
    %cst_14 = arith.constant 1.000000e-15 : f32
    %37 = vector.broadcast %cst_14 : f32 to vector<256x1xf32>
    %38 = arith.maximumf %36, %37 : vector<256x1xf32>
    %cst_15 = arith.constant 1.000000e+00 : f32
    %39 = vector.broadcast %cst_15 : f32 to vector<256x1xf32>
    %40 = arith.divf %39, %38 : vector<256x1xf32>
    %cst_16 = arith.constant 1.000000e+00 : f32
    %41 = vector.broadcast %cst_16 : f32 to vector<256x1xf32>
    %42 = arith.mulf %38, %41 : vector<256x1xf32>
    %43 = math.exp %42 : vector<256x1xf32>
    %cst_17 = arith.constant 1.000000e+00 : f32
    %44 = vector.broadcast %cst_17 : f32 to vector<256x1xf32>
    %45 = arith.divf %44, %43 : vector<256x1xf32>
    %46 = arith.mulf %42, %42 : vector<256x1xf32>
    %cst_18 = arith.constant 1.000000e-01 : f32
    %47 = vector.broadcast %cst_18 : f32 to vector<256x1xf32>
    %48 = arith.cmpf olt, %42, %47 : vector<256x1xf32>
    %cst_19 = arith.constant 0.166666672 : f32
    %49 = vector.broadcast %cst_19 : f32 to vector<256x1xf32>
    %50 = arith.mulf %46, %49 : vector<256x1xf32>
    %cst_20 = arith.constant 1.000000e+00 : f32
    %51 = vector.broadcast %cst_20 : f32 to vector<256x1xf32>
    %52 = arith.addf %51, %50 : vector<256x1xf32>
    %53 = arith.mulf %42, %52 : vector<256x1xf32>
    %54 = arith.subf %43, %45 : vector<256x1xf32>
    %cst_21 = arith.constant 5.000000e-01 : f32
    %55 = vector.broadcast %cst_21 : f32 to vector<256x1xf32>
    %56 = arith.mulf %55, %54 : vector<256x1xf32>
    %57 = arith.select %48, %53, %56 : vector<256x1xi1>, vector<256x1xf32>
    %cst_22 = arith.constant 5.000000e-01 : f32
    %58 = vector.broadcast %cst_22 : f32 to vector<256x1xf32>
    %59 = arith.mulf %58, %46 : vector<256x1xf32>
    %cst_23 = arith.constant 1.000000e+00 : f32
    %60 = vector.broadcast %cst_23 : f32 to vector<256x1xf32>
    %61 = arith.addf %60, %59 : vector<256x1xf32>
    %62 = arith.addf %43, %45 : vector<256x1xf32>
    %cst_24 = arith.constant 5.000000e-01 : f32
    %63 = vector.broadcast %cst_24 : f32 to vector<256x1xf32>
    %64 = arith.mulf %63, %62 : vector<256x1xf32>
    %65 = arith.select %48, %61, %64 : vector<256x1xi1>, vector<256x1xf32>
    %cst_25 = arith.constant 1.000000e+00 : f32
    %66 = vector.broadcast %cst_25 : f32 to vector<256x1xf32>
    %67 = arith.mulf %66, %65 : vector<256x1xf32>
    %cst_26 = arith.constant 1.000000e+00 : f32
    %68 = vector.broadcast %cst_26 : f32 to vector<256x1xf32>
    %69 = arith.mulf %68, %57 : vector<256x1xf32>
    %70 = arith.mulf %69, %40 : vector<256x1xf32>
    %71 = vector.broadcast %2 : vector<1x128xf32> to vector<256x128xf32>
    %72 = arith.mulf %32, %71 : vector<256x128xf32>
    %cst_27 = arith.constant dense<0.000000e+00> : vector<256xf32>
    %73 = vector.multi_reduction <add>, %72, %cst_27 [1] : vector<256x128xf32> to vector<256xf32>
    %74 = vector.shape_cast %73 : vector<256xf32> to vector<256x1xf32>
    %75 = arith.mulf %74, %40 : vector<256x1xf32>
    %cst_28 = arith.constant 1.000000e+00 : f32
    %76 = vector.broadcast %cst_28 : f32 to vector<256x1xf32>
    %77 = arith.mulf %75, %76 : vector<256x1xf32>
    %cst_29 = arith.constant 1.000000e+00 : f32
    %78 = vector.broadcast %cst_29 : f32 to vector<256x1xf32>
    %79 = arith.subf %78, %67 : vector<256x1xf32>
    %80 = arith.mulf %77, %79 : vector<256x1xf32>
    %81 = arith.mulf %80, %40 : vector<256x1xf32>
    %82 = vector.broadcast %3 : f32 to vector<256x1xf32>
    %83 = arith.mulf %82, %70 : vector<256x1xf32>
    %84 = vector.broadcast %4 : f32 to vector<256x1xf32>
    %85 = arith.mulf %84, %81 : vector<256x1xf32>
    %86 = arith.subf %83, %85 : vector<256x1xf32>
    %87 = vector.broadcast %86 : vector<256x1xf32> to vector<256x128xf32>
    %88 = arith.mulf %87, %32 : vector<256x128xf32>
    %89 = vector.broadcast %4 : f32 to vector<1x128xf32>
    %90 = arith.mulf %89, %2 : vector<1x128xf32>
    %91 = vector.broadcast %90 : vector<1x128xf32> to vector<256x128xf32>
    %92 = arith.addf %88, %91 : vector<256x128xf32>
    %93 = arith.mulf %86, %86 : vector<256x1xf32>
    %94 = arith.mulf %93, %35 : vector<256x1xf32>
    %cst_30 = arith.constant 2.000000e+00 : f32
    %95 = arith.mulf %cst_30, %4 : f32
    %96 = vector.broadcast %95 : f32 to vector<256x1xf32>
    %97 = arith.mulf %96, %86 : vector<256x1xf32>
    %98 = arith.mulf %97, %74 : vector<256x1xf32>
    %99 = arith.addf %94, %98 : vector<256x1xf32>
    %100 = arith.mulf %4, %4 : f32
    %101 = arith.mulf %100, %5 : f32
    %102 = vector.broadcast %101 : f32 to vector<256x1xf32>
    %103 = arith.addf %99, %102 : vector<256x1xf32>
    %cst_31 = arith.constant 1.000000e+00 : f32
    %104 = vector.broadcast %cst_31 : f32 to vector<256x1xf32>
    %105 = arith.addf %104, %103 : vector<256x1xf32>
    %cst_32 = arith.constant 1.000000e-07 : f32
    %106 = vector.broadcast %cst_32 : f32 to vector<256x1xf32>
    %107 = arith.maximumf %105, %106 : vector<256x1xf32>
    %108 = math.sqrt %107 : vector<256x1xf32>
    %109 = tpu.iota {dimensions = array<i32: 1>} : vector<1x128xi32>
    %c0_i32 = arith.constant 0 : i32
    %110 = vector.broadcast %c0_i32 : i32 to vector<1x128xi32>
    %111 = arith.cmpi eq, %109, %110 : vector<1x128xi32>
    %112 = vector.shape_cast %111 : vector<1x128xi1> to vector<1x128xi1>
    %113 = vector.broadcast %112 : vector<1x128xi1> to vector<256x128xi1>
    %114 = vector.shape_cast %108 : vector<256x1xf32> to vector<256x1xf32>
    %115 = vector.broadcast %114 : vector<256x1xf32> to vector<256x128xf32>
    %116 = arith.select %113, %115, %92 : vector<256x128xi1>, vector<256x128xf32>
    %c0_33 = arith.constant 0 : index
    %c0_34 = arith.constant 0 : index
    %117 = vector.load %arg5[%c0_33, %c0_34] : memref<256x128xf32, #tpu.memory_space<vmem>>, vector<256x128xf32>
    tpu.vector_store %arg5[%c0_33, %c0_34], %116 {strides = array<i32>} : memref<256x128xf32, #tpu.memory_space<vmem>>, vector<256x128xf32>,
    return
  }
  func.func @transform_0(%arg0: i32) -> (i32, i32) {
    %c0_i32 = arith.constant 0 : i32
    %c0_i32_0 = arith.constant 0 : i32
    return %arg0, %c0_i32 : i32, i32
  }
  func.func @transform_1(%arg0: i32) -> (i32, i32) {
    %c0_i32 = arith.constant 0 : i32
    %c0_i32_0 = arith.constant 0 : i32
    %c0_i32_1 = arith.constant 0 : i32
    return %c0_i32, %c0_i32_0 : i32, i32
  }
  func.func @transform_2(%arg0: i32) -> (i32, i32) {
    %c0_i32 = arith.constant 0 : i32
    %c0_i32_0 = arith.constant 0 : i32
    %c0_i32_1 = arith.constant 0 : i32
    return %c0_i32, %c0_i32_0 : i32, i32
  }
  func.func @transform_3(%arg0: i32) -> i32 {
    %c0_i32 = arith.constant 0 : i32
    %c0_i32_0 = arith.constant 0 : i32
    return %c0_i32 : i32
  }
  func.func @transform_4(%arg0: i32) -> (i32, i32) {
    %c0_i32 = arith.constant 0 : i32
    %c0_i32_0 = arith.constant 0 : i32
    return %arg0, %c0_i32 : i32, i32
  }
}

</mosaic_0001>

<bundles_post_ra>
// kernel: tpu_custom_call.1
= control target key start
LH: loop header
LB: loop body
LE: loop exit
PB: predicated region body
PF: predicated region fallthrough
CT: control target
= control target key end

     0   :  { %9 = vsyncpa [#allocation4], 0  ;;  %s11319_s0 = inlined_call_operand.vmem [shape: f32[512,64], index: 0, kind: input, shape index: {}]   ;;  %s11320_s1 = inlined_call_operand.vmem [shape: f32[64,128], index: 1, kind: input, shape index: {}]   ;;  %s11321_s2 = inlined_call_operand.vmem [shape: f32[1,128], index: 2, kind: input, shape index: {}]   ;;  %s11322_s3 = inlined_call_operand.vmem [shape: f32[3], index: 3, kind: input, shape index: {}]   ;;  %s11323_s4 = inlined_call_operand.hbm [shape: f32[512,128], index: 4, kind: output, shape index: {}]  }
   0x1   :  { %10 = vsyncpa [#allocation3], 0 }
   0x2   :  { %12 = vsyncpa [#allocation3 + $0x1], 0  ;;  %s7082_s15 = smov 0   ;;  %s7084_s16 = smov 0  }
   0x3   :  { %s7086_s17 = smov 0   ;;  %s7088_s18 = smov 0  }
   0x4 LB: > { %s7103_s19 = sadd.s32 4294967295, %s7050_s18   ;;  %s5377_s20 = sadd.s32 4294967294, %s7050_s18   ;;  %s7050_s18 = sphi %s7088_s18, %s11703_s18   ;;  %s7046_s17 = sphi %s7086_s17, %s11702_s17   ;;  %s7042_s16 = sphi %s7084_s16, %s11701_s16   ;;  %s7038_s15 = sphi %s7082_s15, %s11700_s15  }
   0x5   : > { %s7107_s21 = sadd.s32 1, %s7050_s18   ;;  %s114_s22 = sadd.s32 1, %s7046_s17 }
   0x6   : > { %s111_s23 = ssub.s32 %s7050_s18, %s7107_s21  ;;  %p124_p0 = scmp.ne.s32.totalorder %s7046_s17, %s7042_s16 }
   0x7   : > { %p112_p1 = scmp.eq.s32.totalorder %s111_s23, 0  ;;  %p125_p2 = scmp.eq.s32.totalorder %s7103_s19, 1 }
   0x8   : > { %p130_p3 = scmp.ne.s32.totalorder %s7042_s16, %s7038_s15  ;;  %p131_p4 = scmp.eq.s32.totalorder %s5377_s20, 1 }
   0x9   : > { %s7118_s24 = scalar_select %p112_p1, %s7046_s17, %s114_s22  }
   0xa   : > { %p7120_p5 = por %p125_p2, %p124_p0  ;;  %p7124_p6 = por %p131_p4, %p130_p3 }
   0xb   : > { %p5378_p7 = scmp.ge.s32.totalorder %s7050_s18, 1  ;;  %p138_p8 = scmp.lt.s32.totalorder %s7050_s18, 3 }
   0xc   : > { %p6320_p9 = scmp.eq.s32.totalorder %s7103_s19, 0  ;;  %s157_s30 = sshll.u32 %s11322_s3, 4  ;;  %s158_s30 = int_to_ptr.vmem [resolvable:$true] %s157_s30 }
   0xd   : > { %p7131_p10 = pnand %p5378_p7, %p138_p8  ;;  %s6969_s5 = scalar_lea.vmem %s158_s30, 16 }
   0xe   : > { %p6970_p13 = scmp.ne.s32.totalorder %s158_s30, %s6969_s5  ;;  %p6977_p3 = scmp.lt.s32.totalorder %s158_s30, %s158_s30 }
   0xf   : > { %p6312_p11 = pneg %p7131_p10  ;;  %p6978_p4 = scmp.lt.s32.totalorder %s6969_s5, %s6969_s5 }
  0x11   : > { %p6313_p12 = pnand %p6320_p9, %p6312_p11  ;;  %p6979_p7 = por %p6978_p4, %p6977_p3 }
  0x13   : > { %p6971_p0 = pneg %p6313_p12 }
  0x15   : > { %p6972_p1 = pnand %p6971_p0, %p6970_p13 }
  0x17   : > { %p6973_p2 = pneg %p6972_p1 }
  0x19   : > { %p6980_p8 = pnand %p6979_p7, %p6973_p2 }
  0x1b   : > { %6983 = shalt.err (!%p6980_p8)
}
  0x1c   : > { %s7052_s6 = smov [#allocation2]   ;;  %179 = sbr.rel (%p7131_p10) target bundleno = 1341 (0x53d), region = 36 }
  0x1d   : > { %6315 = dma.vmem_to_smem (!%p6313_p12), %s158_s30, 16, %s7052_s6, [#allocation4]  }
  0x23   : > { %7029 = dma.done.wait (%p6320_p9), [#allocation4], 16  }
  0x24   : > { %7031 = vsyncadd (%p6320_p9), [#allocation4], 4294967280 }
  0x25   : > { %185 = sfence }
  0x26   : > { %s5384_s7 = sshll.u32 %s7103_s19, 5  ;;  %vm289_vm0 = vcmask 523264   ;;  %s254_s14 = sld [smem:[#allocation2]] }
  0x27   : > { %p207_p11 = scmp.lt.s32.totalorder %s5384_s7, 63  ;;  %s9471_s22 = sld [smem:[#allocation2 + $0x2]] }
  0x28   : > { %s203_s28 = sand.u32 1, %s7042_s16   ;;  %s5425_s5 = sshll.u32 %s7103_s19, 12 }
  0x29   : > { %s11705_s7 = smov (!%p207_p11, %s5384_s7), 63  ;;  %s5383_s29 = sshll.u32 %s203_s28, 8 }
  0x2a   : > { %s5385_s8 = sshll.u32 %s11705_s7, 3  ;;  %s9785_s30 = scalar_lea.vmem [#allocation5], %s5383_s29 }
  0x2b   : > { %s7152_s11 = scalar_lea.vmem %s11319_s0, %s5385_s8  ;;  %s5303_s6 = sshll.u32 %s9785_s30, 4  ;;  %s11271_s6 = int_to_ptr.vmem [resolvable:$true] %s5303_s6 }
  0x2c   : > { %v215_v0 = vld [vmem:[%s7152_s11 + $0x10] sm:$0xff]  ;;  %v213_v1 = vld [vmem:[%s7152_s11] sm:$0xff]  ;;  %v216_v2 = vld [vmem:[%s7152_s11 + $0x18] sm:$0xff]  ;;  %s11269_s9 = scalar_lea.hbm %s11323_s4, %s5425_s5  ;;  %s11278_s19 = scalar_lea.sflag [#allocation3], %s203_s28 }
  0x2d   : > { %v7157_v3 = vmul.f32 %v215_v0, %v215_v0  ;;  %v7159_v4 = vmul.f32 %v213_v1, %v213_v1  ;;  %v214_v5 = vld [vmem:[%s7152_s11 + $0x8] sm:$0xff]  ;;  %v7162_v6 = vmul.f32 %v216_v2, %v216_v2  ;;  %v7172_v11 = vld [vmem:[%s7152_s11 + $0x20] sm:$0xff]  ;;  %v7185_v16 = vld [vmem:[%s7152_s11 + $0x38] sm:$0xff]  ;;  %v7247_v37 = vmax.f32 %v215_v0, 1.0000001  ;;  %s6984_s10 = scalar_lea.vmem %s11271_s6, 4096 }
  0x2e   : > { %v7164_v7 = vmul.f32 %v214_v5, %v214_v5  ;;  %v218_v10 = vld [vmem:[%s7152_s11 + $0x28] sm:$0xff]  ;;  %v7182_v15 = vmul.f32 %v7172_v11, %v7172_v11  ;;  %v7188_v17 = vld [vmem:[%s7152_s11 + $0x30] sm:$0xff]  ;;  %v7199_v21 = vmul.f32 %v7185_v16, %v7185_v16  ;;  %v7216_v27 = vld [vmem:[%s7152_s11 + $0x40] sm:$0xff]  ;;  %v7249_v38 = vmax.f32 %v213_v1, 1.0000001  ;;  %p6985_p9 = scmp.ne.s32.totalorder %s11271_s6, %s6984_s10 }
  0x2f   : > { %11458 = vst [vmem:[#allocation8_spill] sm:$0xff] %v7162_v6  ;;  %v296_v8 = vsel %vm289_vm0, %v7157_v3, 0.0  ;;  %v290_v9 = vsel %vm289_vm0, %v7159_v4, 0.0  ;;  %v299_v12 = vsel %vm289_vm0, %v7162_v6, 0.0  ;;  %v7178_v14 = vmul.f32 %v218_v10, %v218_v10  ;;  %v7191_v18 = vld [vmem:[%s7152_s11 + $0x48] sm:$0xff]  ;;  %v7219_v28 = vld [vmem:[%s7152_s11 + $0x58] sm:$0xff] }
  0x30   : > { %11459 = vst [vmem:[#allocation9_spill] sm:$0xff] %v7164_v7  ;;  %297 = vadd.xlane.f32.xlu1 %v296_v8  ;;  %291 = vadd.xlane.f32.xlu0 %v290_v9  ;;  %v293_v13 = vsel %vm289_vm0, %v7164_v7, 0.0  ;;  %11461 = vst [vmem:[#allocation11_spill] sm:$0xff] %v7182_v15  ;;  %v302_v20 = vsel %vm289_vm0, %v7182_v15, 0.0  ;;  %v7203_v22 = vmul.f32 %v7188_v17, %v7188_v17  ;;  %v311_v24 = vsel %vm289_vm0, %v7199_v21, 0.0  ;;  %v7234_v33 = vld [vmem:[%s7152_s11 + $0x50] sm:$0xff]  ;;  %p6986_p10 = pnand %p6985_p9, %p7120_p5 }
  0x31   : > { %11460 = vst [vmem:[#allocation10_spill] sm:$0xff] %v7178_v14  ;;  %v305_v19 = vsel %vm289_vm0, %v7178_v14, 0.0  ;;  %11462 = vst [vmem:[#allocation12_spill] sm:$0xff] %v7199_v21  ;;  %v7207_v23 = vmul.f32 %v7191_v18, %v7191_v18  ;;  %v7223_v29 = vmul.f32 %v7216_v27, %v7216_v27  ;;  %v7227_v30 = vmul.f32 %v7219_v28, %v7219_v28  ;;  %v7237_v34 = vld [vmem:[%s7152_s11 + $0x68] sm:$0xff]  ;;  %v7256_v41 = vld [vmem:[%s7152_s11 + $0x60] sm:$0xff] }
  0x32   : > { %11463 = vst [vmem:[#allocation13_spill] sm:$0xff] %v7203_v22  ;;  %v308_v25 = vsel %vm289_vm0, %v7203_v22, 0.0  ;;  %v7241_v35 = vmul.f32 %v7234_v33, %v7234_v33  ;;  %v7245_v36 = vmul.f32 %v7237_v34, %v7237_v34  ;;  %v7258_v42 = vmax.f32 %v216_v2, 1.0000001  ;;  %v7261_v43 = vld [vmem:[%s7152_s11 + $0x78] sm:$0xff]  ;;  %v7264_v44 = vld [vmem:[%s7152_s11 + $0x70] sm:$0xff]  ;;  %p6987_p12 = pneg %p6986_p10 }
  0x33   : > { %11464 = vst [vmem:[#allocation14_spill] sm:$0xff] %v7207_v23  ;;  %v317_v26 = vsel %vm289_vm0, %v7207_v23, 0.0  ;;  %11465 = vst [vmem:[#allocation15_spill] sm:$0xff] %v7223_v29  ;;  %v314_v31 = vsel %vm289_vm0, %v7223_v29, 0.0  ;;  %v323_v32 = vsel %vm289_vm0, %v7227_v30, 0.0  ;;  %v740_v45 = vmul.f32 %v7247_v37, %v7247_v37  ;;  %v7293_v55 = vld [vmem:[%s7152_s11 + $0x88] sm:$0xff] }
  0x34   : > { %300 = vadd.xlane.f32.xlu1 %v299_v12  ;;  %294 = vadd.xlane.f32.xlu0 %v293_v13  ;;  %11466 = vst [vmem:[#allocation16_spill] sm:$0xff] %v7227_v30  ;;  %11467 = vst [vmem:[#allocation17_spill] sm:$0xff] %v7241_v35  ;;  %v320_v39 = vsel %vm289_vm0, %v7241_v35, 0.0  ;;  %v329_v40 = vsel %vm289_vm0, %v7245_v36, 0.0  ;;  %v7270_v46 = vmul.f32 %v7256_v41, %v7256_v41  ;;  %v7274_v48 = vmax.f32 %v214_v5, 1.0000001 }
  0x35   : > { %11468 = vst [vmem:[#allocation18_spill] sm:$0xff] %v7245_v36  ;;  %v738_v47 = vmul.f32 %v7249_v38, %v7249_v38  ;;  %v7278_v49 = vmul.f32 %v7261_v43, %v7261_v43  ;;  %v7282_v50 = vmul.f32 %v7264_v44, %v7264_v44  ;;  %v741_v51 = vmul.f32 %v7258_v42, %v7258_v42  ;;  %v7317_v0 = vld [vmem:[%s7152_s11 + $0x80] sm:$0xff]  ;;  %v7320_v1 = vld [vmem:[%s7152_s11 + $0x98] sm:$0xff] }
  0x36   : > { %11469 = vst [vmem:[#allocation19_spill] sm:$0xff] %v7270_v46  ;;  %v326_v52 = vsel %vm289_vm0, %v7270_v46, 0.0  ;;  %v7288_v53 = vadd.f32 -1.0, %v740_v45  ;;  %v739_v57 = vmul.f32 %v7274_v48, %v7274_v48  ;;  %v7303_v60 = vmax.f32 %v218_v10, 1.0000001 }
  0x37   : > { %11470 = vst [vmem:[#allocation20_spill] sm:$0xff] %v7278_v49  ;;  %11471 = vst [vmem:[#allocation21_spill] sm:$0xff] %v7282_v50  ;;  %v335_v54 = vsel %vm289_vm0, %v7278_v49, 0.0  ;;  %v7295_v56 = vadd.f32 -1.0, %v738_v47  ;;  %v332_v58 = vsel %vm289_vm0, %v7282_v50, 0.0  ;;  %v7301_v59 = vadd.f32 -1.0, %v741_v51 }
  0x38   : > { %306 = vadd.xlane.f32.xlu1 %v305_v19  ;;  %303 = vadd.xlane.f32.xlu0 %v302_v20  ;;  %v7307_v61 = vmul.f32 %v7293_v55, %v7293_v55  ;;  %6361 = vrsqrt.f32 %v7288_v53  ;;  %v7311_v62 = vmax.f32 %v7172_v11, 1.0000001  ;;  %v7314_v63 = vadd.f32 -1.0, %v739_v57  ;;  %v7349_v19 = vld [vmem:[%s7152_s11 + $0x90] sm:$0xff] }
  0x39   : > { %6363 = vrsqrt.f32 %v7295_v56  ;;  %v743_v2 = vmul.f32 %v7303_v60, %v7303_v60  ;;  %v7326_v5 = vmax.f32 %v7185_v16, 1.0000001  ;;  %v7333_v10 = vmax.f32 %v7188_v17, 1.0000001 }
  0x3a   : > { %11472 = vst [vmem:[#allocation22_spill] sm:$0xff] %v7307_v61  ;;  %6365 = vrsqrt.f32 %v7301_v59  ;;  %v341_v8 = vsel %vm289_vm0, %v7307_v61, 0.0  ;;  %v742_v9 = vmul.f32 %v7311_v62, %v7311_v62  ;;  %v7337_v11 = vmul.f32 %v7317_v0, %v7317_v0 }
  0x3b   : > { %v7341_v12 = vmul.f32 %v7320_v1, %v7320_v1  ;;  %6367 = vrsqrt.f32 %v7314_v63  ;;  %v7351_v17 = vadd.f32 -1.0, %v743_v2  ;;  %v745_v20 = vmul.f32 %v7326_v5, %v7326_v5 }
  0x3c   : > { %312 = vadd.xlane.f32.xlu1 %v311_v24  ;;  %309 = vadd.xlane.f32.xlu0 %v308_v25  ;;  %11473 = vst [vmem:[#allocation23_spill] sm:$0xff] %v7337_v11  ;;  %v338_v13 = vsel %vm289_vm0, %v7337_v11, 0.0  ;;  %v7355_v24 = vadd.f32 -1.0, %v742_v9  ;;  %v744_v25 = vmul.f32 %v7333_v10, %v7333_v10  ;;  %vm818_vm1 = vcmp.eq.f32.partialorder %v7288_v53, inf  ;;  %v7397_v9 = vld [vmem:[%s7152_s11 + $0xb8] sm:$0xff] }
  0x3d   : > { %11474 = vst [vmem:[#allocation24_spill] sm:$0xff] %v7341_v12  ;;  %v347_v16 = vsel %vm289_vm0, %v7341_v12, 0.0  ;;  %vm820_vm2 = vcmp.eq.f32.partialorder %v7288_v53, 0.0  ;;  %vm804_vm3 = vcmp.eq.f32.partialorder %v7295_v56, inf  ;;  %6369 = vrsqrt.f32 %v7351_v17 }
  0x3e   : > { %6371 = vrsqrt.f32 %v7355_v24  ;;  %v7374_v47 = vadd.f32 -1.0, %v744_v25  ;;  %vm806_vm4 = vcmp.eq.f32.partialorder %v7295_v56, 0.0  ;;  %vm825_vm5 = vcmp.eq.f32.partialorder %v7301_v59, inf }
  0x3f   : > { %vm827_vm6 = vcmp.eq.f32.partialorder %v7301_v59, 0.0  ;;  %vm811_vm7 = vcmp.eq.f32.partialorder %v7314_v63, inf  ;;  %v7403_v25 = vmax.f32 %v7219_v28, 1.0000001  ;;  %vm813_vm8 = vcmp.eq.f32.partialorder %v7314_v63, 0.0 }
  0x40   : > { %318 = vadd.xlane.f32.xlu1 %v317_v26  ;;  %315 = vadd.xlane.f32.xlu0 %v314_v31  ;;  %v7360_v26 = vmax.f32 %v7191_v18, 1.0000001  ;;  %v7364_v31 = vmul.f32 %v7349_v19, %v7349_v19  ;;  %v7371_v18 = vadd.f32 -1.0, %v745_v20  ;;  %v7422_v28 = vmul.f32 %v7397_v9, %v7397_v9 }
  0x41   : > { %vm839_vm9 = vcmp.eq.f32.partialorder %v7351_v17, inf  ;;  %v749_v50 = vmul.f32 %v7403_v25, %v7403_v25  ;;  %v7437_v49 = vmax.f32 %v7234_v33, 1.0000001  ;;  %vm841_vm10 = vcmp.eq.f32.partialorder %v7351_v17, 0.0 }
  0x42   : > { %11475 = vst [vmem:[#allocation25_spill] sm:$0xff] %v7364_v31  ;;  %v747_v51 = vmul.f32 %v7360_v26, %v7360_v26  ;;  %v344_v57 = vsel %vm289_vm0, %v7364_v31, 0.0  ;;  %6373 = vrsqrt.f32 %v7371_v18  ;;  %11478 = vst [vmem:[#allocation28_spill] sm:$0xff] %v7422_v28  ;;  %vm832_vm11 = vcmp.eq.f32.partialorder %v7355_v24, inf }
  0x43   : > { %6375 = vrsqrt.f32 %v7374_v47  ;;  %vm834_vm12 = vcmp.eq.f32.partialorder %v7355_v24, 0.0  ;;  %vm853_vm13 = vcmp.eq.f32.partialorder %v7371_v18, inf  ;;  %v7465_v35 = vadd.f32 -1.0, %v749_v50 }
  0x44   : > { %324 = vadd.xlane.f32.xlu1 %v323_v32  ;;  %321 = vadd.xlane.f32.xlu0 %v320_v39  ;;  %v6362_v32 = vpop.eup %6361  ;;  %vm846_vm14 = vcmp.eq.f32.partialorder %v7374_v47, inf  ;;  %vm855_vm15 = vcmp.eq.f32.partialorder %v7371_v18, 0.0 }
  0x45   : > { %v6364_v39 = vpop.eup %6363  ;;  %v817_v2 = vmul.f32 %v6362_v32, %v7288_v53  ;;  %v7406_v32 = vadd.f32 -1.0, %v747_v51 }
  0x46   : > { %v6366_v45 = vpop.eup %6365 }
  0x47   : > { %v824_v20 = vmul.f32 %v6366_v45, %v7301_v59  ;;  %v819_v51 = vsel %vm818_vm1, %v7288_v53, %v817_v2  ;;  %6377 = vrsqrt.f32 %v7406_v32  ;;  %vm848_vm1 = vcmp.eq.f32.partialorder %v7374_v47, 0.0 }
  0x48   : > { %330 = vadd.xlane.f32.xlu1 %v329_v40  ;;  %327 = vadd.xlane.f32.xlu0 %v326_v52  ;;  %v821_v40 = vand.u32 2147483648, %v7288_v53  ;;  %v7379_v52 = vmax.f32 %v7216_v27, 1.0000001  ;;  %v7394_v27 = vld [vmem:[%s7152_s11 + $0xa0] sm:$0xff]  ;;  %v748_v53 = vmul.f32 %v7437_v49, %v7437_v49 }
  0x49   : > { %v7418_v45 = vmul.f32 %v7394_v27, %v7394_v27  ;;  %v7709_v29 = vmax.f32 %v7394_v27, 1.0000001  ;;  %v7726_v27 = vmax.f32 %v7397_v9, 1.0000001 }
  0x4b   : > { %11477 = vst [vmem:[#allocation27_spill] sm:$0xff] %v7418_v45  ;;  %v350_v2 = vsel %vm289_vm0, %v7418_v45, 0.0  ;;  %v758_v9 = vmul.f32 %v7709_v29, %v7709_v29 }
  0x4c   : > { %336 = vadd.xlane.f32.xlu1 %v335_v54  ;;  %333 = vadd.xlane.f32.xlu0 %v332_v58  ;;  %v807_v54 = vand.u32 2147483648, %v7295_v56  ;;  %v7387_v58 = vld [vmem:[%s7152_s11 + $0xa8] sm:$0xff] }
  0x4d   : > { %v7412_v31 = vmul.f32 %v7387_v58, %v7387_v58 }
  0x4f   : > { %11476 = vst [vmem:[#allocation26_spill] sm:$0xff] %v7412_v31  ;;  %v353_v11 = vsel %vm289_vm0, %v7412_v31, 0.0 }
  0x50   : > { %342 = vadd.xlane.f32.xlu1 %v341_v8  ;;  %339 = vadd.xlane.f32.xlu0 %v338_v13  ;;  %v828_v8 = vand.u32 2147483648, %v7301_v59  ;;  %v6368_v13 = vpop.eup %6367 }
  0x51   : > { %v810_v12 = vmul.f32 %v6368_v13, %v7314_v63  ;;  %v826_v13 = vsel %vm825_vm5, %v7301_v59, %v824_v20  ;;  %v6370_v33 = vpop.eup %6369  ;;  %v835_v20 = vand.u32 2147483648, %v7355_v24 }
  0x52   : > { %v6372_v45 = vpop.eup %6371  ;;  %v829_v36 = vsel %vm827_vm6, %v828_v8, %v826_v13  ;;  %vm881_vm6 = vcmp.eq.f32.partialorder %v7465_v35, inf }
  0x53   : > { %v6374_v50 = vpop.eup %6373  ;;  %v831_v8 = vmul.f32 %v6372_v45, %v7355_v24  ;;  %v7493_v13 = vadd.f32 %v829_v36, %v7258_v42  ;;  %v7523_v45 = vld [vmem:[%s7152_s11 + $0xd8] sm:$0xff] }
  0x54   : > { %348 = vadd.xlane.f32.xlu1 %v347_v16  ;;  %345 = vadd.xlane.f32.xlu0 %v344_v57  ;;  %v803_v16 = vmul.f32 %v6364_v39, %v7295_v56  ;;  %v746_v57 = vmul.f32 %v7379_v52, %v7379_v52  ;;  %v814_v39 = vand.u32 2147483648, %v7314_v63 }
  0x56   : > { %v805_v61 = vsel %vm804_vm3, %v7295_v56, %v803_v16  ;;  %v7446_v31 = vadd.f32 -1.0, %v746_v57  ;;  %v359_v16 = vsel %vm289_vm0, %v7422_v28, 0.0  ;;  %v822_v57 = vsel %vm820_vm2, %v821_v40, %v819_v51  ;;  %v7476_v56 = vld [vmem:[%s7152_s11 + $0xb0] sm:$0xff] }
  0x57   : > { %v808_v46 = vsel %vm806_vm4, %v807_v54, %v805_v61  ;;  %v838_v40 = vmul.f32 %v6370_v33, %v7351_v17  ;;  %v7479_v61 = vld [vmem:[%s7152_s11 + $0xc8] sm:$0xff]  ;;  %v7482_v59 = vadd.f32 %v822_v57, %v7247_v37  ;;  %v849_v37 = vand.u32 2147483648, %v7374_v47 }
  0x58   : > { %354 = vadd.xlane.f32.xlu1 %v353_v11  ;;  %351 = vadd.xlane.f32.xlu0 %v350_v2  ;;  %v842_v11 = vand.u32 2147483648, %v7351_v17  ;;  %v812_v2 = vsel %vm811_vm7, %v7314_v63, %v810_v12  ;;  %6379 = vrsqrt.f32 %v7446_v31  ;;  %v7473_v12 = vmax.f32 %v7237_v34, 1.0000001  ;;  %v6376_v34 = vpop.eup %6375 }
  0x59   : > { %v815_v54 = vsel %vm813_vm8, %v814_v39, %v812_v2  ;;  %v7490_v51 = vadd.f32 %v808_v46, %v7249_v38  ;;  %6381 = vrsqrt.f32 %v7465_v35  ;;  %v7500_v63 = vadd.f32 -1.0, %v748_v53  ;;  %v7511_v46 = vld [vmem:[%s7152_s11 + $0xc0] sm:$0xff]  ;;  %v6378_v53 = vpop.eup %6377 }
  0x5a   : > { %v7504_v39 = vmul.f32 %v7476_v56, %v7476_v56  ;;  %v7508_v38 = vmul.f32 %v7479_v61, %v7479_v61  ;;  %v7514_v36 = vadd.f32 %v815_v54, %v7274_v48  ;;  %vm867_vm2 = vcmp.eq.f32.partialorder %v7406_v32, inf }
  0x5b   : > { %v751_v42 = vmul.f32 %v7473_v12, %v7473_v12  ;;  %v833_v33 = vsel %vm832_vm11, %v7355_v24, %v831_v8  ;;  %v852_v57 = vmul.f32 %v6374_v50, %v7371_v18  ;;  %v845_v48 = vmul.f32 %v6376_v34, %v7374_v47 }
  0x5c   : > { %360 = vadd.xlane.f32.xlu1 %v359_v16  ;;  %v7497_v16 = vmax.f32 %v7256_v41, 1.0000001  ;;  %11479 = vst [vmem:[#allocation29_spill] sm:$0xff] %v7504_v39  ;;  %11480 = vst [vmem:[#allocation30_spill] sm:$0xff] %v7508_v38  ;;  %v840_v41 = vsel %vm839_vm9, %v7351_v17, %v838_v40  ;;  %v356_v2 = vsel %vm289_vm0, %v7504_v39, 0.0  ;;  %v365_v28 = vsel %vm289_vm0, %v7508_v38, 0.0 }
  0x5d   : > { %v7535_v54 = vmax.f32 %v7261_v43, 1.0000001  ;;  %357 = vadd.xlane.f32.xlu0 %v356_v2  ;;  %v7541_v50 = vmul.f32 %v7511_v46, %v7511_v46  ;;  %v843_v8 = vsel %vm841_vm10, %v842_v11, %v840_v41  ;;  %vm869_vm3 = vcmp.eq.f32.partialorder %v7406_v32, 0.0 }
  0x5e   : > { %v750_v40 = vmul.f32 %v7497_v16, %v7497_v16  ;;  %6383 = vrsqrt.f32 %v7500_v63  ;;  %v7549_v43 = vmul.f32 %v7523_v45, %v7523_v45  ;;  %v836_v34 = vsel %vm834_vm12, %v835_v20, %v833_v33  ;;  %v7569_v20 = vld [vmem:[%s7152_s11 + $0xd0] sm:$0xff] }
  0x5f   : > { %11481 = vst [vmem:[#allocation31_spill] sm:$0xff] %v7541_v50  ;;  %v870_v2 = vand.u32 2147483648, %v7406_v32  ;;  %v7554_v38 = vadd.f32 -1.0, %v751_v42  ;;  %v362_v17 = vsel %vm289_vm0, %v7541_v50, 0.0  ;;  %v854_v11 = vsel %vm853_vm13, %v7371_v18, %v852_v57 }
  0x60   : > { %366 = vadd.xlane.f32.xlu1 %v365_v28  ;;  %11482 = vst [vmem:[#allocation32_spill] sm:$0xff] %v7549_v43  ;;  %v847_v28 = vsel %vm846_vm14, %v7374_v47, %v845_v48  ;;  %v866_v41 = vmul.f32 %v6378_v53, %v7406_v32  ;;  %v7566_v24 = vmax.f32 %v7264_v44, 1.0000001  ;;  %v7572_v33 = vadd.f32 %v843_v8, %v7303_v60 }
  0x61   : > { %vm860_vm4 = vcmp.eq.f32.partialorder %v7446_v31, inf  ;;  %v7575_v50 = vadd.f32 -1.0, %v750_v40  ;;  %v753_v57 = vmul.f32 %v7535_v54, %v7535_v54  ;;  %363 = vadd.xlane.f32.xlu0 %v362_v17  ;;  %v7580_v48 = vadd.f32 %v836_v34, %v7311_v62 }
  0x62   : > { %v6380_v42 = vpop.eup %6379  ;;  %vm862_vm5 = vcmp.eq.f32.partialorder %v7446_v31, 0.0  ;;  %v863_v44 = vand.u32 2147483648, %v7446_v31  ;;  %v371_v60 = vsel %vm289_vm0, %v7549_v43, 0.0  ;;  %v11483_v53 = vand.u32 2147483648, %v7371_v18 }
  0x63   : > { %v850_v8 = vsel %vm848_vm1, %v849_v37, %v847_v28  ;;  %6385 = vrsqrt.f32 %v7554_v38  ;;  %v7595_v62 = vmul.f32 %v7569_v20, %v7569_v20  ;;  %v6382_v34 = vpop.eup %6381  ;;  %v868_v17 = vsel %vm867_vm2, %v7406_v32, %v866_v41  ;;  %v7607_v37 = vld [vmem:[%s7152_s11 + $0xe8] sm:$0xff]  ;;  %v7617_v41 = vld [vmem:[%s7152_s11 + $0xe0] sm:$0xff] }
  0x64   : > { %v857_v40 = vsel %vm855_vm15, %v11483_v53, %v854_v11  ;;  %372 = vadd.xlane.f32.xlu1 %v371_v60  ;;  %v859_v43 = vmul.f32 %v6380_v42, %v7446_v31  ;;  %v752_v18 = vmul.f32 %v7566_v24, %v7566_v24  ;;  %v7604_v47 = vmax.f32 %v7293_v55, 1.0000001 }
  0x65   : > { %11484 = vst [vmem:[#allocation33_spill] sm:$0xff] %v7595_v62  ;;  %6387 = vrsqrt.f32 %v7575_v50  ;;  %v7611_v11 = vadd.f32 -1.0, %v753_v57  ;;  %v7614_v28 = vmax.f32 %v7317_v0, 1.0000001  ;;  %v7620_v42 = vadd.f32 %v857_v40, %v7326_v5 }
  0x66   : > { %v7623_v60 = vadd.f32 %v850_v8, %v7333_v10  ;;  %vm883_vm7 = vcmp.eq.f32.partialorder %v7465_v35, 0.0  ;;  %v884_v55 = vand.u32 2147483648, %v7465_v35  ;;  %v871_v57 = vsel %vm869_vm3, %v870_v2, %v868_v17 }
  0x67   : > { %v880_v53 = vmul.f32 %v6382_v34, %v7465_v35  ;;  %v368_v0 = vsel %vm289_vm0, %v7595_v62, 0.0  ;;  %v7634_v5 = vmul.f32 %v7607_v37, %v7607_v37  ;;  %v861_v10 = vsel %vm860_vm4, %v7446_v31, %v859_v43 }
  0x68   : > { %v6384_v40 = vpop.eup %6383  ;;  %v7639_v8 = vadd.f32 -1.0, %v752_v18  ;;  %v755_v32 = vmul.f32 %v7604_v47, %v7604_v47  ;;  %369 = vadd.xlane.f32.xlu0 %v368_v0  ;;  %v7645_v2 = vmul.f32 %v7617_v41, %v7617_v41  ;;  %6389 = vrsqrt.f32 %v7611_v11  ;;  %v7656_v18 = vld [vmem:[%s7152_s11 + $0xf8] sm:$0xff] }
  0x69   : > { %11485 = vst [vmem:[#allocation34_spill] sm:$0xff] %v7634_v5  ;;  %v754_v34 = vmul.f32 %v7614_v28, %v7614_v28  ;;  %v7651_v17 = vmax.f32 %v7320_v1, 1.0000001  ;;  %v377_v43 = vsel %vm289_vm0, %v7634_v5, 0.0  ;;  %v7659_v62 = vadd.f32 %v871_v57, %v7360_v26 }
  0x6a   : > { %11486 = vst [vmem:[#allocation35_spill] sm:$0xff] %v7645_v2  ;;  %vm874_vm8 = vcmp.eq.f32.partialorder %v7500_v63, inf  ;;  %vm876_vm9 = vcmp.eq.f32.partialorder %v7500_v63, 0.0  ;;  %v877_v0 = vand.u32 2147483648, %v7500_v63  ;;  %378 = vadd.xlane.f32.xlu1 %v377_v43  ;;  %v864_v39 = vsel %vm862_vm5, %v863_v44, %v861_v10 }
  0x6b   : > { %v882_v1 = vsel %vm881_vm6, %v7465_v35, %v880_v53  ;;  %v873_v5 = vmul.f32 %v6384_v40, %v7500_v63  ;;  %vm895_vm10 = vcmp.eq.f32.partialorder %v7554_v38, inf  ;;  %6391 = vrsqrt.f32 %v7639_v8 }
  0x6c   : > { %v7672_v26 = vadd.f32 -1.0, %v755_v32  ;;  %v374_v57 = vsel %vm289_vm0, %v7645_v2, 0.0  ;;  %v7678_v31 = vmul.f32 %v7656_v18, %v7656_v18  ;;  %vm897_vm11 = vcmp.eq.f32.partialorder %v7554_v38, 0.0  ;;  %v7695_v2 = vld [vmem:[%s7152_s11 + $0xf0] sm:$0xff] }
  0x6d   : > { %v6386_v44 = vpop.eup %6385  ;;  %v7681_v53 = vadd.f32 -1.0, %v754_v34  ;;  %v757_v40 = vmul.f32 %v7651_v17, %v7651_v17  ;;  %v7686_v10 = vmax.f32 %v7349_v19, 1.0000001  ;;  %375 = vadd.xlane.f32.xlu0 %v374_v57  ;;  %v7689_v32 = vadd.f32 %v864_v39, %v7379_v52 }
  0x6e   : > { %11487 = vst [vmem:[#allocation36_spill] sm:$0xff] %v7678_v31  ;;  %v898_v43 = vand.u32 2147483648, %v7554_v38  ;;  %vm888_vm12 = vcmp.eq.f32.partialorder %v7575_v50, inf  ;;  %vm890_vm13 = vcmp.eq.f32.partialorder %v7575_v50, 0.0  ;;  %v885_v30 = vsel %vm883_vm7, %v884_v55, %v882_v1 }
  0x6f   : > { %v6388_v34 = vpop.eup %6387  ;;  %v875_v19 = vsel %vm874_vm8, %v7500_v63, %v873_v5  ;;  %v891_v57 = vand.u32 2147483648, %v7575_v50  ;;  %v7704_v52 = vmax.f32 %v7387_v58, 1.0000001  ;;  %v894_v39 = vmul.f32 %v6386_v44, %v7554_v38 }
  0x70   : > { %6393 = vrsqrt.f32 %v7672_v26  ;;  %v383_v35 = vsel %vm289_vm0, %v7678_v31, 0.0  ;;  %v7714_v55 = vadd.f32 -1.0, %v757_v40  ;;  %v756_v5 = vmul.f32 %v7686_v10, %v7686_v10 }
  0x71   : > { %6395 = vrsqrt.f32 %v7681_v53  ;;  %384 = vadd.xlane.f32.xlu1 %v383_v35  ;;  %v7720_v58 = vmul.f32 %v7695_v2, %v7695_v2  ;;  %v887_v1 = vmul.f32 %v6388_v34, %v7575_v50  ;;  %vm909_vm14 = vcmp.eq.f32.partialorder %v7611_v11, inf }
  0x72   : > { %vm911_vm15 = vcmp.eq.f32.partialorder %v7611_v11, 0.0  ;;  %v6390_v44 = vpop.eup %6389  ;;  %v7729_v40 = vadd.f32 %v885_v30, %v7403_v25  ;;  %v878_v35 = vsel %vm876_vm9, %v877_v0, %v875_v19  ;;  %v912_v31 = vand.u32 2147483648, %v7611_v11 }
  0x73   : > { %11488 = vst [vmem:[#allocation37_spill] sm:$0xff] %v7720_v58  ;;  %v759_v23 = vmul.f32 %v7704_v52, %v7704_v52  ;;  %v896_v34 = vsel %vm895_vm10, %v7554_v38, %v894_v39  ;;  %v380_v22 = vsel %vm289_vm0, %v7720_v58, 0.0  ;;  %vm902_vm1 = vcmp.eq.f32.partialorder %v7639_v8, inf }
  0x74   : > { %vm904_vm2 = vcmp.eq.f32.partialorder %v7639_v8, 0.0  ;;  %6397 = vrsqrt.f32 %v7714_v55  ;;  %v7746_v30 = vadd.f32 -1.0, %v756_v5  ;;  %381 = vadd.xlane.f32.xlu0 %v380_v22  ;;  %v7053_v25 = vmov 0  }
  0x75   : > { %6360 = vset.pattern.permute.xlu1 %v7053_v25  ;;  %v6392_v63 = vpop.eup %6391  ;;  %v889_v0 = vsel %vm888_vm12, %v7575_v50, %v887_v1  ;;  %v908_v19 = vmul.f32 %v6390_v44, %v7611_v11  ;;  %v905_v39 = vand.u32 2147483648, %v7639_v8  ;;  %v761_v58 = vmul.f32 %v7726_v27, %v7726_v27  ;;  %6359 = vset.pattern.permute.xlu0 %v7053_v25 }
  0x76   : > { %v7756_v21 = vadd.f32 %v878_v35, %v7437_v49  ;;  %v899_v22 = vsel %vm897_vm11, %v898_v43, %v896_v34  ;;  %v7760_v5 = vadd.f32 -1.0, %v759_v23  ;;  %v7763_v15 = vmax.f32 %v7476_v56, 1.0000001 }
  0x77   : > { %vm923_vm3 = vcmp.eq.f32.partialorder %v7672_v26, inf  ;;  %v926_v1 = vand.u32 2147483648, %v7672_v26  ;;  %v7767_v44 = vadd.f32 -1.0, %v758_v9  ;;  %v7770_v14 = vmax.f32 %v7479_v61, 1.0000001 }
  0x78   : > { %v892_v49 = vsel %vm890_vm13, %v891_v57, %v889_v0  ;;  %v901_v38 = vmul.f32 %v6392_v63, %v7639_v8  ;;  %vm925_vm4 = vcmp.eq.f32.partialorder %v7672_v26, 0.0  ;;  %vm916_vm5 = vcmp.eq.f32.partialorder %v7681_v53, inf }
  0x79   : > { %6399 = vrsqrt.f32 %v7746_v30  ;;  %v7779_v56 = vadd.f32 %v899_v22, %v7473_v12  ;;  %v910_v61 = vsel %vm909_vm14, %v7611_v11, %v908_v19  ;;  %vm918_vm6 = vcmp.eq.f32.partialorder %v7681_v53, 0.0 }
  0x7a   : > { %v6394_v23 = vpop.eup %6393  ;;  %v919_v50 = vand.u32 2147483648, %v7681_v53  ;;  %v7786_v43 = vadd.f32 -1.0, %v761_v58  ;;  %vm937_vm7 = vcmp.eq.f32.partialorder %v7714_v55, inf  ;;  %6401 = vrsqrt.f32 %v7760_v5 }
  0x7b   : > { %v6396_v57 = vpop.eup %6395  ;;  %v760_v35 = vmul.f32 %v7763_v15, %v7763_v15  ;;  %v7793_v12 = vmax.f32 %v7511_v46, 1.0000001  ;;  %v7796_v34 = vadd.f32 %v892_v49, %v7497_v16  ;;  %6403 = vrsqrt.f32 %v7767_v44 }
  0x7c   : > { %v763_v58 = vmul.f32 %v7770_v14, %v7770_v14  ;;  %v7802_v9 = vmax.f32 %v7523_v45, 1.0000001  ;;  %v913_v25 = vsel %vm911_vm15, %v912_v31, %v910_v61  ;;  %v903_v63 = vsel %vm902_vm1, %v7639_v8, %v901_v38 }
  0x7d   : > { %v922_v46 = vmul.f32 %v6394_v23, %v7672_v26  ;;  %v7811_v16 = vmax.f32 %v7569_v20, 1.0000001  ;;  %v915_v0 = vmul.f32 %v6396_v57, %v7681_v53  ;;  %vm939_vm8 = vcmp.eq.f32.partialorder %v7714_v55, 0.0 }
  0x7e   : > { %6405 = vrsqrt.f32 %v7786_v43  ;;  %v7817_v45 = vmax.f32 %v7607_v37, 1.0000001  ;;  %v6398_v11 = vpop.eup %6397  ;;  %v940_v31 = vand.u32 2147483648, %v7714_v55  ;;  %v7820_v19 = vadd.f32 -1.0, %v760_v35 }
  0x7f   : > { %v762_v22 = vmul.f32 %v7793_v12, %v7793_v12  ;;  %v7825_v20 = vmax.f32 %v7617_v41, 1.0000001  ;;  %v7828_v49 = vadd.f32 %v913_v25, %v7535_v54  ;;  %v906_v38 = vsel %vm904_vm2, %v905_v39, %v903_v63 }
  0x80   : > { %v7832_v23 = vadd.f32 -1.0, %v763_v58  ;;  %v765_v37 = vmul.f32 %v7802_v9, %v7802_v9  ;;  %v924_v61 = vsel %vm923_vm3, %v7672_v26, %v922_v46  ;;  %vm930_vm9 = vcmp.eq.f32.partialorder %v7746_v30, inf }
  0x81   : > { %v764_v41 = vmul.f32 %v7811_v16, %v7811_v16  ;;  %v7843_v54 = vmax.f32 %v7656_v18, 1.0000001  ;;  %v917_v8 = vsel %vm916_vm5, %v7681_v53, %v915_v0  ;;  %v936_v39 = vmul.f32 %v6398_v11, %v7714_v55 }
  0x82   : > { %vm932_vm10 = vcmp.eq.f32.partialorder %v7746_v30, 0.0  ;;  %v933_v57 = vand.u32 2147483648, %v7746_v30  ;;  %v767_v35 = vmul.f32 %v7817_v45, %v7817_v45  ;;  %v7854_v25 = vadd.f32 %v906_v38, %v7566_v24 }
  0x83   : > { %v6400_v58 = vpop.eup %6399  ;;  %6407 = vrsqrt.f32 %v7820_v19  ;;  %v7857_v18 = vadd.f32 -1.0, %v762_v22  ;;  %v766_v63 = vmul.f32 %v7825_v20, %v7825_v20  ;;  %v927_v46 = vsel %vm925_vm4, %v926_v1, %v924_v61 }
  0x84   : > { %vm951_vm11 = vcmp.eq.f32.partialorder %v7760_v5, inf  ;;  %6409 = vrsqrt.f32 %v7832_v23  ;;  %v7865_v0 = vadd.f32 -1.0, %v765_v37  ;;  %v6402_v11 = vpop.eup %6401  ;;  %v920_v24 = vsel %vm918_vm6, %v919_v50, %v917_v8 }
  0x85   : > { %vm953_vm12 = vcmp.eq.f32.partialorder %v7760_v5, 0.0  ;;  %v7870_v22 = vadd.f32 -1.0, %v764_v41  ;;  %v769_v38 = vmul.f32 %v7843_v54, %v7843_v54  ;;  %v6404_v7 = vpop.eup %6403  ;;  %v938_v26 = vsel %vm937_vm7, %v7714_v55, %v936_v39 }
  0x86   : > { %v929_v1 = vmul.f32 %v6400_v58, %v7746_v30  ;;  %v7878_v37 = vadd.f32 -1.0, %v767_v35  ;;  %v7881_v61 = vmax.f32 %v7695_v2, 1.0000001  ;;  %v7884_v53 = vadd.f32 %v927_v46, %v7604_v47 }
  0x87   : > { %v954_v50 = vand.u32 2147483648, %v7760_v5  ;;  %6411 = vrsqrt.f32 %v7857_v18  ;;  %v7888_v41 = vadd.f32 -1.0, %v766_v63  ;;  %v7891_v6 = vadd.f32 %v920_v24, %v7614_v28 }
  0x88   : > { %v6406_v8 = vpop.eup %6405  ;;  %v950_v39 = vmul.f32 %v6402_v11, %v7760_v5  ;;  %vm944_vm13 = vcmp.eq.f32.partialorder %v7767_v44, inf  ;;  %6413 = vrsqrt.f32 %v7865_v0  ;;  %v941_v47 = vsel %vm939_vm8, %v940_v31, %v938_v26 }
  0x89   : > { %v943_v2 = vmul.f32 %v6404_v7, %v7767_v44  ;;  %6415 = vrsqrt.f32 %v7870_v22  ;;  %v7900_v35 = vadd.f32 -1.0, %v769_v38  ;;  %v931_v28 = vsel %vm930_vm9, %v7746_v30, %v929_v1 }
  0x8a   : > { %vm946_vm14 = vcmp.eq.f32.partialorder %v7767_v44, 0.0  ;;  %6417 = vrsqrt.f32 %v7878_v37  ;;  %v768_v58 = vmul.f32 %v7881_v61, %v7881_v61  ;;  %v947_v55 = vand.u32 2147483648, %v7767_v44 }
  0x8b   : > { %v964_v31 = vmul.f32 %v6406_v8, %v7786_v43  ;;  %vm965_vm15 = vcmp.eq.f32.partialorder %v7786_v43, inf  ;;  %6419 = vrsqrt.f32 %v7888_v41  ;;  %v7914_v7 = vadd.f32 %v941_v47, %v7651_v17 }
  0x8c   : > { %v952_v63 = vsel %vm951_vm11, %v7760_v5, %v950_v39  ;;  %vm967_vm1 = vcmp.eq.f32.partialorder %v7786_v43, 0.0  ;;  %6421 = vlog2.f32 %v7490_v51  ;;  %v934_v11 = vsel %vm932_vm10, %v933_v57, %v931_v28 }
  0x8d   : > { %v6408_v46 = vpop.eup %6407  ;;  %v945_v24 = vsel %vm944_vm13, %v7767_v44, %v943_v2  ;;  %v968_v38 = vand.u32 2147483648, %v7786_v43  ;;  %6423 = vrsqrt.f32 %v7900_v35  ;;  %vm958_vm2 = vcmp.eq.f32.partialorder %v7820_v19, inf }
  0x8e   : > { %v6410_v17 = vpop.eup %6409  ;;  %vm960_vm3 = vcmp.eq.f32.partialorder %v7820_v19, 0.0  ;;  %v7930_v26 = vadd.f32 -1.0, %v768_v58  ;;  %6425 = vlog2.f32 %v7514_v36  ;;  %v955_v51 = vsel %vm953_vm12, %v954_v50, %v952_v63 }
  0x8f   : > { %v966_v30 = vsel %vm965_vm15, %v7786_v43, %v964_v31  ;;  %v961_v57 = vand.u32 2147483648, %v7820_v19  ;;  %6427 = vlog2.f32 %v7482_v59  ;;  %v7941_v1 = vadd.f32 %v934_v11, %v7686_v10 }
  0x90   : > { %v948_v8 = vsel %vm946_vm14, %v947_v55, %v945_v24  ;;  %v957_v39 = vmul.f32 %v6408_v46, %v7820_v19  ;;  %6429 = vlog2.f32 %v7493_v13  ;;  %v978_v5 = vmul.f32 %v6410_v17, %v7832_v23 }
  0x91   : > { %v6412_v36 = vpop.eup %6411  ;;  %vm979_vm4 = vcmp.eq.f32.partialorder %v7832_v23, inf  ;;  %vm981_vm5 = vcmp.eq.f32.partialorder %v7832_v23, 0.0  ;;  %6431 = vlog2.f32 %v7659_v62  ;;  %v1047_v10 = vadd.f32 %v955_v51, %v7704_v52 }
  0x92   : > { %v6414_v59 = vpop.eup %6413  ;;  %v969_v44 = vsel %vm967_vm1, %v968_v38, %v966_v30  ;;  %v982_v50 = vand.u32 2147483648, %v7832_v23  ;;  %6433 = vrsqrt.f32 %v7930_v26  ;;  %v7957_v47 = vadd.f32 %v948_v8, %v7709_v29 }
  0x93   : > { %v6416_v13 = vpop.eup %6415  ;;  %vm972_vm6 = vcmp.eq.f32.partialorder %v7857_v18, inf  ;;  %vm974_vm7 = vcmp.eq.f32.partialorder %v7857_v18, 0.0  ;;  %6435 = vlog2.f32 %v7580_v48  ;;  %v959_v52 = vsel %vm958_vm2, %v7820_v19, %v957_v39 }
  0x94   : > { %v6418_v62 = vpop.eup %6417  ;;  %v971_v43 = vmul.f32 %v6412_v36, %v7857_v18  ;;  %v975_v2 = vand.u32 2147483648, %v7857_v18  ;;  %6437 = vlog2.f32 %v7729_v40  ;;  %v1049_v29 = vadd.f32 %v969_v44, %v7726_v27 }
  0x95   : > { %v6420_v28 = vpop.eup %6419  ;;  %v980_v58 = vsel %vm979_vm4, %v7832_v23, %v978_v5  ;;  %v992_v48 = vmul.f32 %v6414_v59, %v7865_v0  ;;  %6439 = vlog2.f32 %v7572_v33  ;;  %vm993_vm8 = vcmp.eq.f32.partialorder %v7865_v0, inf }
  0x96   : > { %v7974_v55 = vpop.eup %6421  ;;  %vm995_vm9 = vcmp.eq.f32.partialorder %v7865_v0, 0.0  ;;  %v996_v31 = vand.u32 2147483648, %v7865_v0  ;;  %6441 = vlog2.f32 %v7779_v56  ;;  %v962_v27 = vsel %vm960_vm3, %v961_v57, %v959_v52 }
  0x97   : > { %v6424_v40 = vpop.eup %6423  ;;  %vm986_vm10 = vcmp.eq.f32.partialorder %v7870_v22, inf  ;;  %vm988_vm11 = vcmp.eq.f32.partialorder %v7870_v22, 0.0  ;;  %6443 = vlog2.f32 %v7623_v60  ;;  %v983_v63 = vsel %vm981_vm5, %v982_v50, %v980_v58 }
  0x98   : > { %v7985_v33 = vpop.eup %6425  ;;  %v973_v46 = vsel %vm972_vm6, %v7857_v18, %v971_v43  ;;  %v989_v56 = vand.u32 2147483648, %v7870_v22  ;;  %6445 = vlog2.f32 %v7828_v49  ;;  %v994_v11 = vsel %vm993_vm8, %v7865_v0, %v992_v48 }
  0x99   : > { %v7994_v19 = vpop.eup %6427  ;;  %v985_v24 = vmul.f32 %v6416_v13, %v7870_v22  ;;  %v1006_v60 = vmul.f32 %v6418_v62, %v7878_v37  ;;  %6447 = vlog2.f32 %v7620_v42  ;;  %v8003_v38 = vadd.f32 %v962_v27, %v7763_v15 }
  0x9a   : > { %v8000_v23 = vpop.eup %6429  ;;  %vm1007_vm12 = vcmp.eq.f32.partialorder %v7878_v37, inf  ;;  %vm1009_vm13 = vcmp.eq.f32.partialorder %v7878_v37, 0.0  ;;  %6449 = vlog2.f32 %v7884_v53  ;;  %v1051_v17 = vadd.f32 %v983_v63, %v7770_v14 }
  0x9b   : > { %v8008_v49 = vpop.eup %6431  ;;  %v1010_v51 = vand.u32 2147483648, %v7878_v37  ;;  %v999_v30 = vmul.f32 %v6420_v28, %v7888_v41  ;;  %6451 = vlog2.f32 %v7689_v32  ;;  %v976_v15 = vsel %vm974_vm7, %v975_v2, %v973_v46 }
  0x9c   : > { %v6434_v42 = vpop.eup %6433  ;;  %v997_v57 = vsel %vm995_vm9, %v996_v31, %v994_v11  ;;  %vm1000_vm14 = vcmp.eq.f32.partialorder %v7888_v41, inf  ;;  %6453 = vlog2.f32 %v7914_v7  ;;  %v987_v14 = vsel %vm986_vm10, %v7870_v22, %v985_v24 }
  0x9d   : > { %v8020_v53 = vpop.eup %6435  ;;  %v1008_v8 = vsel %vm1007_vm12, %v7878_v37, %v1006_v60  ;;  %v1020_v32 = vmul.f32 %v6424_v40, %v7900_v35  ;;  %6455 = vlog2.f32 %v7756_v21  ;;  %vm1002_vm15 = vcmp.eq.f32.partialorder %v7888_v41, 0.0 }
  0x9e   : > { %v8028_v18 = vpop.eup %6437  ;;  %v1003_v0 = vand.u32 2147483648, %v7888_v41  ;;  %vm1021_vm1 = vcmp.eq.f32.partialorder %v7900_v35, inf  ;;  %6457 = vlog2.f32 %v1047_v10  ;;  %v1053_v39 = vadd.f32 %v997_v57, %v7802_v9 }
  0x9f   : > { %v8033_v7 = vpop.eup %6439  ;;  %v1001_v36 = vsel %vm1000_vm14, %v7888_v41, %v999_v30  ;;  %v1024_v5 = vand.u32 2147483648, %v7900_v35  ;;  %6459 = vlog2.f32 %v7796_v34  ;;  %v990_v59 = vsel %vm988_vm11, %v989_v56, %v987_v14  ;;  %v11490_v30 = vld [vmem:[#allocation9_spill] sm:$0xff] }
  0xa0   : > { %v8039_v21 = vpop.eup %6441  ;;  %v1011_v44 = vsel %vm1009_vm13, %v1010_v51, %v1008_v8  ;;  %v1013_v10 = vmul.f32 %v6434_v42, %v7930_v26  ;;  %6461 = vlog2.f32 %v1049_v29  ;;  %v1022_v9 = vsel %vm1021_vm1, %v7900_v35, %v1020_v32 }
  0xa1   : > { %v6444_v50 = vpop.eup %6443  ;;  %vm1023_vm2 = vcmp.eq.f32.partialorder %v7900_v35, 0.0  ;;  %vm1014_vm3 = vcmp.eq.f32.partialorder %v7930_v26, inf  ;;  %6463 = vlog2.f32 %v7854_v25  ;;  %v1050_v13 = vadd.f32 %v976_v15, %v7793_v12 }
  0xa2   : > { %v6446_v34 = vpop.eup %6445  ;;  %v1004_v22 = vsel %vm1002_vm15, %v1003_v0, %v1001_v36  ;;  %vm1016_vm4 = vcmp.eq.f32.partialorder %v7930_v26, 0.0  ;;  %6465 = vlog2.f32 %v1051_v17  ;;  %v8055_v62 = vadd.f32 %v990_v59, %v7811_v16  ;;  %v11489_v17 = vld [vmem:[#allocation8_spill] sm:$0xff]  ;;  %v11491_v59 = vld [vmem:[#allocation10_spill] sm:$0xff] }
  0xa3   : > { %v6448_v37 = vpop.eup %6447  ;;  %v1055_v52 = vadd.f32 %v1011_v44, %v7817_v45  ;;  %v1017_v35 = vand.u32 2147483648, %v7930_v26  ;;  %6467 = vlog2.f32 %v7891_v6  ;;  %v1025_v43 = vsel %vm1023_vm2, %v1024_v5, %v1022_v9  ;;  %v8077_v6 = vld [vmem:[%s11320_s1] sm:$0xff] }
  0xa4   : > { %v6450_v25 = vpop.eup %6449  ;;  %v1015_v12 = vsel %vm1014_vm3, %v7930_v26, %v1013_v10  ;;  %v8062_v41 = vmul.f32 0.6931472, %v7974_v55  ;;  %6469 = vlog2.f32 %v1053_v39  ;;  %v8065_v28 = vadd.f32 %v1004_v22, %v7825_v20  ;;  %v8082_v20 = vld [vmem:[%s11320_s1 + $0x8] sm:$0xff]  ;;  %v11492_v10 = vld [vmem:[#allocation11_spill] sm:$0xff] }
  0xa5   : > { %v6452_v2 = vpop.eup %6451  ;;  %v8068_v45 = vmul.f32 0.6931472, %v7985_v33  ;;  %v8071_v58 = vmul.f32 0.6931472, %v7994_v19  ;;  %6471 = vlog2.f32 %v7941_v1  ;;  %v1475_v40 = vand.u32 4294901760, %v8077_v6 }
  0xa6   : > { %v6454_v48 = vpop.eup %6453  ;;  %v11354_v27 = vand.u32 4294901760, %v8082_v20  ;;  %v1057_v33 = vadd.f32 %v1025_v43, %v7843_v54  ;;  %v1018_v63 = vsel %vm1016_vm4, %v1017_v35, %v1015_v12  ;;  %v8092_v46 = vmul.f32 0.6931472, %v8000_v23 }
  0xa7   : > { %v6456_v1 = vpop.eup %6455  ;;  %6473 = vlog2.f32 %v7957_v47  ;;  %v8106_v24 = vmul.f32 0.6931472, %v8008_v49  ;;  %v8109_v47 = vmul.f32 0.6931472, %v8020_v53  ;;  %v8112_v60 = vmul.f32 0.6931472, %v8028_v18 }
  0xa8   : > { %v6458_v56 = vpop.eup %6457  ;;  %6475 = vlog2.f32 %v1055_v52  ;;  %v8119_v15 = vmul.f32 0.6931472, %v8033_v7  ;;  %v8124_v57 = vadd.f32 %v1018_v63, %v7881_v61  ;;  %v8130_v53 = vmul.f32 0.6931472, %v6444_v50 }
  0xa9   : > { %v6460_v54 = vpop.eup %6459  ;;  %6477 = vlog2.f32 %v8003_v38  ;;  %v8128_v38 = vmul.f32 0.6931472, %v8039_v21  ;;  %v8138_v18 = vmul.f32 0.6931472, %v6446_v34  ;;  %v8142_v39 = vmul.f32 0.6931472, %v6448_v37 }
  0xaa   : > { %v6462_v23 = vpop.eup %6461  ;;  %v8144_v36 = vmul.f32 0.6931472, %v6450_v25  ;;  %v8146_v5 = vmul.f32 0.6931472, %v6452_v2  ;;  %v8154_v9 = vmul.f32 0.6931472, %v6454_v48 }
  0xab   : > { %v6464_v49 = vpop.eup %6463  ;;  %v8161_v22 = vmul.f32 0.6931472, %v6458_v56  ;;  %v8163_v37 = vmul.f32 0.6931472, %v6460_v54  ;;  %v8169_v35 = vmul.f32 0.6931472, %v6462_v23 }
  0xac   : > { %v6466_v14 = vpop.eup %6465  ;;  %v8174_v2 = vmul.f32 0.6931472, %v6464_v49  ;;  %v11493_v48 = vld [vmem:[#allocation12_spill] sm:$0xff]  ;;  %v11495_v49 = vld [vmem:[#allocation14_spill] sm:$0xff] }
  0xad   : > { %v8140_v61 = vpop.eup %6467 }
  0xae   : > { %v8149_v21 = vpop.eup %6469 }
  0xaf   : > { %v8156_v34 = vpop.eup %6471 }
  0xb1   : > { %v8171_v25 = vpop.eup %6473 }
  0xbd   : > { %v298_v16 = vpop.xlane.xlu1 %297  ;;  %v292_v29 = vpop.xlane.xlu0 %291 }
  0xbe   : > { %v388_v55 = vsub.f32 %v298_v16, %v7157_v3  ;;  %v386_v31 = vsub.f32 %v292_v29, %v7159_v4  ;;  %v8103_v4 = vpack.c.bf16 %v11354_v27, %v1475_v40  ;;  %v8176_v16 = vmul.f32 0.6931472, %v6466_v14  ;;  %v8179_v29 = vpop.eup %6475 }
  0xc0   : > { %v8095_v19 = vmax.f32 %v388_v55, 0.0  ;;  %v8097_v3 = vmax.f32 %v386_v31, 0.0  ;;  %6099 = vmatprep.subr.bf16.mxu0 %v8103_v4  ;;  %6051 = vmatprep.subr.bf16.mxu1 %v8103_v4  ;;  %v11494_v31 = vld [vmem:[#allocation13_spill] sm:$0xff] }
  0xc1   : > { %v301_v26 = vpop.xlane.xlu1 %300  ;;  %v295_v11 = vpop.xlane.xlu0 %294  ;;  %6101 = vmatpush3.bf16.msra.mxu0 %v8103_v4  ;;  %6053 = vmatpush3.bf16.msra.mxu1 %v8103_v4 }
  0xc2   : > { %6479 = vrsqrt.f32 %v8095_v19  ;;  %v389_v51 = vsub.f32 %v301_v26, %v11489_v17  ;;  %v387_v42 = vsub.f32 %v295_v11, %v11490_v30  ;;  %vm452_vm5 = vcmp.eq.f32.partialorder %v8097_v3, inf }
  0xc3   : > { %6481 = vrsqrt.f32 %v8097_v3  ;;  %vm454_vm6 = vcmp.eq.f32.partialorder %v8097_v3, 0.0  ;;  %v455_v63 = vand.u32 2147483648, %v8097_v3  ;;  %vm466_vm7 = vcmp.eq.f32.partialorder %v8095_v19, inf }
  0xc4   : > { %v8134_v8 = vmax.f32 %v389_v51, 0.0  ;;  %v8136_v32 = vmax.f32 %v387_v42, 0.0  ;;  %6483 = vlog2.f32 %v1050_v13  ;;  %v8159_v13 = vmul.f32 0.6931472, %v6456_v1 }
  0xc5   : > { %v307_v0 = vpop.xlane.xlu1 %306  ;;  %v304_v7 = vpop.xlane.xlu0 %303  ;;  %6485 = vlog2.f32 %v8055_v62  ;;  %vm468_vm8 = vcmp.eq.f32.partialorder %v8095_v19, 0.0  ;;  %v469_v26 = vand.u32 2147483648, %v8095_v19 }
  0xc6   : > { %6487 = vrsqrt.f32 %v8134_v8  ;;  %v391_v44 = vsub.f32 %v307_v0, %v11491_v59  ;;  %v390_v50 = vsub.f32 %v304_v7, %v11492_v10  ;;  %vm459_vm9 = vcmp.eq.f32.partialorder %v8136_v32, inf }
  0xc7   : > { %6489 = vrsqrt.f32 %v8136_v32  ;;  %vm461_vm10 = vcmp.eq.f32.partialorder %v8136_v32, 0.0  ;;  %v462_v51 = vand.u32 2147483648, %v8136_v32  ;;  %vm473_vm11 = vcmp.eq.f32.partialorder %v8134_v8, inf }
  0xc8   : > { %v8165_v62 = vmax.f32 %v391_v44, 0.0  ;;  %v8167_v52 = vmax.f32 %v390_v50, 0.0  ;;  %6491 = vlog2.f32 %v1057_v33  ;;  %v8185_v33 = vpop.eup %6477  ;;  %vm475_vm12 = vcmp.eq.f32.partialorder %v8134_v8, 0.0 }
  0xc9   : > { %v313_v43 = vpop.xlane.xlu1 %312  ;;  %v310_v12 = vpop.xlane.xlu0 %309  ;;  %6493 = vlog2.f32 %v8065_v28  ;;  %v476_v59 = vand.u32 2147483648, %v8134_v8 }
  0xca   : > { %6495 = vrsqrt.f32 %v8165_v62  ;;  %v393_v55 = vsub.f32 %v313_v43, %v11493_v48  ;;  %v392_v1 = vsub.f32 %v310_v12, %v11494_v31  ;;  %vm480_vm13 = vcmp.eq.f32.partialorder %v8167_v52, inf }
  0xcb   : > { %6497 = vrsqrt.f32 %v8167_v52  ;;  %vm482_vm14 = vcmp.eq.f32.partialorder %v8167_v52, 0.0  ;;  %vm487_vm15 = vcmp.eq.f32.partialorder %v8165_v62, inf  ;;  %vm489_vm1 = vcmp.eq.f32.partialorder %v8165_v62, 0.0 }
  0xcc   : > { %v6480_v28 = vpop.eup %6479  ;;  %v8191_v56 = vmax.f32 %v393_v55, 0.0  ;;  %v8193_v54 = vmax.f32 %v392_v1, 0.0  ;;  %v483_v1 = vand.u32 2147483648, %v8167_v52 }
  0xcd   : > { %v6482_v11 = vpop.eup %6481  ;;  %v465_v23 = vmul.f32 %v6480_v28, %v8095_v19  ;;  %v319_v17 = vpop.xlane.xlu1 %318 }
  0xce   : > { %v8201_v30 = vpop.eup %6483  ;;  %v451_v42 = vmul.f32 %v6482_v11, %v8097_v3  ;;  %6499 = vrsqrt.f32 %v8191_v56  ;;  %v395_v14 = vsub.f32 %v319_v17, %v11495_v49  ;;  %v11496_v17 = vld [vmem:[#allocation15_spill] sm:$0xff]  ;;  %vm494_vm2 = vcmp.eq.f32.partialorder %v8193_v54, inf }
  0xcf   : > { %v8207_v0 = vpop.eup %6485  ;;  %6501 = vrsqrt.f32 %v8193_v54  ;;  %v467_v7 = vsel %vm466_vm7, %v8095_v19, %v465_v23  ;;  %v316_v23 = vpop.xlane.xlu0 %315  ;;  %vm501_vm3 = vcmp.eq.f32.partialorder %v8191_v56, inf  ;;  %vm503_vm4 = vcmp.eq.f32.partialorder %v8191_v56, 0.0 }
  0xd0   : > { %v6488_v44 = vpop.eup %6487  ;;  %v8215_v10 = vmax.f32 %v395_v14, 0.0  ;;  %v453_v50 = vsel %vm452_vm5, %v8097_v3, %v451_v42  ;;  %v470_v43 = vsel %vm468_vm8, %v469_v26, %v467_v7  ;;  %v394_v42 = vsub.f32 %v316_v23, %v11496_v17  ;;  %v11497_v7 = vld [vmem:[#allocation16_spill] sm:$0xff] }
  0xd1   : > { %v6490_v12 = vpop.eup %6489  ;;  %v472_v48 = vmul.f32 %v6488_v44, %v8134_v8  ;;  %v456_v55 = vsel %vm454_vm6, %v455_v63, %v453_v50  ;;  %v676_v31 = vmax.f32 %v470_v43, 1e-15  ;;  %v325_v49 = vpop.xlane.xlu1 %324  ;;  %v490_v63 = vand.u32 2147483648, %v8165_v62 }
  0xd2   : > { %v8227_v28 = vpop.eup %6491  ;;  %v458_v11 = vmul.f32 %v6490_v12, %v8136_v32  ;;  %6503 = vrsqrt.f32 %v8215_v10  ;;  %v674_v19 = vmax.f32 %v456_v55, 1e-15  ;;  %v397_v44 = vsub.f32 %v325_v49, %v11497_v7 }
  0xd3   : > { %v8232_v26 = vpop.eup %6493  ;;  %v474_v3 = vsel %vm473_vm11, %v8134_v8, %v472_v48  ;;  %v8247_v23 = vmax.f32 %v394_v42, 0.0  ;;  %vm515_vm5 = vcmp.eq.f32.partialorder %v8215_v10, inf  ;;  %vm517_vm6 = vcmp.eq.f32.partialorder %v8215_v10, 0.0 }
  0xd4   : > { %v6496_v14 = vpop.eup %6495  ;;  %6505 = vrcp.f32 %v674_v19  ;;  %v460_v50 = vsel %vm459_vm9, %v8136_v32, %v458_v11  ;;  %v477_v43 = vsel %vm475_vm12, %v476_v59, %v474_v3  ;;  %v8252_v49 = vmax.f32 %v397_v44, 0.0  ;;  %v322_v44 = vpop.xlane.xlu0 %321 }
  0xd5   : > { %v6498_v12 = vpop.eup %6497  ;;  %v486_v55 = vmul.f32 %v6496_v14, %v8165_v62  ;;  %v463_v48 = vsel %vm461_vm10, %v462_v51, %v460_v50  ;;  %6507 = vrcp.f32 %v676_v31  ;;  %v677_v7 = vmax.f32 %v477_v43, 1e-15  ;;  %v331_v50 = vpop.xlane.xlu1 %330 }
  0xd6   : > { %v479_v17 = vmul.f32 %v6498_v12, %v8167_v52  ;;  %v675_v19 = vmax.f32 %v463_v48, 1e-15  ;;  %6509 = vrsqrt.f32 %v8247_v23  ;;  %v497_v59 = vand.u32 2147483648, %v8193_v54 }
  0xd7   : > { %v488_v8 = vsel %vm487_vm15, %v8165_v62, %v486_v55  ;;  %6511 = vrsqrt.f32 %v8252_v49  ;;  %v504_v3 = vand.u32 2147483648, %v8191_v56  ;;  %v11498_v55 = vld [vmem:[#allocation17_spill] sm:$0xff]  ;;  %vm496_vm7 = vcmp.eq.f32.partialorder %v8193_v54, 0.0 }
  0xd8   : > { %v6500_v11 = vpop.eup %6499  ;;  %v481_v32 = vsel %vm480_vm13, %v8167_v52, %v479_v17  ;;  %6513 = vrcp.f32 %v675_v19  ;;  %v491_v12 = vsel %vm489_vm1, %v490_v63, %v488_v8  ;;  %v396_v48 = vsub.f32 %v322_v44, %v11498_v55  ;;  %v11499_v17 = vld [vmem:[#allocation18_spill] sm:$0xff] }
  0xd9   : > { %v6502_v51 = vpop.eup %6501  ;;  %v500_v31 = vmul.f32 %v6500_v11, %v8191_v56  ;;  %v484_v42 = vsel %vm482_vm14, %v483_v1, %v481_v32  ;;  %6515 = vrcp.f32 %v677_v7  ;;  %v399_v27 = vsub.f32 %v331_v50, %v11499_v17  ;;  %v11500_v50 = vld [vmem:[#allocation19_spill] sm:$0xff] }
  0xda   : > { %v493_v14 = vmul.f32 %v6502_v51, %v8193_v54  ;;  %v678_v43 = vmax.f32 %v484_v42, 1e-15  ;;  %v679_v11 = vmax.f32 %v491_v12, 1e-15  ;;  %v518_v19 = vand.u32 2147483648, %v8215_v10  ;;  %v337_v12 = vpop.xlane.xlu1 %336 }
  0xdb   : > { %v502_v52 = vsel %vm501_vm3, %v8191_v56, %v500_v31  ;;  %v8282_v63 = vmax.f32 %v396_v48, 0.0  ;;  %v8284_v7 = vmax.f32 %v399_v27, 0.0  ;;  %v8293_v31 = vmul.f32 0.6931472, %v8140_v61 }
  0xdc   : > { %v6504_v1 = vpop.eup %6503  ;;  %6517 = vrcp.f32 %v678_v43  ;;  %v505_v8 = vsel %vm503_vm4, %v504_v3, %v502_v52  ;;  %v495_v51 = vsel %vm494_vm2, %v8193_v54, %v493_v14  ;;  %vm508_vm8 = vcmp.eq.f32.partialorder %v8247_v23, inf  ;;  %v328_v3 = vpop.xlane.xlu0 %327 }
  0xdd   : > { %v514_v62 = vmul.f32 %v6504_v1, %v8215_v10  ;;  %6519 = vrcp.f32 %v679_v11  ;;  %vm529_vm9 = vcmp.eq.f32.partialorder %v8252_v49, inf  ;;  %v681_v61 = vmax.f32 %v505_v8, 1e-15  ;;  %v11501_v11 = vld [vmem:[#allocation20_spill] sm:$0xff] }
  0xde   : > { %v6506_v32 = vpop.eup %6505  ;;  %6521 = vrsqrt.f32 %v8282_v63  ;;  %v398_v43 = vsub.f32 %v328_v3, %v11500_v50  ;;  %vm531_vm10 = vcmp.eq.f32.partialorder %v8252_v49, 0.0  ;;  %v498_v55 = vsel %vm496_vm7, %v497_v59, %v495_v51 }
  0xdf   : > { %v6508_v42 = vpop.eup %6507  ;;  %v1123_v27 = vmul.f32 %v6506_v32, %v8062_v41  ;;  %v516_v56 = vsel %vm515_vm5, %v8215_v10, %v514_v62  ;;  %6523 = vrsqrt.f32 %v8284_v7  ;;  %v401_v10 = vsub.f32 %v337_v12, %v11501_v11 }
  0xe0   : > { %v519_v14 = vsel %vm517_vm6, %v518_v19, %v516_v56  ;;  %v6510_v44 = vpop.eup %6509  ;;  %v532_v52 = vand.u32 2147483648, %v8252_v49  ;;  %vm510_vm11 = vcmp.eq.f32.partialorder %v8247_v23, 0.0  ;;  %v8314_v62 = vmax.f32 %v398_v43, 0.0  ;;  %v334_v59 = vpop.xlane.xlu0 %333  ;;  %v11502_v56 = vld [vmem:[#allocation21_spill] sm:$0xff] }
  0xe1   : > { %1188 = vperm.xlu0 %6359, %v1123_v27   ;;  %v683_v41 = vmax.f32 %v519_v14, 1e-15  ;;  %v6512_v48 = vpop.eup %6511  ;;  %v507_v17 = vmul.f32 %v6510_v44, %v8247_v23  ;;  %v511_v8 = vand.u32 2147483648, %v8247_v23  ;;  %v8317_v54 = vmax.f32 %v401_v10, 0.0 }
  0xe2   : > { %v6514_v1 = vpop.eup %6513  ;;  %v528_v19 = vmul.f32 %v6512_v48, %v8252_v49  ;;  %v680_v27 = vmax.f32 %v498_v55, 1e-15  ;;  %v400_v3 = vsub.f32 %v334_v59, %v11502_v56  ;;  %vm543_vm12 = vcmp.eq.f32.partialorder %v8284_v7, inf  ;;  %v343_v48 = vpop.xlane.xlu1 %342 }
  0xe3   : > { %6525 = vrcp.f32 %v683_v41  ;;  %v6516_v32 = vpop.eup %6515  ;;  %v1125_v51 = vmul.f32 %v6514_v1, %v8068_v45  ;;  %v509_v44 = vsel %vm508_vm8, %v8247_v23, %v507_v17  ;;  %v1127_v45 = vmul.f32 %v6508_v42, %v8071_v58 }
  0xe4   : > { %6527 = vrcp.f32 %v681_v61  ;;  %v530_v14 = vsel %vm529_vm9, %v8252_v49, %v528_v19  ;;  %v8333_v43 = vmax.f32 %v400_v3, 0.0  ;;  %vm545_vm13 = vcmp.eq.f32.partialorder %v8284_v7, 0.0  ;;  %v11503_v49 = vld [vmem:[#allocation22_spill] sm:$0xff] }
  0xe5   : > { %6529 = vrsqrt.f32 %v8314_v62  ;;  %1193 = vperm.xlu1 %6360, %v1125_v51   ;;  %v533_v61 = vsel %vm531_vm10, %v532_v52, %v530_v14  ;;  %v546_v41 = vand.u32 2147483648, %v8284_v7  ;;  %v512_v17 = vsel %vm510_vm11, %v511_v8, %v509_v44  ;;  %v340_v8 = vpop.xlane.xlu0 %339  ;;  %v11505_v44 = vld [vmem:[#allocation24_spill] sm:$0xff] }
  0xe6   : > { %v6518_v50 = vpop.eup %6517  ;;  %6531 = vrsqrt.f32 %v8317_v54  ;;  %v685_v12 = vmax.f32 %v533_v61, 1e-15  ;;  %vm522_vm14 = vcmp.eq.f32.partialorder %v8282_v63, inf  ;;  %vm524_vm15 = vcmp.eq.f32.partialorder %v8282_v63, 0.0 }
  0xe7   : > { %v6520_v55 = vpop.eup %6519  ;;  %6533 = vrcp.f32 %v680_v27  ;;  %v403_v42 = vsub.f32 %v343_v48, %v11503_v49  ;;  %v1129_v11 = vmul.f32 %v6516_v32, %v8092_v46  ;;  %v525_v10 = vand.u32 2147483648, %v8282_v63  ;;  %v11504_v46 = vld [vmem:[#allocation23_spill] sm:$0xff]  ;;  %v349_v27 = vpop.xlane.xlu1 %348 }
  0xe8   : > { %v6522_v58 = vpop.eup %6521  ;;  %6535 = vrsqrt.f32 %v8333_v43  ;;  %vm557_vm1 = vcmp.eq.f32.partialorder %v8317_v54, inf  ;;  %vm559_vm2 = vcmp.eq.f32.partialorder %v8317_v54, 0.0  ;;  %v1131_v59 = vmul.f32 %v6518_v50, %v8109_v47 }
  0xe9   : > { %v6524_v52 = vpop.eup %6523  ;;  %v521_v1 = vmul.f32 %v6522_v58, %v8282_v63  ;;  %1198 = vperm.xlu1 %6360, %v1127_v45   ;;  %6537 = vrcp.f32 %v685_v12  ;;  %v8349_v19 = vmax.f32 %v403_v42, 0.0  ;;  %v682_v51 = vmax.f32 %v512_v17, 1e-15 }
  0xea   : > { %v542_v23 = vmul.f32 %v6524_v52, %v8284_v7  ;;  %v402_v32 = vsub.f32 %v340_v8, %v11504_v46  ;;  %v1133_v56 = vmul.f32 %v6520_v55, %v8119_v15  ;;  %v560_v3 = vand.u32 2147483648, %v8317_v54  ;;  %v11506_v46 = vld [vmem:[#allocation25_spill] sm:$0xff] }
  0xeb   : > { %vm536_vm3 = vcmp.eq.f32.partialorder %v8314_v62, inf  ;;  %6539 = vrsqrt.f32 %v8349_v19  ;;  %v405_v45 = vsub.f32 %v349_v27, %v11505_v44  ;;  %v523_v47 = vsel %vm522_vm14, %v8282_v63, %v521_v1 }
  0xec   : > { %v544_v61 = vsel %vm543_vm12, %v8284_v7, %v542_v23  ;;  %v8364_v12 = vmax.f32 %v402_v32, 0.0  ;;  %vm538_vm4 = vcmp.eq.f32.partialorder %v8314_v62, 0.0  ;;  %6541 = vrcp.f32 %v682_v51  ;;  %v8381_v7 = vld [vmem:[%s11320_s1 + $0x10] sm:$0xff]  ;;  %v346_v23 = vpop.xlane.xlu0 %345 }
  0xed   : > { %v6526_v14 = vpop.eup %6525  ;;  %1203 = vperm.xlu1 %6360, %v1129_v11   ;;  %v547_v55 = vsel %vm545_vm13, %v546_v41, %v544_v61  ;;  %v8370_v17 = vmax.f32 %v405_v45, 0.0  ;;  %v539_v49 = vand.u32 2147483648, %v8314_v62  ;;  %vm550_vm5 = vcmp.eq.f32.partialorder %v8333_v43, inf }
  0xee   : > { %v6528_v50 = vpop.eup %6527  ;;  %v1141_v15 = vmul.f32 %v6526_v14, %v8106_v24  ;;  %v687_v58 = vmax.f32 %v547_v55, 1e-15  ;;  %6543 = vrsqrt.f32 %v8364_v12  ;;  %v526_v24 = vsel %vm524_vm15, %v525_v10, %v523_v47 }
  0xef   : > { %v6530_v48 = vpop.eup %6529  ;;  %6545 = vrsqrt.f32 %v8370_v17  ;;  %vm552_vm6 = vcmp.eq.f32.partialorder %v8333_v43, 0.0  ;;  %v553_v11 = vand.u32 2147483648, %v8333_v43  ;;  %v8388_v63 = vmul.f32 %v6528_v50, %v8142_v39  ;;  %v8402_v39 = vld [vmem:[%s11320_s1 + $0x18] sm:$0xff] }
  0xf0   : > { %v6532_v42 = vpop.eup %6531  ;;  %v535_v52 = vmul.f32 %v6530_v48, %v8314_v62  ;;  %1233 = vperm.xlu0 %6359, %v1141_v15   ;;  %6547 = vrcp.f32 %v687_v58  ;;  %v684_v10 = vmax.f32 %v526_v24, 1e-15  ;;  %v404_v32 = vsub.f32 %v346_v23, %v11506_v46  ;;  %v355_v58 = vpop.xlane.xlu1 %354 }
  0xf1   : > { %v556_v41 = vmul.f32 %v6532_v42, %v8317_v54  ;;  %v6534_v1 = vpop.eup %6533  ;;  %1208 = vperm.xlu1 %6360, %v1131_v59   ;;  %v1481_v59 = vand.u32 4294901760, %v8381_v7  ;;  %vm571_vm7 = vcmp.eq.f32.partialorder %v8349_v19, inf  ;;  %vm573_vm8 = vcmp.eq.f32.partialorder %v8349_v19, 0.0  ;;  %v352_v42 = vpop.xlane.xlu0 %351 }
  0xf2   : > { %v537_v8 = vsel %vm536_vm3, %v8314_v62, %v535_v52  ;;  %v6536_v51 = vpop.eup %6535  ;;  %v8410_v47 = vmax.f32 %v404_v32, 0.0  ;;  %v1135_v50 = vmul.f32 %v6534_v1, %v8130_v53  ;;  %6549 = vrcp.f32 %v684_v10  ;;  %v11507_v53 = vld [vmem:[#allocation26_spill] sm:$0xff] }
  0xf3   : > { %v558_v27 = vsel %vm557_vm1, %v8317_v54, %v556_v41  ;;  %v540_v14 = vsel %vm538_vm4, %v539_v49, %v537_v8  ;;  %v6538_v44 = vpop.eup %6537  ;;  %v549_v45 = vmul.f32 %v6536_v51, %v8333_v43  ;;  %v1484_v54 = vand.u32 4294901760, %v8402_v39  ;;  %v11508_v41 = vld [vmem:[#allocation27_spill] sm:$0xff] }
  0xf4   : > { %v561_v61 = vsel %vm559_vm2, %v560_v3, %v558_v27  ;;  %v1145_v62 = vmul.f32 %v6538_v44, %v8112_v60  ;;  %v686_v55 = vmax.f32 %v540_v14, 1e-15  ;;  %6551 = vrsqrt.f32 %v8410_v47  ;;  %v361_v27 = vpop.xlane.xlu1 %360 }
  0xf5   : > { %v689_v15 = vmax.f32 %v561_v61, 1e-15  ;;  %1213 = vperm.xlu1 %6360, %v1133_v56   ;;  %v551_v48 = vsel %vm550_vm5, %v8333_v43, %v549_v45  ;;  %v6540_v3 = vpop.eup %6539  ;;  %v574_v49 = vand.u32 2147483648, %v8349_v19  ;;  %vm585_vm9 = vcmp.eq.f32.partialorder %v8370_v17, inf  ;;  %v8451_v45 = vld [vmem:[%s11320_s1 + $0x20] sm:$0xff] }
  0xf6   : > { %1243 = vperm.xlu0 %6359, %v1145_v62   ;;  %vm564_vm10 = vcmp.eq.f32.partialorder %v8364_v12, inf  ;;  %v570_v60 = vmul.f32 %v6540_v3, %v8349_v19  ;;  %v407_v56 = vsub.f32 %v355_v58, %v11507_v53  ;;  %v554_v52 = vsel %vm552_vm6, %v553_v11, %v551_v48  ;;  %v6542_v24 = vpop.eup %6541 }
  0xf7   : > { %6553 = vrcp.f32 %v689_v15  ;;  %v406_v1 = vsub.f32 %v352_v42, %v11508_v41  ;;  %vm587_vm11 = vcmp.eq.f32.partialorder %v8370_v17, 0.0  ;;  %v588_v23 = vand.u32 2147483648, %v8370_v17 }
  0xf8   : > { %v8433_v10 = vpack.c.bf16 %v1484_v54, %v1481_v59  ;;  %v6544_v8 = vpop.eup %6543  ;;  %v8435_v51 = vmax.f32 %v407_v56, 0.0  ;;  %v572_v43 = vsel %vm571_vm7, %v8349_v19, %v570_v60  ;;  %6555 = vrcp.f32 %v686_v55  ;;  %v8460_v19 = vld [vmem:[%s11320_s1 + $0x28] sm:$0xff]  ;;  %v8477_v56 = vld [vmem:[%s11320_s1 + $0x30] sm:$0xff] }
  0xf9   : > { %1218 = vperm.xlu1 %6360, %v1135_v50   ;;  %vm566_vm12 = vcmp.eq.f32.partialorder %v8364_v12, 0.0  ;;  %v6546_v11 = vpop.eup %6545  ;;  %v563_v46 = vmul.f32 %v6544_v8, %v8364_v12  ;;  %v8442_v32 = vmax.f32 %v406_v1, 0.0  ;;  %v575_v14 = vsel %vm573_vm8, %v574_v49, %v572_v43  ;;  %v11509_v50 = vld [vmem:[#allocation28_spill] sm:$0xff] }
  0xfa   : > { %v688_v44 = vmax.f32 %v554_v52, 1e-15  ;;  %6103 = vmatprep.subr.bf16.mxu0 %v8433_v10  ;;  %6055 = vmatprep.subr.bf16.mxu1 %v8433_v10  ;;  %v6548_v61 = vpop.eup %6547  ;;  %v584_v62 = vmul.f32 %v6546_v11, %v8370_v17  ;;  %6557 = vrsqrt.f32 %v8435_v51  ;;  %v409_v15 = vsub.f32 %v361_v27, %v11509_v50  ;;  %v358_v11 = vpop.xlane.xlu0 %357  ;;  %v11510_v27 = vld [vmem:[#allocation29_spill] sm:$0xff] }
  0xfb   : > { %v691_v55 = vmax.f32 %v575_v14, 1e-15  ;;  %6105 = vmatpush3.bf16.msra.mxu0 %v8433_v10  ;;  %6057 = vmatpush3.bf16.msra.mxu1 %v8433_v10  ;;  %6559 = vrsqrt.f32 %v8442_v32  ;;  %v1149_v48 = vmul.f32 %v6548_v61, %v8128_v38  ;;  %v1139_v3 = vmul.f32 %v6542_v24, %v8146_v5 }
  0xfc   : > { %v567_v58 = vand.u32 2147483648, %v8364_v12  ;;  %v8467_v49 = vmax.f32 %v409_v15, 0.0  ;;  %v586_v60 = vsel %vm585_vm9, %v8370_v17, %v584_v62  ;;  %v1487_v53 = vand.u32 4294901760, %v8451_v45  ;;  %v6550_v42 = vpop.eup %6549  ;;  %v8491_v17 = vld [vmem:[%s11320_s1 + $0x38] sm:$0xff]  ;;  %v11511_v15 = vld [vmem:[#allocation30_spill] sm:$0xff] }
  0xfd   : > { %1223 = vperm.xlu1 %6360, %v8388_v63   ;;  %6561 = vrcp.f32 %v691_v55  ;;  %1253 = vperm.xlu0 %6359, %v1149_v48   ;;  %v589_v38 = vsel %vm587_vm11, %v588_v23, %v586_v60  ;;  %v565_v5 = vsel %vm564_vm10, %v8364_v12, %v563_v46  ;;  %v1490_v63 = vand.u32 4294901760, %v8460_v19 }
  0xfe   : > { %6563 = vrcp.f32 %v688_v44  ;;  %v693_v52 = vmax.f32 %v589_v38, 1e-15  ;;  %vm578_vm13 = vcmp.eq.f32.partialorder %v8410_v47, inf  ;;  %vm580_vm14 = vcmp.eq.f32.partialorder %v8410_v47, 0.0  ;;  %v6552_v24 = vpop.eup %6551  ;;  %v367_v44 = vpop.xlane.xlu1 %366 }
  0xff   : > { %6565 = vrsqrt.f32 %v8467_v49  ;;  %vm599_vm15 = vcmp.eq.f32.partialorder %v8435_v51, inf  ;;  %v568_v41 = vsel %vm566_vm12, %v567_v58, %v565_v5  ;;  %v581_v1 = vand.u32 2147483648, %v8410_v47 }
 0x100   : > { %v1493_v23 = vand.u32 4294901760, %v8477_v56  ;;  %v577_v43 = vmul.f32 %v6552_v24, %v8410_v47  ;;  %6567 = vrcp.f32 %v693_v52  ;;  %vm601_vm1 = vcmp.eq.f32.partialorder %v8435_v51, 0.0 }
 0x101   : > { %v6554_v8 = vpop.eup %6553  ;;  %1228 = vperm.xlu1 %6360, %v1139_v3   ;;  %v690_v46 = vmax.f32 %v568_v41, 1e-15  ;;  %v408_v14 = vsub.f32 %v358_v11, %v11510_v27  ;;  %v8506_v12 = vpack.c.bf16 %v1490_v63, %v1487_v53  ;;  %v1496_v62 = vand.u32 4294901760, %v8491_v17  ;;  %v11512_v41 = vld [vmem:[#allocation31_spill] sm:$0xff] }
 0x102   : > { %v1153_v61 = vmul.f32 %v6554_v8, %v8138_v18  ;;  %v6556_v50 = vpop.eup %6555  ;;  %v411_v55 = vsub.f32 %v367_v44, %v11511_v15  ;;  %v1143_v48 = vmul.f32 %v6550_v42, %v8159_v13  ;;  %v579_v3 = vsel %vm578_vm13, %v8410_v47, %v577_v43  ;;  %v364_v42 = vpop.xlane.xlu0 %363 }
 0x103   : > { %6569 = vrcp.f32 %v690_v46  ;;  %v8514_v58 = vmax.f32 %v408_v14, 0.0  ;;  %v602_v18 = vand.u32 2147483648, %v8435_v51  ;;  %v582_v60 = vsel %vm580_vm14, %v581_v1, %v579_v3  ;;  %6107 = vmatprep.subr.bf16.mxu0 %v8506_v12  ;;  %6059 = vmatprep.subr.bf16.mxu1 %v8506_v12  ;;  %v373_v46 = vpop.xlane.xlu1 %372 }
 0x104   : > { %1263 = vperm.xlu0 %6359, %v1153_v61   ;;  %v8524_v13 = vpack.c.bf16 %v1496_v62, %v1493_v23  ;;  %v6558_v38 = vpop.eup %6557  ;;  %v8526_v5 = vmax.f32 %v411_v55, 0.0  ;;  %vm613_vm2 = vcmp.eq.f32.partialorder %v8467_v49, inf  ;;  %v692_v52 = vmax.f32 %v582_v60, 1e-15  ;;  %6109 = vmatpush3.bf16.msra.mxu0 %v8506_v12 }
 0x105   : > { %1238 = vperm.xlu1 %6360, %v1143_v48   ;;  %vm592_vm3 = vcmp.eq.f32.partialorder %v8442_v32, inf  ;;  %v6560_v47 = vpop.eup %6559  ;;  %v598_v24 = vmul.f32 %v6558_v38, %v8435_v51  ;;  %6571 = vrsqrt.f32 %v8514_v58  ;;  %v410_v1 = vsub.f32 %v364_v42, %v11512_v41  ;;  %6061 = vmatpush3.bf16.msra.mxu1 %v8506_v12 }
 0x106   : > { %v1147_v8 = vmul.f32 %v6556_v50, %v8163_v37  ;;  %6111 = vmatprep.subr.bf16.mxu0 %v8524_v13  ;;  %v591_v11 = vmul.f32 %v6560_v47, %v8442_v32  ;;  %6573 = vrsqrt.f32 %v8526_v5  ;;  %vm594_vm4 = vcmp.eq.f32.partialorder %v8442_v32, 0.0  ;;  %v11513_v37 = vld [vmem:[#allocation32_spill] sm:$0xff]  ;;  %6063 = vmatprep.subr.bf16.mxu1 %v8524_v13 }
 0x107   : > { %v6562_v43 = vpop.eup %6561  ;;  %v595_v27 = vand.u32 2147483648, %v8442_v32  ;;  %v8542_v44 = vmax.f32 %v410_v1, 0.0  ;;  %v413_v61 = vsub.f32 %v373_v46, %v11513_v37  ;;  %v600_v15 = vsel %vm599_vm15, %v8435_v51, %v598_v24  ;;  %v370_v24 = vpop.xlane.xlu0 %369 }
 0x108   : > { %v6564_v14 = vpop.eup %6563  ;;  %v1157_v50 = vmul.f32 %v6562_v43, %v8144_v36  ;;  %v603_v48 = vsel %vm601_vm1, %v602_v18, %v600_v15  ;;  %v616_v3 = vand.u32 2147483648, %v8467_v49  ;;  %6575 = vrcp.f32 %v692_v52  ;;  %6113 = vmatpush3.bf16.msra.mxu0 %v8524_v13 }
 0x109   : > { %v6566_v55 = vpop.eup %6565  ;;  %1248 = vperm.xlu1 %6360, %v1147_v8   ;;  %v593_v60 = vsel %vm592_vm3, %v8442_v32, %v591_v11  ;;  %6577 = vrsqrt.f32 %v8542_v44  ;;  %vm615_vm5 = vcmp.eq.f32.partialorder %v8467_v49, 0.0  ;;  %v1095_v51 = vmul.f32 0.6931472, %v8156_v34  ;;  %6065 = vmatpush3.bf16.msra.mxu1 %v8524_v13 }
 0x10a   : > { %v612_v36 = vmul.f32 %v6566_v55, %v8467_v49  ;;  %1273 = vperm.xlu0 %6359, %v1157_v50   ;;  %v6568_v18 = vpop.eup %6567  ;;  %v8561_v38 = vmax.f32 %v413_v61, 0.0  ;;  %v695_v42 = vmax.f32 %v603_v48, 1e-15  ;;  %v1151_v52 = vmul.f32 %v6564_v14, %v8174_v2  ;;  %v11514_v2 = vld [vmem:[#allocation33_spill] sm:$0xff] }
 0x10b   : > { %v596_v47 = vsel %vm594_vm4, %v595_v27, %v593_v60  ;;  %v1161_v41 = vmul.f32 %v6568_v18, %v8154_v9  ;;  %v8572_v34 = vmul.f32 0.6931472, %v8171_v25  ;;  %v412_v11 = vsub.f32 %v370_v24, %v11514_v2  ;;  %v379_v9 = vpop.xlane.xlu1 %378  ;;  %v11515_v27 = vld [vmem:[#allocation34_spill] sm:$0xff]  ;;  %v376_v48 = vpop.xlane.xlu0 %375 }
 0x10c   : > { %v614_v1 = vsel %vm613_vm2, %v8467_v49, %v612_v36  ;;  %v694_v8 = vmax.f32 %v596_v47, 1e-15  ;;  %6579 = vrsqrt.f32 %v8561_v38  ;;  %vm606_vm6 = vcmp.eq.f32.partialorder %v8514_v58, inf  ;;  %v11516_v36 = vld [vmem:[#allocation35_spill] sm:$0xff] }
 0x10d   : > { %v6570_v43 = vpop.eup %6569  ;;  %v617_v32 = vsel %vm615_vm5, %v616_v3, %v614_v1  ;;  %1258 = vperm.xlu1 %6360, %v1151_v52   ;;  %6581 = vrcp.f32 %v695_v42  ;;  %vm627_vm7 = vcmp.eq.f32.partialorder %v8526_v5, inf  ;;  %vm629_vm8 = vcmp.eq.f32.partialorder %v8526_v5, 0.0 }
 0x10e   : > { %1283 = vperm.xlu0 %6359, %v1161_v41   ;;  %v697_v46 = vmax.f32 %v617_v32, 1e-15  ;;  %v8581_v25 = vmax.f32 %v412_v11, 0.0  ;;  %v415_v14 = vsub.f32 %v379_v9, %v11515_v27  ;;  %v1155_v37 = vmul.f32 %v6570_v43, %v8293_v31  ;;  %v11518_v9 = vld [vmem:[#allocation36_spill] sm:$0xff] }
 0x10f   : > { %6583 = vrcp.f32 %v694_v8  ;;  %v6572_v49 = vpop.eup %6571  ;;  %vm620_vm9 = vcmp.eq.f32.partialorder %v8542_v44, inf  ;;  %v623_v61 = vand.u32 2147483648, %v8542_v44  ;;  %v630_v50 = vand.u32 2147483648, %v8526_v5  ;;  %v385_v32 = vpop.xlane.xlu1 %384 }
 0x110   : > { %6585 = vrcp.f32 %v697_v46  ;;  %v6574_v15 = vpop.eup %6573  ;;  %v605_v55 = vmul.f32 %v6572_v49, %v8514_v58  ;;  %vm608_vm10 = vcmp.eq.f32.partialorder %v8514_v58, 0.0  ;;  %v609_v31 = vand.u32 2147483648, %v8514_v58 }
 0x111   : > { %6587 = vrsqrt.f32 %v8581_v25  ;;  %1268 = vperm.xlu1 %6360, %v1155_v37   ;;  %v626_v3 = vmul.f32 %v6574_v15, %v8526_v5  ;;  %v8593_v60 = vmax.f32 %v415_v14, 0.0  ;;  %v414_v18 = vsub.f32 %v376_v48, %v11516_v36 }
 0x112   : > { %vm641_vm11 = vcmp.eq.f32.partialorder %v8561_v38, inf  ;;  %v6576_v42 = vpop.eup %6575  ;;  %vm643_vm12 = vcmp.eq.f32.partialorder %v8561_v38, 0.0  ;;  %v607_v52 = vsel %vm606_vm6, %v8514_v58, %v605_v55  ;;  %v8604_v47 = vsub.f32 %v8077_v6, %v1475_v40 }
 0x113   : > { %v11517_v24 = vand.u32 4294901760, %v8082_v20  ;;  %v6578_v1 = vpop.eup %6577  ;;  %6589 = vrsqrt.f32 %v8593_v60  ;;  %v8612_v8 = vmax.f32 %v414_v18, 0.0  ;;  %v628_v43 = vsel %vm627_vm7, %v8526_v5, %v626_v3  ;;  %v382_v3 = vpop.xlane.xlu0 %381 }
 0x114   : > { %v1159_v2 = vmul.f32 %v6576_v42, %v1095_v51  ;;  %v619_v11 = vmul.f32 %v6578_v1, %v8542_v44  ;;  %v631_v6 = vsel %vm629_vm8, %v630_v50, %v628_v43  ;;  %v644_v40 = vand.u32 2147483648, %v8561_v38  ;;  %v11519_v42 = vld [vmem:[#allocation37_spill] sm:$0xff] }
 0x115   : > { %v8609_v41 = vsub.f32 %v8082_v20, %v11517_v24  ;;  %vm622_vm13 = vcmp.eq.f32.partialorder %v8542_v44, 0.0  ;;  %vm634_vm14 = vcmp.eq.f32.partialorder %v8581_v25, inf  ;;  %v637_v20 = vand.u32 2147483648, %v8581_v25 }
 0x116   : > { %6591 = vrsqrt.f32 %v8612_v8  ;;  %v417_v46 = vsub.f32 %v385_v32, %v11518_v9  ;;  %1278 = vperm.xlu1 %6360, %v1159_v2   ;;  %v6580_v51 = vpop.eup %6579  ;;  %v699_v27 = vmax.f32 %v631_v6, 1e-15  ;;  %v610_v14 = vsel %vm608_vm10, %v609_v31, %v607_v52 }
 0x117   : > { %v621_v5 = vsel %vm620_vm9, %v8542_v44, %v619_v11  ;;  %vm636_vm15 = vcmp.eq.f32.partialorder %v8581_v25, 0.0  ;;  %v6582_v37 = vpop.eup %6581  ;;  %v640_v49 = vmul.f32 %v6580_v51, %v8561_v38  ;;  %v1870_v15 = vand.u32 4294901760, %v8604_v47 }
 0x118   : > { %v8633_v50 = vmax.f32 %v417_v46, 0.0  ;;  %v1877_v55 = vand.u32 4294901760, %v8609_v41  ;;  %v1165_v58 = vmul.f32 %v6582_v37, %v8161_v22  ;;  %6593 = vrcp.f32 %v699_v27 }
 0x119   : > { %v6584_v48 = vpop.eup %6583  ;;  %v696_v31 = vmax.f32 %v610_v14, 1e-15  ;;  %v624_v36 = vsel %vm622_vm13, %v623_v61, %v621_v5  ;;  %v416_v52 = vsub.f32 %v382_v3, %v11519_v42  ;;  %v642_v24 = vsel %vm641_vm11, %v8561_v38, %v640_v49 }
 0x11a   : > { %v6586_v18 = vpop.eup %6585  ;;  %6595 = vrsqrt.f32 %v8633_v50  ;;  %v1163_v1 = vmul.f32 %v6584_v48, %v8572_v34  ;;  %1293 = vperm.xlu0 %6359, %v1165_v58   ;;  %v645_v2 = vsel %vm643_vm12, %v644_v40, %v642_v24  ;;  %vm655_vm1 = vcmp.eq.f32.partialorder %v8593_v60, inf }
 0x11b   : > { %v6588_v43 = vpop.eup %6587  ;;  %v1169_v22 = vmul.f32 %v6586_v18, %v8169_v35  ;;  %vm657_vm2 = vcmp.eq.f32.partialorder %v8593_v60, 0.0  ;;  %v8652_v61 = vmax.f32 %v416_v52, 0.0  ;;  %v701_v11 = vmax.f32 %v645_v2, 1e-15 }
 0x11c   : > { %v633_v44 = vmul.f32 %v6588_v43, %v8581_v25  ;;  %1288 = vperm.xlu1 %6360, %v1163_v1   ;;  %v698_v32 = vmax.f32 %v624_v36, 1e-15  ;;  %6597 = vrcp.f32 %v696_v31  ;;  %v1871_v34 = vsub.f32 %v8604_v47, %v1870_v15 }
 0x11d   : > { %v1878_v6 = vsub.f32 %v8609_v41, %v1877_v55  ;;  %v8656_v35 = vpack.c.bf16 %v1877_v55, %v1870_v15  ;;  %v6590_v38 = vpop.eup %6589  ;;  %vm648_vm3 = vcmp.eq.f32.partialorder %v8612_v8, inf  ;;  %6599 = vrsqrt.f32 %v8652_v61 }
 0x11e   : > { %v658_v40 = vand.u32 2147483648, %v8593_v60  ;;  %v635_v9 = vsel %vm634_vm14, %v8581_v25, %v633_v44  ;;  %v654_v46 = vmul.f32 %v6590_v38, %v8593_v60  ;;  %v651_v51 = vand.u32 2147483648, %v8612_v8  ;;  %1303 = vperm.xlu0 %6359, %v1169_v22  }
 0x11f   : > { %6601 = vrcp.f32 %v701_v11  ;;  %v638_v27 = vsel %vm636_vm15, %v637_v20, %v635_v9  ;;  %6115 = vmatprep.subr.bf16.mxu0 %v8656_v35  ;;  %v1872_v37 = vand.u32 4294901760, %v1871_v34  ;;  %v1879_v49 = vand.u32 4294901760, %v1878_v6 }
 0x120   : > { %v6592_v14 = vpop.eup %6591  ;;  %6603 = vrcp.f32 %v698_v32  ;;  %v700_v5 = vmax.f32 %v638_v27, 1e-15  ;;  %v656_v55 = vsel %vm655_vm1, %v8593_v60, %v654_v46  ;;  %vm650_vm4 = vcmp.eq.f32.partialorder %v8612_v8, 0.0 }
 0x121   : > { %v647_v15 = vmul.f32 %v6592_v14, %v8612_v8  ;;  %6605 = vlog2.f32 %v8124_v57  ;;  %v659_v25 = vsel %vm657_vm2, %v658_v40, %v656_v55  ;;  %vm669_vm5 = vcmp.eq.f32.partialorder %v8633_v50, inf }
 0x122   : > { %v1103_v20 = vmul.f32 0.6931472, %v8185_v33  ;;  %v8679_v48 = vpack.c.bf16 %v1879_v49, %v1872_v37  ;;  %v6594_v3 = vpop.eup %6593  ;;  %v703_v58 = vmax.f32 %v659_v25, 1e-15  ;;  %v672_v31 = vand.u32 2147483648, %v8633_v50 }
 0x123   : > { %6607 = vrcp.f32 %v700_v5  ;;  %v649_v36 = vsel %vm648_vm3, %v8612_v8, %v647_v15  ;;  %v1173_v57 = vmul.f32 %v6594_v3, %v8176_v16  ;;  %v8690_v33 = vsub.f32 %v8381_v7, %v1481_v59 }
 0x124   : > { %v6596_v18 = vpop.eup %6595  ;;  %v652_v60 = vsel %vm650_vm4, %v651_v51, %v649_v36  ;;  %6067 = vmatprep.subr.bf16.mxu1 %v8679_v48  ;;  %v8695_v42 = vsub.f32 %v8402_v39, %v1484_v54  ;;  %6609 = vrcp.f32 %v703_v58  ;;  %vm671_vm6 = vcmp.eq.f32.partialorder %v8633_v50, 0.0 }
 0x125   : > { %v668_v52 = vmul.f32 %v6596_v18, %v8633_v50  ;;  %v702_v8 = vmax.f32 %v652_v60, 1e-15  ;;  %1313 = vperm.xlu0 %6359, %v1173_v57   ;;  %v1113_v16 = vmul.f32 0.6931472, %v8149_v21  ;;  %v1107_v24 = vmul.f32 0.6931472, %v8201_v30 }
 0x126   : > { %v1884_v1 = vand.u32 4294901760, %v8690_v33  ;;  %v1891_v7 = vand.u32 4294901760, %v8695_v42  ;;  %v6598_v59 = vpop.eup %6597  ;;  %vm662_vm7 = vcmp.eq.f32.partialorder %v8652_v61, inf  ;;  %v665_v39 = vand.u32 2147483648, %v8652_v61 }
 0x127   : > { %v670_v54 = vsel %vm669_vm5, %v8633_v50, %v668_v52  ;;  %6611 = vrcp.f32 %v702_v8  ;;  %v6600_v43 = vpop.eup %6599  ;;  %v1167_v2 = vmul.f32 %v6598_v59, %v1103_v20  ;;  %vm664_vm8 = vcmp.eq.f32.partialorder %v8652_v61, 0.0 }
 0x128   : > { %v673_v22 = vsel %vm671_vm6, %v672_v31, %v670_v54  ;;  %v1885_v21 = vsub.f32 %v8690_v33, %v1884_v1  ;;  %v1892_v30 = vsub.f32 %v8695_v42, %v1891_v7  ;;  %v661_v11 = vmul.f32 %v6600_v43, %v8652_v61 }
 0x129   : > { %v6602_v44 = vpop.eup %6601  ;;  %v705_v32 = vmax.f32 %v673_v22, 1e-15  ;;  %v8712_v34 = vpack.c.bf16 %v1891_v7, %v1884_v1  ;;  %1298 = vperm.xlu1 %6360, %v1167_v2   ;;  %v1117_v46 = vmul.f32 0.6931472, %v8179_v29  ;;  %v1111_v14 = vmul.f32 0.6931472, %v8207_v0 }
 0x12a   : > { %v6604_v6 = vpop.eup %6603  ;;  %v1177_v38 = vmul.f32 %v6602_v44, %v1113_v16  ;;  %v1886_v50 = vand.u32 4294901760, %v1885_v21  ;;  %v1893_v40 = vand.u32 4294901760, %v1892_v30  ;;  %v663_v51 = vsel %vm662_vm7, %v8652_v61, %v661_v11  ;;  %v6937_v21 = vld [vmem:[%s7152_s11] sm:$0xff] }
 0x12b   : > { %v6606_v9 = vpop.eup %6605  ;;  %6613 = vrcp.f32 %v705_v32  ;;  %v1171_v27 = vmul.f32 %v6604_v6, %v1107_v24  ;;  %v666_v5 = vsel %vm664_vm8, %v665_v39, %v663_v51  ;;  %v1115_v29 = vmul.f32 0.6931472, %v8232_v26 }
 0x12c   : > { %1323 = vperm.xlu0 %6359, %v1177_v38   ;;  %v8719_v37 = vpack.c.bf16 %v1893_v40, %v1886_v50  ;;  %v704_v15 = vmax.f32 %v666_v5, 1e-15  ;;  %v1121_v61 = vmul.f32 0.6931472, %v8227_v28  ;;  %v1119_v36 = vmul.f32 0.6931472, %v6606_v9 }
 0x12d   : > { %v6608_v49 = vpop.eup %6607  ;;  %1308 = vperm.xlu1 %6360, %v1171_v27   ;;  %v1897_v60 = vsub.f32 %v8451_v45, %v1487_v53  ;;  %v1904_v26 = vsub.f32 %v8460_v19, %v1490_v63  ;;  %v8734_v1 = vsub.f32 %v8477_v56, %v1493_v23  ;;  %v8739_v45 = vsub.f32 %v8491_v17, %v1496_v62  ;;  %v6938_v38 = vld [vmem:[%s7152_s11 + $0x8] sm:$0xff]  ;;  %v6939_v40 = vld [vmem:[%s7152_s11 + $0x10] sm:$0xff] }
 0x12e   : > { %v6610_v55 = vpop.eup %6609  ;;  %6615 = vrcp.f32 %v704_v15  ;;  %v1175_v20 = vmul.f32 %v6608_v49, %v1111_v14  ;;  %v8753_v17 = vpack.c.bf16 %v8609_v41, %v8604_v47  ;;  %v8757_v62 = vpack.c.bf16 %v8695_v42, %v8690_v33 }
 0x12f   : > { %v1181_v25 = vmul.f32 %v6610_v55, %v1117_v46  ;;  %v1898_v52 = vand.u32 4294901760, %v1897_v60  ;;  %v1905_v28 = vand.u32 4294901760, %v1904_v26  ;;  %v1912_v19 = vand.u32 4294901760, %v8734_v1 }
 0x130   : > { %v1919_v63 = vand.u32 4294901760, %v8739_v45  ;;  %v8777_v5 = vpack.c.bf16 %v1904_v26, %v1897_v60 }
 0x131   : > { %v6612_v3 = vpop.eup %6611  ;;  %1333 = vperm.xlu0 %6359, %v1181_v25   ;;  %1318 = vperm.xlu1 %6360, %v1175_v20   ;;  %v1899_v8 = vsub.f32 %v1897_v60, %v1898_v52  ;;  %v1906_v16 = vsub.f32 %v1904_v26, %v1905_v28  ;;  %v8729_v24 = vpack.c.bf16 %v1905_v28, %v1898_v52  ;;  %v6940_v25 = vld [vmem:[%s7152_s11 + $0x18] sm:$0xff] }
 0x132   : > { %v1179_v58 = vmul.f32 %v6612_v3, %v1115_v29  ;;  %v1913_v39 = vsub.f32 %v8734_v1, %v1912_v19  ;;  %v1920_v56 = vsub.f32 %v8739_v45, %v1919_v63  ;;  %v8747_v23 = vpack.c.bf16 %v1919_v63, %v1912_v19 }
 0x133   : > { %v1900_v53 = vand.u32 4294901760, %v1899_v8  ;;  %v1907_v7 = vand.u32 4294901760, %v1906_v16 }
 0x134   : > { %v1914_v54 = vand.u32 4294901760, %v1913_v39  ;;  %v1921_v43 = vand.u32 4294901760, %v1920_v56 }
 0x135   : > { %v6614_v31 = vpop.eup %6613  ;;  %1328 = vperm.xlu1 %6360, %v1179_v58   ;;  %v8743_v59 = vpack.c.bf16 %v1907_v7, %v1900_v53  ;;  %v6942_v7 = vld [vmem:[%s7152_s11 + $0x28] sm:$0xff] }
 0x136   : > { %v1185_v0 = vmul.f32 %v6614_v31, %v1121_v61  ;;  %v8749_v22 = vpack.c.bf16 %v1921_v43, %v1914_v54 }
 0x138   : > { %1343 = vperm.xlu0 %6359, %v1185_v0   ;;  %v6616_v18 = vpop.eup %6615 }
 0x139   : > { %v1183_v57 = vmul.f32 %v6616_v18, %v1119_v36 }
 0x13b   : > { %1338 = vperm.xlu1 %6360, %v1183_v57   ;;  %v6941_v57 = vld [vmem:[%s7152_s11 + $0x20] sm:$0xff] }
 0x160   : > { %v1189_v2 = vpop.permute.xlu0 %1188 }
 0x161   : > { %v1346_v30 = vmul.f32 %v6937_v21, %v1189_v2  ;;  %v6944_v2 = vld [vmem:[%s7152_s11 + $0x58] sm:$0xff] }
 0x163   : > { %v1379_v44 = vsel %vm289_vm0, %v1346_v30, 0 }
 0x164   : > { %v8761_v11 = vand.u32 4294901760, %v1379_v44  ;;  %v1194_v32 = vpop.permute.xlu1 %1193 }
 0x165   : > { %v1347_v50 = vmul.f32 %v6938_v38, %v1194_v32  ;;  %v6945_v38 = vld [vmem:[%s7152_s11 + $0x30] sm:$0xff] }
 0x166   : > { %v8764_v6 = vsub.f32 %v1379_v44, %v8761_v11 }
 0x167   : > { %v1382_v47 = vsel %vm289_vm0, %v1347_v50, 0 }
 0x168   : > { %v1549_v41 = vand.u32 4294901760, %v8764_v6  ;;  %v8769_v33 = vand.u32 4294901760, %v1382_v47  ;;  %v1199_v42 = vpop.permute.xlu1 %1198 }
 0x169   : > { %v1348_v9 = vmul.f32 %v6939_v40, %v1199_v42  ;;  %v8832_v42 = vpack.c.bf16 %v8739_v45, %v8734_v1  ;;  %v6947_v45 = vld [vmem:[%s7152_s11 + $0x68] sm:$0xff] }
 0x16a   : > { %5874 = vmatprep.mubr.f32.mxu0 %v1549_v41  ;;  %v1550_v46 = vsub.f32 %v8764_v6, %v1549_v41  ;;  %v8774_v51 = vsub.f32 %v1382_v47, %v8769_v33 }
 0x16b   : > { %v1385_v27 = vsel %vm289_vm0, %v1348_v9, 0 }
 0x16c   : > { %v1551_v14 = vand.u32 4294901760, %v1550_v46  ;;  %v8779_v49 = vand.u32 4294901760, %v1385_v27  ;;  %v1204_v15 = vpop.permute.xlu1 %1203  ;;  %v1559_v55 = vand.u32 4294901760, %v8774_v51 }
 0x16d   : > { %v1349_v20 = vmul.f32 %v6940_v25, %v1204_v15 }
 0x16e   : > { %5682 = vmatprep.mubr.f32.mxu1 %v1551_v14  ;;  %v8784_v29 = vsub.f32 %v1385_v27, %v8779_v49  ;;  %5875 = vmatmul.mubr.f32.vlgmr.msra.gmra.mrb[0].mxu0 %v1559_v55  ;;  %v1560_v3 = vsub.f32 %v8774_v51, %v1559_v55 }
 0x16f   : > { %v1388_v61 = vsel %vm289_vm0, %v1349_v20, 0  ;;  %v1234_v58 = vpop.permute.xlu0 %1233  ;;  %6117 = vmatpush3.bf16.msra.mxu0 %v8656_v35 }
 0x170   : > { %v8789_v31 = vand.u32 4294901760, %v1388_v61  ;;  %v1209_v0 = vpop.permute.xlu1 %1208  ;;  %v1561_v36 = vand.u32 4294901760, %v1560_v3  ;;  %v1569_v18 = vand.u32 4294901760, %v8784_v29  ;;  %6119 = vmatprep.subr.bf16.mxu0 %v8712_v34 }
 0x171   : > { %v1350_v60 = vmul.f32 %v6941_v57, %v1209_v0 }
 0x172   : > { %v8795_v26 = vsub.f32 %v1388_v61, %v8789_v31  ;;  %5683 = vmatmul.mubr.f32.vlgmr.msra.gmra.mrb[0].mxu1 %v1561_v36  ;;  %5877 = vmatprep.mubr.f32.mxu0 %v1569_v18  ;;  %v1570_v52 = vsub.f32 %v8784_v29, %v1569_v18 }
 0x173   : > { %v1391_v35 = vsel %vm289_vm0, %v1350_v60, 0  ;;  %6069 = vmatpush3.bf16.msra.mxu1 %v8679_v48  ;;  %6121 = vmatpush3.bf16.msra.mxu0 %v8712_v34  ;;  %v6943_v48 = vld [vmem:[%s7152_s11 + $0x48] sm:$0xff] }
 0x174   : > { %v8801_v28 = vand.u32 4294901760, %v1391_v35  ;;  %v1214_v8 = vpop.permute.xlu1 %1213  ;;  %v1571_v16 = vand.u32 4294901760, %v1570_v52  ;;  %v1579_v53 = vand.u32 4294901760, %v8795_v26  ;;  %6071 = vmatprep.subr.bf16.mxu1 %v8719_v37  ;;  %6123 = vmatprep.subr.bf16.mxu0 %v8729_v24  ;;  %v1355_v34 = vmul.f32 %v6943_v48, %v1234_v58  ;;  %v6948_v52 = vld [vmem:[%s7152_s11 + $0x40] sm:$0xff] }
 0x175   : > { %v1351_v19 = vmul.f32 %v6942_v7, %v1214_v8  ;;  %v1244_v63 = vpop.permute.xlu0 %1243 }
 0x176   : > { %v8808_v39 = vsub.f32 %v1391_v35, %v8801_v28  ;;  %5685 = vmatprep.mubr.f32.mxu1 %v1571_v16  ;;  %5878 = vmatmul.mubr.f32.gmra.mrb[2].mxu0 %v1579_v53  ;;  %v1580_v56 = vsub.f32 %v8795_v26, %v1579_v53  ;;  %v1357_v21 = vmul.f32 %v6944_v2, %v1244_v63  ;;  %v1406_v47 = vsel %vm289_vm0, %v1355_v34, 0  ;;  %v6949_v63 = vld [vmem:[%s7152_s11 + $0x78] sm:$0xff] }
 0x177   : > { %v1394_v54 = vsel %vm289_vm0, %v1351_v19, 0  ;;  %6073 = vmatpush3.bf16.msra.mxu1 %v8719_v37  ;;  %6125 = vmatpush3.bf16.msra.mxu0 %v8729_v24  ;;  %v8840_v15 = vand.u32 4294901760, %v1406_v47 }
 0x178   : > { %11520 = vst [vmem:[#allocation8_spill] sm:$0xff] %v8808_v39  ;;  %v8815_v43 = vand.u32 4294901760, %v1394_v54  ;;  %v1219_v30 = vpop.permute.xlu1 %1218  ;;  %v1581_v44 = vand.u32 4294901760, %v1580_v56  ;;  %v1589_v32 = vand.u32 4294901760, %v8808_v39  ;;  %6075 = vmatprep.subr.bf16.mxu1 %v8743_v59  ;;  %6127 = vmatprep.subr.bf16.mxu0 %v8747_v23  ;;  %v1412_v40 = vsel %vm289_vm0, %v1357_v21, 0  ;;  %v6950_v21 = vld [vmem:[%s7152_s11 + $0x50] sm:$0xff] }
 0x179   : > { %v1352_v50 = vmul.f32 %v6945_v38, %v1219_v30  ;;  %v8848_v3 = vand.u32 4294901760, %v1412_v40  ;;  %v8858_v60 = vsub.f32 %v1406_v47, %v8840_v15 }
 0x17a   : > { %v8824_v37 = vsub.f32 %v1394_v54, %v8815_v43  ;;  %5686 = vmatmul.mubr.f32.gmra.mrb[2].mxu1 %v1581_v44  ;;  %5880 = vmatprep.mubr.f32.mxu0 %v1589_v32  ;;  %v1590_v24 = vsub.f32 %v8808_v39, %v1589_v32 }
 0x17b   : > { %v1397_v41 = vsel %vm289_vm0, %v1352_v50, 0  ;;  %6077 = vmatpush3.bf16.msra.mxu1 %v8743_v59  ;;  %6129 = vmatpush3.bf16.msra.mxu0 %v8747_v23  ;;  %v6946_v23 = vld [vmem:[%s7152_s11 + $0x38] sm:$0xff]  ;;  %11523 = vst [vmem:[#allocation11_spill] sm:$0xff] %v8858_v60  ;;  %v8866_v16 = vsub.f32 %v1412_v40, %v8848_v3  ;;  %v1639_v44 = vand.u32 4294901760, %v8858_v60 }
 0x17c   : > { %11521 = vst [vmem:[#allocation9_spill] sm:$0xff] %v8824_v37  ;;  %v8835_v9 = vand.u32 4294901760, %v1397_v41  ;;  %v1224_v46 = vpop.permute.xlu1 %1223  ;;  %v1591_v27 = vand.u32 4294901760, %v1590_v24  ;;  %v1599_v14 = vand.u32 4294901760, %v8824_v37  ;;  %6079 = vmatprep.subr.bf16.mxu1 %v8749_v22  ;;  %6131 = vmatprep.subr.bf16.mxu0 %v8103_v4  ;;  %v1254_v59 = vpop.permute.xlu0 %1253 }
 0x17d   : > { %v1353_v55 = vmul.f32 %v6946_v23, %v1224_v46  ;;  %v1359_v25 = vmul.f32 %v6947_v45, %v1254_v59  ;;  %11525 = vst [vmem:[#allocation13_spill] sm:$0xff] %v8866_v16 }
 0x17e   : > { %v8844_v1 = vsub.f32 %v1397_v41, %v8835_v9  ;;  %5688 = vmatprep.mubr.f32.mxu1 %v1591_v27  ;;  %5881 = vmatmul.mubr.f32.gmra.mrb[4].mxu0 %v1599_v14  ;;  %v1600_v20 = vsub.f32 %v8824_v37, %v1599_v14  ;;  %v1659_v41 = vand.u32 4294901760, %v8866_v16 }
 0x17f   : > { %v1400_v61 = vsel %vm289_vm0, %v1353_v55, 0  ;;  %6081 = vmatpush3.bf16.msra.mxu1 %v8749_v22  ;;  %v1418_v58 = vsel %vm289_vm0, %v1359_v25, 0  ;;  %v6951_v55 = vld [vmem:[%s7152_s11 + $0x60] sm:$0xff]  ;;  %v1640_v25 = vsub.f32 %v8858_v60, %v1639_v44 }
 0x180   : > { %11522 = vst [vmem:[#allocation10_spill] sm:$0xff] %v8844_v1  ;;  %v8853_v0 = vand.u32 4294901760, %v1400_v61  ;;  %v1229_v36 = vpop.permute.xlu1 %1228  ;;  %v1601_v18 = vand.u32 4294901760, %v1600_v20  ;;  %v1609_v57 = vand.u32 4294901760, %v8844_v1  ;;  %6083 = vmatprep.subr.bf16.mxu1 %v8753_v17  ;;  %v8868_v53 = vand.u32 4294901760, %v1418_v58  ;;  %v6952_v20 = vld [vmem:[%s7152_s11 + $0x88] sm:$0xff] }
 0x181   : > { %v1354_v35 = vmul.f32 %v6948_v52, %v1229_v36 }
 0x182   : > { %v8862_v8 = vsub.f32 %v1400_v61, %v8853_v0  ;;  %5689 = vmatmul.mubr.f32.gmra.mrb[4].mxu1 %v1601_v18  ;;  %5883 = vmatprep.mubr.f32.mxu0 %v1609_v57  ;;  %v1610_v22 = vsub.f32 %v8844_v1, %v1609_v57  ;;  %v8883_v47 = vsub.f32 %v1418_v58, %v8868_v53 }
 0x183   : > { %v1264_v7 = vpop.permute.xlu0 %1263  ;;  %v1403_v19 = vsel %vm289_vm0, %v1354_v35, 0  ;;  %v1660_v57 = vsub.f32 %v8866_v16, %v1659_v41 }
 0x184   : > { %11524 = vst [vmem:[#allocation12_spill] sm:$0xff] %v8862_v8  ;;  %v1361_v48 = vmul.f32 %v6949_v63, %v1264_v7  ;;  %v8872_v34 = vand.u32 4294901760, %v1403_v19  ;;  %v1239_v56 = vpop.permute.xlu1 %1238  ;;  %v1611_v54 = vand.u32 4294901760, %v1610_v22  ;;  %v1619_v2 = vand.u32 4294901760, %v8862_v8  ;;  %11527 = vst [vmem:[#allocation15_spill] sm:$0xff] %v8883_v47 }
 0x185   : > { %v1356_v30 = vmul.f32 %v6950_v21, %v1239_v56  ;;  %v1679_v52 = vand.u32 4294901760, %v8883_v47 }
 0x186   : > { %v1424_v32 = vsel %vm289_vm0, %v1361_v48, 0  ;;  %v8879_v38 = vsub.f32 %v1403_v19, %v8872_v34  ;;  %5691 = vmatprep.mubr.f32.mxu1 %v1611_v54  ;;  %5884 = vmatmul.mubr.f32.gmra.mrb[6].mxu0 %v1619_v2  ;;  %v1620_v50 = vsub.f32 %v8862_v8, %v1619_v2  ;;  %v6953_v2 = vld [vmem:[%s7152_s11 + $0x70] sm:$0xff] }
 0x187   : > { %v1409_v24 = vsel %vm289_vm0, %v1356_v30, 0  ;;  %v8890_v59 = vand.u32 4294901760, %v1424_v32  ;;  %v1641_v30 = vand.u32 4294901760, %v1640_v25 }
 0x188   : > { %11526 = vst [vmem:[#allocation14_spill] sm:$0xff] %v8879_v38  ;;  %v8887_v40 = vand.u32 4294901760, %v1409_v24  ;;  %v1249_v46 = vpop.permute.xlu1 %1248  ;;  %v1621_v27 = vand.u32 4294901760, %v1620_v50  ;;  %v1629_v14 = vand.u32 4294901760, %v8879_v38 }
 0x189   : > { %v1274_v23 = vpop.permute.xlu0 %1273  ;;  %v1358_v45 = vmul.f32 %v6951_v55, %v1249_v46  ;;  %v8907_v48 = vsub.f32 %v1424_v32, %v8890_v59  ;;  %v1661_v32 = vand.u32 4294901760, %v1660_v57 }
 0x18a   : > { %v1363_v61 = vmul.f32 %v6952_v20, %v1274_v23  ;;  %v8896_v58 = vsub.f32 %v1409_v24, %v8887_v40  ;;  %5692 = vmatmul.mubr.f32.gmra.mrb[6].mxu1 %v1621_v27  ;;  %5886 = vmatprep.mubr.f32.mxu0 %v1629_v14  ;;  %v1630_v36 = vsub.f32 %v8879_v38, %v1629_v14 }
 0x18b   : > { %v1415_v18 = vsel %vm289_vm0, %v1358_v45, 0  ;;  %5887 = vmatmul.mubr.f32.gmra.mrb[8].mxu0 %v1639_v44  ;;  %11529 = vst [vmem:[#allocation17_spill] sm:$0xff] %v8907_v48  ;;  %v6954_v44 = vld [vmem:[%s7152_s11 + $0x98] sm:$0xff]  ;;  %v1680_v14 = vsub.f32 %v8883_v47, %v1679_v52 }
 0x18c   : > { %11528 = vst [vmem:[#allocation16_spill] sm:$0xff] %v8896_v58  ;;  %v1430_v35 = vsel %vm289_vm0, %v1363_v61, 0  ;;  %v8903_v22 = vand.u32 4294901760, %v1415_v18  ;;  %v1259_v7 = vpop.permute.xlu1 %1258  ;;  %v1631_v19 = vand.u32 4294901760, %v1630_v36  ;;  %v1649_v63 = vand.u32 4294901760, %v8896_v58 }
 0x18d   : > { %v8909_v56 = vand.u32 4294901760, %v1430_v35  ;;  %v1284_v54 = vpop.permute.xlu0 %1283  ;;  %v1360_v21 = vmul.f32 %v6953_v2, %v1259_v7 }
 0x18e   : > { %v1365_v50 = vmul.f32 %v6954_v44, %v1284_v54  ;;  %v8914_v24 = vsub.f32 %v1415_v18, %v8903_v22  ;;  %5694 = vmatprep.mubr.f32.mxu1 %v1631_v19  ;;  %5889 = vmatprep.mubr.f32.mxu0 %v1649_v63  ;;  %v1650_v46 = vsub.f32 %v8896_v58, %v1649_v63  ;;  %v6955_v18 = vld [vmem:[%s7152_s11 + $0x80] sm:$0xff]  ;;  %v1681_v44 = vand.u32 4294901760, %v1680_v14 }
 0x18f   : > { %v1421_v27 = vsel %vm289_vm0, %v1360_v21, 0  ;;  %5695 = vmatmul.mubr.f32.gmra.mrb[8].mxu1 %v1641_v30  ;;  %5890 = vmatmul.mubr.f32.gmra.mrb[10].mxu0 %v1659_v41  ;;  %v8924_v61 = vsub.f32 %v1430_v35, %v8909_v56  ;;  %v1699_v41 = vand.u32 4294901760, %v8907_v48 }
 0x190   : > { %11530 = vst [vmem:[#allocation18_spill] sm:$0xff] %v8914_v24  ;;  %v1436_v23 = vsel %vm289_vm0, %v1365_v50, 0  ;;  %v8920_v55 = vand.u32 4294901760, %v1421_v27  ;;  %v1269_v45 = vpop.permute.xlu1 %1268  ;;  %v1651_v25 = vand.u32 4294901760, %v1650_v46  ;;  %v1669_v20 = vand.u32 4294901760, %v8914_v24 }
 0x191   : > { %11531 = vst [vmem:[#allocation19_spill] sm:$0xff] %v8924_v61  ;;  %v8926_v36 = vand.u32 4294901760, %v1436_v23  ;;  %v1362_v7 = vmul.f32 %v6955_v18, %v1269_v45  ;;  %v1700_v50 = vsub.f32 %v8907_v48, %v1699_v41  ;;  %v1719_v46 = vand.u32 4294901760, %v8924_v61  ;;  %v6956_v45 = vld [vmem:[%s7152_s11 + $0x90] sm:$0xff] }
 0x192   : > { %v8931_v57 = vsub.f32 %v1421_v27, %v8920_v55  ;;  %5697 = vmatprep.mubr.f32.mxu1 %v1651_v25  ;;  %5892 = vmatprep.mubr.f32.mxu0 %v1669_v20  ;;  %v1670_v19 = vsub.f32 %v8914_v24, %v1669_v20 }
 0x193   : > { %v1427_v63 = vsel %vm289_vm0, %v1362_v7, 0  ;;  %5698 = vmatmul.mubr.f32.gmra.mrb[10].mxu1 %v1661_v32  ;;  %5893 = vmatmul.mubr.f32.gmra.mrb[12].mxu0 %v1679_v52  ;;  %v8939_v21 = vsub.f32 %v1436_v23, %v8926_v36  ;;  %v1701_v18 = vand.u32 4294901760, %v1700_v50  ;;  %v1720_v7 = vsub.f32 %v8924_v61, %v1719_v46 }
 0x194   : > { %11532 = vst [vmem:[#allocation20_spill] sm:$0xff] %v8931_v57  ;;  %v8935_v35 = vand.u32 4294901760, %v1427_v63  ;;  %v1671_v54 = vand.u32 4294901760, %v1670_v19  ;;  %v1689_v2 = vand.u32 4294901760, %v8931_v57 }
 0x195   : > { %11533 = vst [vmem:[#allocation21_spill] sm:$0xff] %v8939_v21  ;;  %v1279_v30 = vpop.permute.xlu1 %1278  ;;  %v1721_v61 = vand.u32 4294901760, %v1720_v7 }
 0x196   : > { %v8944_v27 = vsub.f32 %v1427_v63, %v8935_v35  ;;  %v1364_v32 = vmul.f32 %v6956_v45, %v1279_v30  ;;  %5700 = vmatprep.mubr.f32.mxu1 %v1671_v54  ;;  %5895 = vmatprep.mubr.f32.mxu0 %v1689_v2  ;;  %v1690_v52 = vsub.f32 %v8931_v57, %v1689_v2  ;;  %v1739_v54 = vand.u32 4294901760, %v8939_v21  ;;  %v6957_v2 = vld [vmem:[%s7152_s11 + $0xa8] sm:$0xff]  ;;  %v6958_v45 = vld [vmem:[%s7152_s11 + $0xa0] sm:$0xff] }
 0x197   : > { %5701 = vmatmul.mubr.f32.gmra.mrb[12].mxu1 %v1681_v44  ;;  %5896 = vmatmul.mubr.f32.gmra.mrb[14].mxu0 %v1699_v41 }
 0x198   : > { %11534 = vst [vmem:[#allocation22_spill] sm:$0xff] %v8944_v27  ;;  %v1433_v23 = vsel %vm289_vm0, %v1364_v32, 0  ;;  %v1691_v25 = vand.u32 4294901760, %v1690_v52  ;;  %v1709_v14 = vand.u32 4294901760, %v8944_v27 }
 0x199   : > { %v8950_v20 = vand.u32 4294901760, %v1433_v23  ;;  %v1294_v19 = vpop.permute.xlu0 %1293 }
 0x19a   : > { %5703 = vmatprep.mubr.f32.mxu1 %v1691_v25  ;;  %5898 = vmatprep.mubr.f32.mxu0 %v1709_v14  ;;  %v1710_v63 = vsub.f32 %v8944_v27, %v1709_v14  ;;  %v1367_v41 = vmul.f32 %v6957_v2, %v1294_v19  ;;  %v6959_v2 = vld [vmem:[%s7152_s11 + $0xb8] sm:$0xff] }
 0x19b   : > { %v8957_v30 = vsub.f32 %v1433_v23, %v8950_v20  ;;  %v1289_v44 = vpop.permute.xlu1 %1288  ;;  %5704 = vmatmul.mubr.f32.gmra.mrb[14].mxu1 %v1701_v18  ;;  %5899 = vmatmul.mubr.f32.gmra.mrb[16].mxu0 %v1719_v46  ;;  %v1740_v23 = vsub.f32 %v8939_v21, %v1739_v54 }
 0x19c   : > { %v1366_v50 = vmul.f32 %v6958_v45, %v1289_v44  ;;  %v1711_v32 = vand.u32 4294901760, %v1710_v63  ;;  %v1442_v52 = vsel %vm289_vm0, %v1367_v41, 0 }
 0x19d   : > { %11535 = vst [vmem:[#allocation23_spill] sm:$0xff] %v8957_v30  ;;  %v1729_v25 = vand.u32 4294901760, %v8957_v30  ;;  %v8962_v14 = vand.u32 4294901760, %v1442_v52  ;;  %v1304_v27 = vpop.permute.xlu0 %1303  ;;  %v1741_v45 = vand.u32 4294901760, %v1740_v23 }
 0x19e   : > { %v1439_v19 = vsel %vm289_vm0, %v1366_v50, 0  ;;  %5706 = vmatprep.mubr.f32.mxu1 %v1711_v32  ;;  %v1369_v48 = vmul.f32 %v6959_v2, %v1304_v27 }
 0x19f   : > { %v8967_v18 = vand.u32 4294901760, %v1439_v19  ;;  %5901 = vmatprep.mubr.f32.mxu0 %v1729_v25  ;;  %5707 = vmatmul.mubr.f32.gmra.mrb[16].mxu1 %v1721_v61  ;;  %v1730_v46 = vsub.f32 %v8957_v30, %v1729_v25  ;;  %v8971_v63 = vsub.f32 %v1442_v52, %v8962_v14  ;;  %v6960_v25 = vld [vmem:[%s7152_s11 + $0xc8] sm:$0xff] }
 0x1a0   : > { %5902 = vmatmul.mubr.f32.gmra.mrb[18].mxu0 %v1739_v54  ;;  %v1448_v44 = vsel %vm289_vm0, %v1369_v48, 0 }
 0x1a1   : > { %11536 = vst [vmem:[#allocation24_spill] sm:$0xff] %v8971_v63  ;;  %v8974_v7 = vsub.f32 %v1439_v19, %v8967_v18  ;;  %v1731_v41 = vand.u32 4294901760, %v1730_v46  ;;  %v1759_v27 = vand.u32 4294901760, %v8971_v63  ;;  %v8980_v32 = vand.u32 4294901760, %v1448_v44 }
 0x1a3   : > { %11537 = vst [vmem:[#allocation25_spill] sm:$0xff] %v8974_v7  ;;  %5709 = vmatprep.mubr.f32.mxu1 %v1731_v41  ;;  %v1749_v50 = vand.u32 4294901760, %v8974_v7  ;;  %v1760_v61 = vsub.f32 %v8971_v63, %v1759_v27  ;;  %v8986_v46 = vsub.f32 %v1448_v44, %v8980_v32  ;;  %v6961_v63 = vld [vmem:[%s7152_s11 + $0xb0] sm:$0xff] }
 0x1a4   : > { %5710 = vmatmul.mubr.f32.gmra.mrb[18].mxu1 %v1741_v45  ;;  %v1314_v52 = vpop.permute.xlu0 %1313 }
 0x1a5   : > { %5904 = vmatprep.mubr.f32.mxu0 %v1749_v50  ;;  %v1750_v54 = vsub.f32 %v8974_v7, %v1749_v50  ;;  %v1371_v19 = vmul.f32 %v6960_v25, %v1314_v52  ;;  %v1761_v2 = vand.u32 4294901760, %v1760_v61  ;;  %11538 = vst [vmem:[#allocation26_spill] sm:$0xff] %v8986_v46  ;;  %v6962_v50 = vld [vmem:[%s7152_s11 + $0xd8] sm:$0xff]  ;;  %v1779_v44 = vand.u32 4294901760, %v8986_v46 }
 0x1a6   : > { %5905 = vmatmul.mubr.f32.gmra.mrb[20].mxu0 %v1759_v27 }
 0x1a7   : > { %v1751_v48 = vand.u32 4294901760, %v1750_v54  ;;  %v1454_v23 = vsel %vm289_vm0, %v1371_v19, 0  ;;  %v6963_v19 = vld [vmem:[%s7152_s11 + $0xc0] sm:$0xff] }
 0x1a8   : > { %v1299_v41 = vpop.permute.xlu1 %1298  ;;  %v8988_v45 = vand.u32 4294901760, %v1454_v23 }
 0x1a9   : > { %5712 = vmatprep.mubr.f32.mxu1 %v1751_v48  ;;  %v1368_v21 = vmul.f32 %v6961_v63, %v1299_v41 }
 0x1aa   : > { %5713 = vmatmul.mubr.f32.gmra.mrb[20].mxu1 %v1761_v2  ;;  %v8997_v54 = vsub.f32 %v1454_v23, %v8988_v45  ;;  %v1780_v23 = vsub.f32 %v8986_v46, %v1779_v44 }
 0x1ab   : > { %v1324_v30 = vpop.permute.xlu0 %1323  ;;  %v1445_v27 = vsel %vm289_vm0, %v1368_v21, 0 }
 0x1ac   : > { %v1373_v7 = vmul.f32 %v6962_v50, %v1324_v30  ;;  %v8993_v52 = vand.u32 4294901760, %v1445_v27  ;;  %v1309_v61 = vpop.permute.xlu1 %1308  ;;  %11539 = vst [vmem:[#allocation27_spill] sm:$0xff] %v8997_v54  ;;  %v1781_v38 = vand.u32 4294901760, %v1780_v23 }
 0x1ad   : > { %v1370_v63 = vmul.f32 %v6963_v19, %v1309_v61  ;;  %v6965_v19 = vld [vmem:[%s7152_s11 + $0xd0] sm:$0xff] }
 0x1ae   : > { %v1460_v25 = vsel %vm289_vm0, %v1373_v7, 0  ;;  %v9004_v30 = vsub.f32 %v1445_v27, %v8993_v52  ;;  %v6964_v7 = vld [vmem:[%s7152_s11 + $0xe8] sm:$0xff]  ;;  %v1799_v27 = vand.u32 4294901760, %v8997_v54 }
 0x1af   : > { %v9001_v48 = vand.u32 4294901760, %v1460_v25  ;;  %v1451_v21 = vsel %vm289_vm0, %v1370_v63, 0 }
 0x1b0   : > { %11540 = vst [vmem:[#allocation28_spill] sm:$0xff] %v9004_v30  ;;  %v1334_v2 = vpop.permute.xlu0 %1333  ;;  %v9007_v41 = vand.u32 4294901760, %v1451_v21  ;;  %v1319_v50 = vpop.permute.xlu1 %1318  ;;  %v1769_v57 = vand.u32 4294901760, %v9004_v30  ;;  %v1800_v8 = vsub.f32 %v8997_v54, %v1799_v27 }
 0x1b1   : > { %v9012_v47 = vsub.f32 %v1460_v25, %v9001_v48  ;;  %v1375_v61 = vmul.f32 %v6964_v7, %v1334_v2  ;;  %v1372_v24 = vmul.f32 %v6965_v19, %v1319_v50  ;;  %v6966_v19 = vld [vmem:[%s7152_s11 + $0xe0] sm:$0xff] }
 0x1b2   : > { %v9018_v63 = vsub.f32 %v1451_v21, %v9007_v41  ;;  %5907 = vmatprep.mubr.f32.mxu0 %v1769_v57  ;;  %v1770_v16 = vsub.f32 %v9004_v30, %v1769_v57  ;;  %v6967_v30 = vld [vmem:[%s7152_s11 + $0xf8] sm:$0xff] }
 0x1b3   : > { %11541 = vst [vmem:[#allocation29_spill] sm:$0xff] %v9012_v47  ;;  %v1466_v58 = vsel %vm289_vm0, %v1375_v61, 0  ;;  %v1457_v46 = vsel %vm289_vm0, %v1372_v24, 0  ;;  %5908 = vmatmul.mubr.f32.gmra.mrb[22].mxu0 %v1779_v44  ;;  %v1819_v57 = vand.u32 4294901760, %v9012_v47 }
 0x1b4   : > { %11542 = vst [vmem:[#allocation30_spill] sm:$0xff] %v9018_v63  ;;  %v9023_v25 = vand.u32 4294901760, %v1466_v58  ;;  %v9025_v60 = vand.u32 4294901760, %v1457_v46  ;;  %v1329_v2 = vpop.permute.xlu1 %1328  ;;  %v1771_v50 = vand.u32 4294901760, %v1770_v16  ;;  %v1789_v7 = vand.u32 4294901760, %v9018_v63 }
 0x1b5   : > { %v1374_v21 = vmul.f32 %v6966_v19, %v1329_v2 }
 0x1b6   : > { %v9032_v61 = vsub.f32 %v1466_v58, %v9023_v25  ;;  %v9035_v44 = vsub.f32 %v1457_v46, %v9025_v60  ;;  %5715 = vmatprep.mubr.f32.mxu1 %v1771_v50  ;;  %5910 = vmatprep.mubr.f32.mxu0 %v1789_v7  ;;  %v1790_v16 = vsub.f32 %v9018_v63, %v1789_v7  ;;  %v1801_v46 = vand.u32 4294901760, %v1800_v8 }
 0x1b7   : > { %v1344_v24 = vpop.permute.xlu0 %1343  ;;  %v1463_v2 = vsel %vm289_vm0, %v1374_v21, 0  ;;  %5716 = vmatmul.mubr.f32.gmra.mrb[22].mxu1 %v1781_v38  ;;  %5911 = vmatmul.mubr.f32.gmra.mrb[24].mxu0 %v1799_v27  ;;  %v1820_v50 = vsub.f32 %v9012_v47, %v1819_v57  ;;  %v6968_v27 = vld [vmem:[%s7152_s11 + $0xf0] sm:$0xff]  ;;  %s9211_s11 = sld [smem:[#allocation2 + $0x1]] }
 0x1b8   : > { %v1377_v1 = vmul.f32 %v6967_v30, %v1344_v24  ;;  %v9040_v23 = vand.u32 4294901760, %v1463_v2  ;;  %v1791_v19 = vand.u32 4294901760, %v1790_v16  ;;  %v1809_v58 = vand.u32 4294901760, %v9035_v44 }
 0x1b9   : > { %v1839_v37 = vand.u32 4294901760, %v9032_v61  ;;  %v1821_v63 = vand.u32 4294901760, %v1820_v50 }
 0x1ba   : > { %v1472_v54 = vsel %vm289_vm0, %v1377_v1, 0  ;;  %v9049_v30 = vsub.f32 %v1463_v2, %v9040_v23  ;;  %v1339_v21 = vpop.permute.xlu1 %1338  ;;  %5718 = vmatprep.mubr.f32.mxu1 %v1791_v19  ;;  %5913 = vmatprep.mubr.f32.mxu0 %v1809_v58  ;;  %v1810_v38 = vsub.f32 %v9035_v44, %v1809_v58 }
 0x1bb   : > { %v9046_v7 = vand.u32 4294901760, %v1472_v54  ;;  %v1376_v24 = vmul.f32 %v6968_v27, %v1339_v21  ;;  %5719 = vmatmul.mubr.f32.gmra.mrb[24].mxu1 %v1801_v46  ;;  %5914 = vmatmul.mubr.f32.gmra.mrb[26].mxu0 %v1819_v57  ;;  %v1840_v2 = vsub.f32 %v9032_v61, %v1839_v37 }
 0x1bc   : > { %v1811_v8 = vand.u32 4294901760, %v1810_v38  ;;  %v1829_v16 = vand.u32 4294901760, %v9049_v30 }
 0x1bd   : > { %v9054_v1 = vsub.f32 %v1472_v54, %v9046_v7  ;;  %v1469_v47 = vsel %vm289_vm0, %v1376_v24, 0  ;;  %v1841_v46 = vand.u32 4294901760, %v1840_v2  ;;  %s4799_s20 = smul.f32 2.0, %s9211_s11 }
 0x1be   : > { %v9059_v39 = vand.u32 4294901760, %v1469_v47  ;;  %5721 = vmatprep.mubr.f32.mxu1 %v1811_v8  ;;  %5916 = vmatprep.mubr.f32.mxu0 %v1829_v16  ;;  %v1830_v19 = vsub.f32 %v9049_v30, %v1829_v16  ;;  %s4897_s23 = smul.f32 %s9211_s11, %s9211_s11 }
 0x1bf   : > { %5722 = vmatmul.mubr.f32.gmra.mrb[26].mxu1 %v1821_v63  ;;  %5917 = vmatmul.mubr.f32.gmra.mrb[28].mxu0 %v1839_v37  ;;  %v1859_v57 = vand.u32 4294901760, %v9054_v1 }
 0x1c0   : > { %v9064_v54 = vsub.f32 %v1469_v47, %v9059_v39  ;;  %v1831_v58 = vand.u32 4294901760, %v1830_v19  ;;  %v253_v47 = vld [vmem:[%s11321_s2] sm:$0x1]  ;;  %s4898_s27 = smul.f32 %s9471_s22, %s4897_s23 }
 0x1c1   : > { %v1860_v21 = vsub.f32 %v9054_v1, %v1859_v57 }
 0x1c2   : > { %5724 = vmatprep.mubr.f32.mxu1 %v1831_v58  ;;  %v1849_v50 = vand.u32 4294901760, %v9064_v54 }
 0x1c3   : > { %5725 = vmatmul.mubr.f32.gmra.mrb[28].mxu1 %v1841_v46  ;;  %v1861_v63 = vand.u32 4294901760, %v1860_v21 }
 0x1c4   : > { %5919 = vmatprep.mubr.f32.mxu0 %v1849_v50  ;;  %v1850_v38 = vsub.f32 %v9064_v54, %v1849_v50 }
 0x1c5   : > { %5920 = vmatmul.mubr.f32.gmra.mrb[30].mxu0 %v1859_v57 }
 0x1c6   : > { %5938 = vmatprep.mubr.f32.mxu0 %v8761_v11  ;;  %v1851_v37 = vand.u32 4294901760, %v1850_v38 }
 0x1c8   : > { %5727 = vmatprep.mubr.f32.mxu1 %v1851_v37 }
 0x1c9   : > { %5728 = vmatmul.mubr.f32.gmra.mrb[30].mxu1 %v1861_v63  ;;  %5939 = vmatmul.mubr.f32.vlgmr.msra.gmra.mrb[0].mxu0 %v8769_v33 }
 0x1ca   : > { %5746 = vmatprep.mubr.f32.mxu1 %v8761_v11  ;;  %5941 = vmatprep.mubr.f32.mxu0 %v8779_v49 }
 0x1cb   : > { %6133 = vmatpush3.bf16.msra.mxu0 %v8103_v4  ;;  %v11543_v4 = vld [vmem:[#allocation8_spill] sm:$0xff] }
 0x1cc   : > { %6135 = vmatprep.subr.bf16.mxu0 %v8433_v10 }
 0x1cd   : > { %5747 = vmatmul.mubr.f32.vlgmr.msra.gmra.mrb[0].mxu1 %v8769_v33  ;;  %5942 = vmatmul.mubr.f32.gmra.mrb[2].mxu0 %v8789_v31 }
 0x1ce   : > { %6085 = vmatpush3.bf16.msra.mxu1 %v8753_v17  ;;  %5749 = vmatprep.mubr.f32.mxu1 %v8779_v49  ;;  %v11547_v17 = vld [vmem:[#allocation14_spill] sm:$0xff] }
 0x1cf   : > { %5944 = vmatprep.mubr.f32.mxu0 %v8801_v28  ;;  %6087 = vmatprep.subr.bf16.mxu1 %v8757_v62 }
 0x1d0   : > { %6137 = vmatpush3.bf16.msra.mxu0 %v8433_v10  ;;  %v11544_v10 = vld [vmem:[#allocation9_spill] sm:$0xff] }
 0x1d1   : > { %5750 = vmatmul.mubr.f32.gmra.mrb[2].mxu1 %v8789_v31  ;;  %5945 = vmatmul.mubr.f32.gmra.mrb[4].mxu0 %v8815_v43 }
 0x1d2   : > { %5752 = vmatprep.mubr.f32.mxu1 %v8801_v28  ;;  %5947 = vmatprep.mubr.f32.mxu0 %v8835_v9 }
 0x1d3   : > { %6089 = vmatpush3.bf16.msra.mxu1 %v8757_v62  ;;  %6139 = vmatprep.subr.bf16.mxu0 %v8506_v12  ;;  %v11548_v62 = vld [vmem:[#allocation11_spill] sm:$0xff] }
 0x1d4   : > { %6091 = vmatprep.subr.bf16.mxu1 %v8777_v5  ;;  %6141 = vmatpush3.bf16.msra.mxu0 %v8506_v12  ;;  %v11545_v12 = vld [vmem:[#allocation10_spill] sm:$0xff] }
 0x1d5   : > { %5753 = vmatmul.mubr.f32.gmra.mrb[4].mxu1 %v8815_v43  ;;  %5948 = vmatmul.mubr.f32.gmra.mrb[6].mxu0 %v8853_v0 }
 0x1d6   : > { %5755 = vmatprep.mubr.f32.mxu1 %v8835_v9  ;;  %5950 = vmatprep.mubr.f32.mxu0 %v8872_v34 }
 0x1d7   : > { %6093 = vmatpush3.bf16.msra.mxu1 %v8777_v5  ;;  %6143 = vmatprep.subr.bf16.mxu0 %v8524_v13  ;;  %v11553_v5 = vld [vmem:[#allocation20_spill] sm:$0xff] }
 0x1d8   : > { %6095 = vmatprep.subr.bf16.mxu1 %v8832_v42  ;;  %6145 = vmatpush3.bf16.msra.mxu0 %v8524_v13  ;;  %v11546_v13 = vld [vmem:[#allocation12_spill] sm:$0xff] }
 0x1d9   : > { %5756 = vmatmul.mubr.f32.gmra.mrb[6].mxu1 %v8853_v0  ;;  %5951 = vmatmul.mubr.f32.gmra.mrb[8].mxu0 %v8840_v15 }
 0x1da   : > { %5758 = vmatprep.mubr.f32.mxu1 %v8872_v34  ;;  %5953 = vmatprep.mubr.f32.mxu0 %v8887_v40 }
 0x1db   : > { %6097 = vmatpush3.bf16.msra.mxu1 %v8832_v42  ;;  %v11560_v42 = vld [vmem:[#allocation24_spill] sm:$0xff] }
 0x1dd   : > { %5759 = vmatmul.mubr.f32.gmra.mrb[8].mxu1 %v8840_v15  ;;  %5954 = vmatmul.mubr.f32.gmra.mrb[10].mxu0 %v8848_v3 }
 0x1de   : > { %5761 = vmatprep.mubr.f32.mxu1 %v8887_v40  ;;  %5956 = vmatprep.mubr.f32.mxu0 %v8903_v22 }
 0x1e1   : > { %5762 = vmatmul.mubr.f32.gmra.mrb[10].mxu1 %v8848_v3  ;;  %5957 = vmatmul.mubr.f32.gmra.mrb[12].mxu0 %v8868_v53 }
 0x1e2   : > { %5764 = vmatprep.mubr.f32.mxu1 %v8903_v22  ;;  %5959 = vmatprep.mubr.f32.mxu0 %v8920_v55 }
 0x1e5   : > { %5765 = vmatmul.mubr.f32.gmra.mrb[12].mxu1 %v8868_v53  ;;  %5960 = vmatmul.mubr.f32.gmra.mrb[14].mxu0 %v8890_v59 }
 0x1e6   : > { %5767 = vmatprep.mubr.f32.mxu1 %v8920_v55  ;;  %5962 = vmatprep.mubr.f32.mxu0 %v8935_v35 }
 0x1e9   : > { %5768 = vmatmul.mubr.f32.gmra.mrb[14].mxu1 %v8890_v59  ;;  %5963 = vmatmul.mubr.f32.gmra.mrb[16].mxu0 %v8909_v56 }
 0x1ea   : > { %5770 = vmatprep.mubr.f32.mxu1 %v8935_v35  ;;  %5965 = vmatprep.mubr.f32.mxu0 %v8950_v20 }
 0x1ed   : > { %5771 = vmatmul.mubr.f32.gmra.mrb[16].mxu1 %v8909_v56  ;;  %5966 = vmatmul.mubr.f32.gmra.mrb[18].mxu0 %v8926_v36 }
 0x1ee   : > { %5773 = vmatprep.mubr.f32.mxu1 %v8950_v20  ;;  %5968 = vmatprep.mubr.f32.mxu0 %v8967_v18 }
 0x1f1   : > { %5774 = vmatmul.mubr.f32.gmra.mrb[18].mxu1 %v8926_v36  ;;  %5969 = vmatmul.mubr.f32.gmra.mrb[20].mxu0 %v8962_v14 }
 0x1f2   : > { %5776 = vmatprep.mubr.f32.mxu1 %v8967_v18  ;;  %5971 = vmatprep.mubr.f32.mxu0 %v8993_v52 }
 0x1f5   : > { %5777 = vmatmul.mubr.f32.gmra.mrb[20].mxu1 %v8962_v14  ;;  %5972 = vmatmul.mubr.f32.gmra.mrb[22].mxu0 %v8980_v32 }
 0x1f6   : > { %5779 = vmatprep.mubr.f32.mxu1 %v8993_v52  ;;  %5974 = vmatprep.mubr.f32.mxu0 %v9007_v41 }
 0x1f9   : > { %5780 = vmatmul.mubr.f32.gmra.mrb[22].mxu1 %v8980_v32  ;;  %5975 = vmatmul.mubr.f32.gmra.mrb[24].mxu0 %v8988_v45 }
 0x1fa   : > { %5782 = vmatprep.mubr.f32.mxu1 %v9007_v41  ;;  %5977 = vmatprep.mubr.f32.mxu0 %v9025_v60 }
 0x1fd   : > { %5783 = vmatmul.mubr.f32.gmra.mrb[24].mxu1 %v8988_v45  ;;  %5978 = vmatmul.mubr.f32.gmra.mrb[26].mxu0 %v9001_v48 }
 0x1fe   : > { %5785 = vmatprep.mubr.f32.mxu1 %v9025_v60  ;;  %5980 = vmatprep.mubr.f32.mxu0 %v9040_v23 }
 0x201   : > { %5786 = vmatmul.mubr.f32.gmra.mrb[26].mxu1 %v9001_v48  ;;  %5981 = vmatmul.mubr.f32.gmra.mrb[28].mxu0 %v9023_v25 }
 0x202   : > { %5788 = vmatprep.mubr.f32.mxu1 %v9040_v23  ;;  %5983 = vmatprep.mubr.f32.mxu0 %v9059_v39 }
 0x205   : > { %5789 = vmatmul.mubr.f32.gmra.mrb[28].mxu1 %v9023_v25  ;;  %5984 = vmatmul.mubr.f32.gmra.mrb[30].mxu0 %v9046_v7 }
 0x206   : > { %5791 = vmatprep.mubr.f32.mxu1 %v9059_v39  ;;  %6002 = vmatprep.mubr.f32.mxu0 %v8761_v11  ;;  %v11549_v11 = vld [vmem:[#allocation16_spill] sm:$0xff] }
 0x209   : > { %5792 = vmatmul.mubr.f32.gmra.mrb[30].mxu1 %v9046_v7  ;;  %6003 = vmatmul.mubr.f32.vlgmr.msra.gmra.mrb[0].mxu0 %v8769_v33  ;;  %v11551_v33 = vld [vmem:[#allocation18_spill] sm:$0xff] }
 0x20a   : > { %5810 = vmatprep.mubr.f32.mxu1 %v8764_v6  ;;  %6005 = vmatprep.mubr.f32.mxu0 %v8779_v49  ;;  %v11550_v6 = vld [vmem:[#allocation13_spill] sm:$0xff] }
 0x20b   : > { %v11554_v49 = vld [vmem:[#allocation17_spill] sm:$0xff] }
 0x20d   : > { %5811 = vmatmul.mubr.f32.vlgmr.msra.gmra.mrb[0].mxu1 %v8774_v51  ;;  %6006 = vmatmul.mubr.f32.gmra.mrb[2].mxu0 %v8789_v31  ;;  %v11552_v51 = vld [vmem:[#allocation15_spill] sm:$0xff] }
 0x20e   : > { %5813 = vmatprep.mubr.f32.mxu1 %v8784_v29  ;;  %6008 = vmatprep.mubr.f32.mxu0 %v8801_v28  ;;  %v11555_v29 = vld [vmem:[#allocation22_spill] sm:$0xff]  ;;  %v11556_v31 = vld [vmem:[#allocation19_spill] sm:$0xff]  ;;  %v11558_v28 = vld [vmem:[#allocation21_spill] sm:$0xff] }
 0x211   : > { %5814 = vmatmul.mubr.f32.gmra.mrb[2].mxu1 %v8795_v26  ;;  %6009 = vmatmul.mubr.f32.gmra.mrb[4].mxu0 %v8815_v43  ;;  %v11557_v26 = vld [vmem:[#allocation23_spill] sm:$0xff]  ;;  %v11559_v43 = vld [vmem:[#allocation25_spill] sm:$0xff] }
 0x212   : > { %5816 = vmatprep.mubr.f32.mxu1 %v11543_v4  ;;  %6011 = vmatprep.mubr.f32.mxu0 %v8835_v9  ;;  %v11561_v9 = vld [vmem:[#allocation28_spill] sm:$0xff] }
 0x215   : > { %5817 = vmatmul.mubr.f32.gmra.mrb[4].mxu1 %v11544_v10  ;;  %6012 = vmatmul.mubr.f32.gmra.mrb[6].mxu0 %v8853_v0  ;;  %v11564_v0 = vld [vmem:[#allocation27_spill] sm:$0xff] }
 0x216   : > { %5819 = vmatprep.mubr.f32.mxu1 %v11545_v12  ;;  %6014 = vmatprep.mubr.f32.mxu0 %v8872_v34 }
 0x219   : > { %5820 = vmatmul.mubr.f32.gmra.mrb[6].mxu1 %v11546_v13  ;;  %6015 = vmatmul.mubr.f32.gmra.mrb[8].mxu0 %v8840_v15  ;;  %v11562_v15 = vld [vmem:[#allocation26_spill] sm:$0xff] }
 0x21a   : > { %5822 = vmatprep.mubr.f32.mxu1 %v11547_v17  ;;  %6017 = vmatprep.mubr.f32.mxu0 %v8887_v40  ;;  %v9218_v40 = vstv %s9211_s11  ;;  %s7054_s11 = smov [#allocation5]  }
 0x21b   : > { %s6988_s12 = sshll.u32 %s7054_s11, 4  ;;  %s6989_s12 = int_to_ptr.vmem [resolvable:$false] %s6988_s12 }
 0x21c   : > { %s6990_s13 = scalar_lea.vmem %s6989_s12, 8192  ;;  %p6991_p13 = scmp.lt.s32.totalorder %s11271_s6, %s6989_s12 }
 0x21d   : > { %5823 = vmatmul.mubr.f32.gmra.mrb[8].mxu1 %v11548_v62  ;;  %6018 = vmatmul.mubr.f32.gmra.mrb[10].mxu0 %v8848_v3  ;;  %v11563_v3 = vld [vmem:[#allocation30_spill] sm:$0xff]  ;;  %p6992_p0 = scmp.lt.s32.totalorder %s6990_s13, %s6984_s10 }
 0x21e   : > { %5825 = vmatprep.mubr.f32.mxu1 %v11549_v11  ;;  %6020 = vmatprep.mubr.f32.mxu0 %v8903_v22 }
 0x21f   : > { %p6993_p1 = por %p6992_p0, %p6991_p13 }
 0x221   : > { %5826 = vmatmul.mubr.f32.gmra.mrb[10].mxu1 %v11550_v6  ;;  %6021 = vmatmul.mubr.f32.gmra.mrb[12].mxu0 %v8868_v53  ;;  %v11565_v53 = vld [vmem:[#allocation29_spill] sm:$0xff]  ;;  %p6994_p2 = pnand %p6993_p1, %p6987_p12 }
 0x222   : > { %5828 = vmatprep.mubr.f32.mxu1 %v11551_v33  ;;  %6023 = vmatprep.mubr.f32.mxu0 %v8920_v55 }
 0x225   : > { %5829 = vmatmul.mubr.f32.gmra.mrb[12].mxu1 %v11552_v51  ;;  %6024 = vmatmul.mubr.f32.gmra.mrb[14].mxu0 %v8890_v59  ;;  %v4696_v59 = vmul.f32 %v9218_v40, %v253_v47 }
 0x226   : > { %5831 = vmatprep.mubr.f32.mxu1 %v11553_v5  ;;  %6026 = vmatprep.mubr.f32.mxu0 %v8935_v35 }
 0x229   : > { %5832 = vmatmul.mubr.f32.gmra.mrb[14].mxu1 %v11554_v49  ;;  %6027 = vmatmul.mubr.f32.gmra.mrb[16].mxu0 %v8909_v56 }
 0x22a   : > { %5834 = vmatprep.mubr.f32.mxu1 %v11555_v29  ;;  %6029 = vmatprep.mubr.f32.mxu0 %v8950_v20 }
 0x22d   : > { %5835 = vmatmul.mubr.f32.gmra.mrb[16].mxu1 %v11556_v31  ;;  %6030 = vmatmul.mubr.f32.gmra.mrb[18].mxu0 %v8926_v36 }
 0x22e   : > { %5837 = vmatprep.mubr.f32.mxu1 %v11557_v26  ;;  %6032 = vmatprep.mubr.f32.mxu0 %v8967_v18 }
 0x231   : > { %5838 = vmatmul.mubr.f32.gmra.mrb[18].mxu1 %v11558_v28  ;;  %6033 = vmatmul.mubr.f32.gmra.mrb[20].mxu0 %v8962_v14 }
 0x232   : > { %5840 = vmatprep.mubr.f32.mxu1 %v11559_v43  ;;  %6035 = vmatprep.mubr.f32.mxu0 %v8993_v52 }
 0x235   : > { %5841 = vmatmul.mubr.f32.gmra.mrb[20].mxu1 %v11560_v42  ;;  %6036 = vmatmul.mubr.f32.gmra.mrb[22].mxu0 %v8980_v32 }
 0x236   : > { %5843 = vmatprep.mubr.f32.mxu1 %v11561_v9  ;;  %6038 = vmatprep.mubr.f32.mxu0 %v9007_v41 }
 0x239   : > { %5844 = vmatmul.mubr.f32.gmra.mrb[22].mxu1 %v11562_v15  ;;  %6039 = vmatmul.mubr.f32.gmra.mrb[24].mxu0 %v8988_v45 }
 0x23a   : > { %5846 = vmatprep.mubr.f32.mxu1 %v11563_v3  ;;  %6041 = vmatprep.mubr.f32.mxu0 %v9025_v60  ;;  %v4337_v60 = vlaneseq }
 0x23c   : > { %v4338_v34 = vshrl.u32 %v4337_v60, 7 }
 0x23d   : > { %5847 = vmatmul.mubr.f32.gmra.mrb[24].mxu1 %v11564_v0  ;;  %6042 = vmatmul.mubr.f32.gmra.mrb[26].mxu0 %v9001_v48 }
 0x23e   : > { %5849 = vmatprep.mubr.f32.mxu1 %v9035_v44  ;;  %6044 = vmatprep.mubr.f32.mxu0 %v9040_v23 }
 0x241   : > { %5850 = vmatmul.mubr.f32.gmra.mrb[26].mxu1 %v11565_v53  ;;  %6045 = vmatmul.mubr.f32.gmra.mrb[28].mxu0 %v9023_v25 }
 0x242   : > { %5852 = vmatprep.mubr.f32.mxu1 %v9049_v30  ;;  %6047 = vmatprep.mubr.f32.mxu0 %v9059_v39  ;;  %v4339_v39 = vsub.s32 0, %v4338_v34 }
 0x244   : > { %v9221_v22 = vrot.slane %v4696_v59, %v4339_v39  ;;  %v9223_v36 = vrot.slane %v253_v47, %v4339_v39 }
 0x245   : > { %5853 = vmatmul.mubr.f32.gmra.mrb[28].mxu1 %v9032_v61  ;;  %6048 = vmatmul.mubr.f32.gmra.mrb[30].mxu0 %v9046_v7 }
 0x246   : > { %5855 = vmatprep.mubr.f32.mxu1 %v9064_v54 }
 0x249   : > { %5856 = vmatmul.mubr.f32.gmra.mrb[30].mxu1 %v9054_v1 }
 0x2dc   : > { %v6004_v56 = vpop.f32.mrb[0].mxu0 }
 0x2dd   : > { %v3154_v55 = vpop.f32.mrb[1].mxu0 }
 0x2e0   : > { %v5812_v35 = vpop.f32.mrb[0].mxu1  ;;  %v6007_v20 = vpop.f32.mrb[2].mxu0 }
 0x2e1   : > { %v9225_v14 = vadd.f32 %v6004_v56, %v5812_v35  ;;  %v2248_v18 = vpop.f32.mrb[1].mxu1  ;;  %v3166_v32 = vpop.f32.mrb[3].mxu0 }
 0x2e2   : > { %v9227_v45 = vadd.f32 %v3154_v55, %v2248_v18 }
 0x2e3   : > { %v4343_v52 = vmul.f32 %v9225_v14, %v9223_v36  ;;  %v3345_v48 = vmul.f32 %v9225_v14, %v9225_v14 }
 0x2e4   : > { %v5815_v41 = vpop.f32.mrb[2].mxu1  ;;  %v6010_v25 = vpop.f32.mrb[4].mxu0  ;;  %v4342_v30 = vmul.f32 %v9227_v45, %v9223_v36  ;;  %v3344_v27 = vmul.f32 %v9227_v45, %v9227_v45 }
 0x2e5   : > { %v9233_v61 = vadd.f32 %v6007_v20, %v5815_v41  ;;  %v3178_v44 = vpop.f32.mrb[5].mxu0  ;;  %4376 = vadd.xlane.f32.xlu1 %v4343_v52  ;;  %3378 = vadd.xlane.f32.xlu0 %v3345_v48  ;;  %v2262_v23 = vpop.f32.mrb[3].mxu1 }
 0x2e6   : > { %v9235_v7 = vadd.f32 %v3166_v32, %v2262_v23 }
 0x2e7   : > { %v3347_v57 = vmul.f32 %v9233_v61, %v9233_v61  ;;  %v4345_v63 = vmul.f32 %v9233_v61, %v9223_v36 }
 0x2e8   : > { %11566 = vst [vmem:[#allocation31_spill] sm:$0xff] %v9235_v7  ;;  %v5818_v24 = vpop.f32.mrb[4].mxu1  ;;  %v6013_v1 = vpop.f32.mrb[6].mxu0  ;;  %v3346_v54 = vmul.f32 %v9235_v7, %v9235_v7  ;;  %v4344_v4 = vmul.f32 %v9235_v7, %v9223_v36 }
 0x2e9   : > { %v9241_v8 = vadd.f32 %v6010_v25, %v5818_v24  ;;  %v3190_v16 = vpop.f32.mrb[7].mxu0  ;;  %4374 = vadd.xlane.f32.xlu0 %v4342_v30  ;;  %3376 = vadd.xlane.f32.xlu1 %v3344_v27  ;;  %v2276_v2 = vpop.f32.mrb[5].mxu1 }
 0x2ea   : > { %v9243_v19 = vadd.f32 %v3178_v44, %v2276_v2 }
 0x2eb   : > { %11567 = vst [vmem:[#allocation32_spill] sm:$0xff] %v9241_v8  ;;  %v3349_v6 = vmul.f32 %v9241_v8, %v9241_v8  ;;  %v4347_v28 = vmul.f32 %v9241_v8, %v9223_v36 }
 0x2ec   : > { %11568 = vst [vmem:[#allocation33_spill] sm:$0xff] %v9243_v19  ;;  %v5821_v58 = vpop.f32.mrb[6].mxu1  ;;  %v6016_v46 = vpop.f32.mrb[8].mxu0  ;;  %v3348_v33 = vmul.f32 %v9243_v19, %v9243_v19  ;;  %v4346_v43 = vmul.f32 %v9243_v19, %v9223_v36 }
 0x2ed   : > { %v9249_v50 = vadd.f32 %v6013_v1, %v5821_v58  ;;  %v3202_v21 = vpop.f32.mrb[9].mxu0  ;;  %3382 = vadd.xlane.f32.xlu1 %v3347_v57  ;;  %3380 = vadd.xlane.f32.xlu0 %v3346_v54  ;;  %v2290_v38 = vpop.f32.mrb[7].mxu1 }
 0x2ee   : > { %v9251_v37 = vadd.f32 %v3190_v16, %v2290_v38 }
 0x2ef   : > { %11569 = vst [vmem:[#allocation34_spill] sm:$0xff] %v9249_v50  ;;  %v3351_v34 = vmul.f32 %v9249_v50, %v9249_v50  ;;  %v4349_v18 = vmul.f32 %v9249_v50, %v9223_v36 }
 0x2f0   : > { %11570 = vst [vmem:[#allocation35_spill] sm:$0xff] %v9251_v37  ;;  %v5824_v10 = vpop.f32.mrb[8].mxu1  ;;  %v6019_v12 = vpop.f32.mrb[10].mxu0  ;;  %v3350_v47 = vmul.f32 %v9251_v37, %v9251_v37  ;;  %v4348_v32 = vmul.f32 %v9251_v37, %v9223_v36 }
 0x2f1   : > { %v9257_v13 = vadd.f32 %v6016_v46, %v5824_v10  ;;  %v3214_v17 = vpop.f32.mrb[11].mxu0  ;;  %4380 = vadd.xlane.f32.xlu1 %v4345_v63  ;;  %4378 = vadd.xlane.f32.xlu0 %v4344_v4  ;;  %v2304_v62 = vpop.f32.mrb[9].mxu1 }
 0x2f2   : > { %v9259_v11 = vadd.f32 %v3202_v21, %v2304_v62 }
 0x2f3   : > { %11571 = vst [vmem:[#allocation36_spill] sm:$0xff] %v9257_v13  ;;  %v3353_v30 = vmul.f32 %v9257_v13, %v9257_v13 }
 0x2f4   : > { %11572 = vst [vmem:[#allocation37_spill] sm:$0xff] %v9259_v11  ;;  %v5827_v51 = vpop.f32.mrb[10].mxu1  ;;  %v6022_v5 = vpop.f32.mrb[12].mxu0  ;;  %v3352_v27 = vmul.f32 %v9259_v11, %v9259_v11 }
 0x2f5   : > { %v9265_v49 = vadd.f32 %v6019_v12, %v5827_v51  ;;  %v3226_v29 = vpop.f32.mrb[13].mxu0  ;;  %3386 = vadd.xlane.f32.xlu1 %v3349_v6  ;;  %3384 = vadd.xlane.f32.xlu0 %v3348_v33  ;;  %v2318_v31 = vpop.f32.mrb[11].mxu1 }
 0x2f6   : > { %v9267_v26 = vadd.f32 %v3214_v17, %v2318_v31 }
 0x2f7   : > { %11573 = vst [vmem:[#allocation8_spill] sm:$0xff] %v9265_v49  ;;  %v3355_v58 = vmul.f32 %v9265_v49, %v9265_v49 }
 0x2f8   : > { %11574 = vst [vmem:[#allocation9_spill] sm:$0xff] %v9267_v26  ;;  %v5830_v42 = vpop.f32.mrb[12].mxu1  ;;  %v6025_v9 = vpop.f32.mrb[14].mxu0  ;;  %v3354_v46 = vmul.f32 %v9267_v26, %v9267_v26 }
 0x2f9   : > { %v9273_v15 = vadd.f32 %v6022_v5, %v5830_v42  ;;  %v3238_v3 = vpop.f32.mrb[15].mxu0  ;;  %4384 = vadd.xlane.f32.xlu1 %v4347_v28  ;;  %4382 = vadd.xlane.f32.xlu0 %v4346_v43  ;;  %v2332_v0 = vpop.f32.mrb[13].mxu1 }
 0x2fa   : > { %v9275_v53 = vadd.f32 %v3226_v29, %v2332_v0 }
 0x2fb   : > { %11575 = vst [vmem:[#allocation10_spill] sm:$0xff] %v9273_v15  ;;  %v3357_v17 = vmul.f32 %v9273_v15, %v9273_v15 }
 0x2fc   : > { %11576 = vst [vmem:[#allocation12_spill] sm:$0xff] %v9275_v53  ;;  %v5833_v39 = vpop.f32.mrb[14].mxu1  ;;  %v6028_v59 = vpop.f32.mrb[16].mxu0  ;;  %v3356_v62 = vmul.f32 %v9275_v53, %v9275_v53 }
 0x2fd   : > { %v9281_v56 = vadd.f32 %v6025_v9, %v5833_v39  ;;  %v3250_v55 = vpop.f32.mrb[17].mxu0  ;;  %3390 = vadd.xlane.f32.xlu1 %v3351_v34  ;;  %3388 = vadd.xlane.f32.xlu0 %v3350_v47  ;;  %v2346_v35 = vpop.f32.mrb[15].mxu1 }
 0x2fe   : > { %v9283_v20 = vadd.f32 %v3238_v3, %v2346_v35 }
 0x2ff   : > { %11577 = vst [vmem:[#allocation14_spill] sm:$0xff] %v9281_v56  ;;  %v3359_v28 = vmul.f32 %v9281_v56, %v9281_v56 }
 0x300   : > { %11578 = vst [vmem:[#allocation11_spill] sm:$0xff] %v9283_v20  ;;  %v5836_v52 = vpop.f32.mrb[16].mxu1  ;;  %v6031_v48 = vpop.f32.mrb[18].mxu0  ;;  %v3358_v43 = vmul.f32 %v9283_v20, %v9283_v20 }
 0x301   : > { %v9289_v41 = vadd.f32 %v6028_v59, %v5836_v52  ;;  %v3262_v25 = vpop.f32.mrb[19].mxu0  ;;  %4388 = vadd.xlane.f32.xlu1 %v4349_v18  ;;  %4386 = vadd.xlane.f32.xlu0 %v4348_v32  ;;  %v2360_v44 = vpop.f32.mrb[17].mxu1 }
 0x302   : > { %v9291_v23 = vadd.f32 %v3250_v55, %v2360_v44 }
 0x303   : > { %11579 = vst [vmem:[#allocation16_spill] sm:$0xff] %v9289_v41  ;;  %v3361_v39 = vmul.f32 %v9289_v41, %v9289_v41 }
 0x304   : > { %11580 = vst [vmem:[#allocation13_spill] sm:$0xff] %v9291_v23  ;;  %v5839_v24 = vpop.f32.mrb[18].mxu1  ;;  %v6034_v1 = vpop.f32.mrb[20].mxu0  ;;  %v3360_v59 = vmul.f32 %v9291_v23, %v9291_v23 }
 0x305   : > { %v9297_v16 = vadd.f32 %v6031_v48, %v5839_v24  ;;  %v3274_v2 = vpop.f32.mrb[21].mxu0  ;;  %3394 = vadd.xlane.f32.xlu1 %v3353_v30  ;;  %3392 = vadd.xlane.f32.xlu0 %v3352_v27  ;;  %v2374_v57 = vpop.f32.mrb[19].mxu1 }
 0x306   : > { %v9299_v54 = vadd.f32 %v3262_v25, %v2374_v57 }
 0x307   : > { %11581 = vst [vmem:[#allocation18_spill] sm:$0xff] %v9297_v16  ;;  %v3363_v25 = vmul.f32 %v9297_v16, %v9297_v16 }
 0x308   : > { %11582 = vst [vmem:[#allocation15_spill] sm:$0xff] %v9299_v54  ;;  %v5842_v21 = vpop.f32.mrb[20].mxu1  ;;  %v6037_v38 = vpop.f32.mrb[22].mxu0  ;;  %v3362_v44 = vmul.f32 %v9299_v54, %v9299_v54 }
 0x309   : > { %v9305_v63 = vadd.f32 %v6034_v1, %v5842_v21  ;;  %v3286_v4 = vpop.f32.mrb[23].mxu0  ;;  %3398 = vadd.xlane.f32.xlu1 %v3355_v58  ;;  %3396 = vadd.xlane.f32.xlu0 %v3354_v46  ;;  %v2388_v10 = vpop.f32.mrb[21].mxu1 }
 0x30a   : > { %v9307_v12 = vadd.f32 %v3274_v2, %v2388_v10 }
 0x30b   : > { %11583 = vst [vmem:[#allocation20_spill] sm:$0xff] %v9305_v63  ;;  %v3365_v58 = vmul.f32 %v9305_v63, %v9305_v63 }
 0x30c   : > { %11584 = vst [vmem:[#allocation17_spill] sm:$0xff] %v9307_v12  ;;  %v5845_v6 = vpop.f32.mrb[22].mxu1  ;;  %v6040_v33 = vpop.f32.mrb[24].mxu0  ;;  %v3364_v46 = vmul.f32 %v9307_v12, %v9307_v12 }
 0x30d   : > { %v9313_v51 = vadd.f32 %v6037_v38, %v5845_v6  ;;  %v3298_v5 = vpop.f32.mrb[25].mxu0  ;;  %3402 = vadd.xlane.f32.xlu1 %v3357_v17  ;;  %3400 = vadd.xlane.f32.xlu0 %v3356_v62  ;;  %v2402_v29 = vpop.f32.mrb[23].mxu1 }
 0x30e   : > { %v9315_v31 = vadd.f32 %v3286_v4, %v2402_v29 }
 0x30f   : > { %11585 = vst [vmem:[#allocation22_spill] sm:$0xff] %v9313_v51  ;;  %v3367_v17 = vmul.f32 %v9313_v51, %v9313_v51 }
 0x310   : > { %11586 = vst [vmem:[#allocation19_spill] sm:$0xff] %v9315_v31  ;;  %v5848_v42 = vpop.f32.mrb[24].mxu1  ;;  %v6043_v9 = vpop.f32.mrb[26].mxu0  ;;  %v3366_v62 = vmul.f32 %v9315_v31, %v9315_v31 }
 0x311   : > { %v9321_v3 = vadd.f32 %v6040_v33, %v5848_v42  ;;  %v3310_v0 = vpop.f32.mrb[27].mxu0  ;;  %3406 = vadd.xlane.f32.xlu1 %v3359_v28  ;;  %3404 = vadd.xlane.f32.xlu0 %v3358_v43  ;;  %v2416_v34 = vpop.f32.mrb[25].mxu1 }
 0x312   : > { %v9323_v47 = vadd.f32 %v3298_v5, %v2416_v34  ;;  %v4350_v34 = vmul.f32 %v9259_v11, %v9223_v36 }
 0x313   : > { %11587 = vst [vmem:[#allocation23_spill] sm:$0xff] %v9321_v3  ;;  %v3369_v6 = vmul.f32 %v9321_v3, %v9321_v3 }
 0x314   : > { %11588 = vst [vmem:[#allocation21_spill] sm:$0xff] %v9323_v47  ;;  %v5851_v55 = vpop.f32.mrb[26].mxu1  ;;  %v6046_v35 = vpop.f32.mrb[28].mxu0  ;;  %v3368_v33 = vmul.f32 %v9323_v47, %v9323_v47 }
 0x315   : > { %v9329_v18 = vadd.f32 %v6043_v9, %v5851_v55  ;;  %v3322_v32 = vpop.f32.mrb[29].mxu0  ;;  %3410 = vadd.xlane.f32.xlu1 %v3361_v39  ;;  %3408 = vadd.xlane.f32.xlu0 %v3360_v59  ;;  %v2430_v52 = vpop.f32.mrb[27].mxu1  ;;  %v4353_v39 = vmul.f32 %v9265_v49, %v9223_v36  ;;  %v4352_v59 = vmul.f32 %v9267_v26, %v9223_v36 }
 0x316   : > { %v9331_v48 = vadd.f32 %v3310_v0, %v2430_v52  ;;  %v4351_v0 = vmul.f32 %v9257_v13, %v9223_v36  ;;  %v4355_v55 = vmul.f32 %v9273_v15, %v9223_v36  ;;  %v4356_v52 = vmul.f32 %v9283_v20, %v9223_v36 }
 0x317   : > { %11589 = vst [vmem:[#allocation25_spill] sm:$0xff] %v9329_v18  ;;  %v3371_v5 = vmul.f32 %v9329_v18, %v9329_v18 }
 0x318   : > { %11590 = vst [vmem:[#allocation24_spill] sm:$0xff] %v9331_v48  ;;  %v5854_v30 = vpop.f32.mrb[28].mxu1  ;;  %v6049_v27 = vpop.f32.mrb[30].mxu0  ;;  %v3370_v29 = vmul.f32 %v9331_v48, %v9331_v48 }
 0x319   : > { %v9337_v24 = vadd.f32 %v6046_v35, %v5854_v30  ;;  %v3334_v1 = vpop.f32.mrb[31].mxu0  ;;  %3414 = vadd.xlane.f32.xlu1 %v3363_v25  ;;  %3412 = vadd.xlane.f32.xlu0 %v3362_v44  ;;  %v2444_v2 = vpop.f32.mrb[29].mxu1  ;;  %v4354_v35 = vmul.f32 %v9275_v53, %v9223_v36  ;;  %v4359_v25 = vmul.f32 %v9289_v41, %v9223_v36 }
 0x31a   : > { %v9339_v57 = vadd.f32 %v3322_v32, %v2444_v2  ;;  %v4357_v32 = vmul.f32 %v9281_v56, %v9223_v36  ;;  %v4358_v44 = vmul.f32 %v9291_v23, %v9223_v36  ;;  %v4361_v30 = vmul.f32 %v9297_v16, %v9223_v36 }
 0x31b   : > { %11591 = vst [vmem:[#allocation28_spill] sm:$0xff] %v9337_v24  ;;  %v3373_v28 = vmul.f32 %v9337_v24, %v9337_v24  ;;  %v4362_v2 = vmul.f32 %v9307_v12, %v9223_v36 }
 0x31c   : > { %11592 = vst [vmem:[#allocation26_spill] sm:$0xff] %v9339_v57  ;;  %v5857_v21 = vpop.f32.mrb[30].mxu1  ;;  %v3372_v43 = vmul.f32 %v9339_v57, %v9339_v57 }
 0x31d   : > { %v9345_v38 = vadd.f32 %v6049_v27, %v5857_v21  ;;  %3418 = vadd.xlane.f32.xlu1 %v3365_v58  ;;  %3416 = vadd.xlane.f32.xlu0 %v3364_v46  ;;  %v2458_v4 = vpop.f32.mrb[31].mxu1  ;;  %v4360_v27 = vmul.f32 %v9299_v54, %v9223_v36  ;;  %v4365_v58 = vmul.f32 %v9313_v51, %v9223_v36 }
 0x31e   : > { %v9347_v10 = vadd.f32 %v3334_v1, %v2458_v4  ;;  %v4363_v1 = vmul.f32 %v9305_v63, %v9223_v36  ;;  %v4364_v46 = vmul.f32 %v9315_v31, %v9223_v36  ;;  %v4367_v21 = vmul.f32 %v9321_v3, %v9223_v36 }
 0x31f   : > { %11593 = vst [vmem:[#allocation30_spill] sm:$0xff] %v9345_v38  ;;  %v3375_v42 = vmul.f32 %v9345_v38, %v9345_v38  ;;  %v4366_v4 = vmul.f32 %v9323_v47, %v9223_v36  ;;  %v9535_v63 = vstv %s4898_s27 }
 0x320   : > { %11594 = vst [vmem:[#allocation27_spill] sm:$0xff] %v9347_v10  ;;  %v3374_v9 = vmul.f32 %v9347_v10, %v9347_v10 }
 0x321   : > { %3422 = vadd.xlane.f32.xlu1 %v3367_v17  ;;  %3420 = vadd.xlane.f32.xlu0 %v3366_v62  ;;  %v4369_v17 = vmul.f32 %v9329_v18, %v9223_v36  ;;  %v4368_v62 = vmul.f32 %v9331_v48, %v9223_v36 }
 0x325   : > { %3426 = vadd.xlane.f32.xlu1 %v3369_v6  ;;  %3424 = vadd.xlane.f32.xlu0 %v3368_v33  ;;  %v4371_v6 = vmul.f32 %v9337_v24, %v9223_v36  ;;  %v4370_v33 = vmul.f32 %v9339_v57, %v9223_v36 }
 0x329   : > { %3430 = vadd.xlane.f32.xlu1 %v3371_v5  ;;  %3428 = vadd.xlane.f32.xlu0 %v3370_v29  ;;  %v4373_v5 = vmul.f32 %v9345_v38, %v9223_v36  ;;  %v4372_v29 = vmul.f32 %v9347_v10, %v9223_v36 }
 0x32d   : > { %3434 = vadd.xlane.f32.xlu1 %v3373_v28  ;;  %3432 = vadd.xlane.f32.xlu0 %v3372_v43 }
 0x331   : > { %3438 = vadd.xlane.f32.xlu1 %v3375_v42  ;;  %3436 = vadd.xlane.f32.xlu0 %v3374_v9 }
 0x335   : > { %4392 = vadd.xlane.f32.xlu1 %v4351_v0  ;;  %4390 = vadd.xlane.f32.xlu0 %v4350_v34 }
 0x339   : > { %4396 = vadd.xlane.f32.xlu1 %v4353_v39  ;;  %4394 = vadd.xlane.f32.xlu0 %v4352_v59 }
 0x33d   : > { %4400 = vadd.xlane.f32.xlu1 %v4355_v55  ;;  %4398 = vadd.xlane.f32.xlu0 %v4354_v35 }
 0x341   : > { %4404 = vadd.xlane.f32.xlu1 %v4357_v32  ;;  %4402 = vadd.xlane.f32.xlu0 %v4356_v52 }
 0x345   : > { %4408 = vadd.xlane.f32.xlu1 %v4359_v25  ;;  %4406 = vadd.xlane.f32.xlu0 %v4358_v44 }
 0x349   : > { %4412 = vadd.xlane.f32.xlu1 %v4361_v30  ;;  %4410 = vadd.xlane.f32.xlu0 %v4360_v27 }
 0x34d   : > { %4416 = vadd.xlane.f32.xlu1 %v4363_v1  ;;  %4414 = vadd.xlane.f32.xlu0 %v4362_v2 }
 0x351   : > { %4420 = vadd.xlane.f32.xlu1 %v4365_v58  ;;  %4418 = vadd.xlane.f32.xlu0 %v4364_v46 }
 0x355   : > { %4424 = vadd.xlane.f32.xlu1 %v4367_v21  ;;  %4422 = vadd.xlane.f32.xlu0 %v4366_v4 }
 0x359   : > { %4428 = vadd.xlane.f32.xlu1 %v4369_v17  ;;  %4426 = vadd.xlane.f32.xlu0 %v4368_v62 }
 0x35d   : > { %4432 = vadd.xlane.f32.xlu1 %v4371_v6  ;;  %4430 = vadd.xlane.f32.xlu0 %v4370_v33 }
 0x361   : > { %4436 = vadd.xlane.f32.xlu1 %v4373_v5  ;;  %4434 = vadd.xlane.f32.xlu0 %v4372_v29 }
 0x372   : > { %v9417_v28 = vpop.xlane.xlu1 %4376  ;;  %v9419_v43 = vpop.xlane.xlu0 %3378 }
 0x373   : > { %6617 = vrsqrt.f32 %v9419_v43  ;;  %vm3449_vm0 = vcmp.eq.f32.partialorder %v9419_v43, inf  ;;  %v3452_v35 = vand.u32 2147483648, %v9419_v43  ;;  %vm3451_vm9 = vcmp.eq.f32.partialorder %v9419_v43, 0.0 }
 0x376   : > { %v9422_v42 = vpop.xlane.xlu0 %4374  ;;  %v9424_v9 = vpop.xlane.xlu1 %3376 }
 0x377   : > { %6619 = vrsqrt.f32 %v9424_v9  ;;  %vm3442_vm10 = vcmp.eq.f32.partialorder %v9424_v9, inf  ;;  %v3445_v58 = vand.u32 2147483648, %v9424_v9  ;;  %vm3444_vm11 = vcmp.eq.f32.partialorder %v9424_v9, 0.0 }
 0x37a   : > { %v9427_v0 = vpop.xlane.xlu1 %3382  ;;  %v9429_v34 = vpop.xlane.xlu0 %3380 }
 0x37b   : > { %6621 = vrsqrt.f32 %v9427_v0  ;;  %vm3463_vm12 = vcmp.eq.f32.partialorder %v9427_v0, inf  ;;  %vm3456_vm13 = vcmp.eq.f32.partialorder %v9429_v34, inf  ;;  %vm3465_vm14 = vcmp.eq.f32.partialorder %v9427_v0, 0.0 }
 0x37c   : > { %6623 = vrsqrt.f32 %v9429_v34  ;;  %vm3458_vm15 = vcmp.eq.f32.partialorder %v9429_v34, 0.0 }
 0x37d   : > { %v6618_v36 = vpop.eup %6617 }
 0x37e   : > { %v3448_v39 = vmul.f32 %v6618_v36, %v9419_v43  ;;  %v9434_v59 = vpop.xlane.xlu1 %4380  ;;  %v9436_v55 = vpop.xlane.xlu0 %4378  ;;  %v3466_v36 = vand.u32 2147483648, %v9427_v0 }
 0x380   : > { %v3450_v32 = vsel %vm3449_vm0, %v9419_v43, %v3448_v39 }
 0x381   : > { %v6620_v52 = vpop.eup %6619  ;;  %v3453_v25 = vsel %vm3451_vm9, %v3452_v35, %v3450_v32  ;;  %v3459_v32 = vand.u32 2147483648, %v9429_v34 }
 0x382   : > { %v9442_v44 = vmax.f32 %v3453_v25, 1e-15  ;;  %v3441_v30 = vmul.f32 %v6620_v52, %v9424_v9  ;;  %v9445_v27 = vpop.xlane.xlu1 %3386  ;;  %v9447_v1 = vpop.xlane.xlu0 %3384 }
 0x383   : > { %11595 = vst [vmem:[#allocation29_spill] sm:$0xff] %v9445_v27  ;;  %11596 = vst [vmem:[#allocation38_spill] sm:$0xff] %v9447_v1  ;;  %6625 = vrsqrt.f32 %v9445_v27  ;;  %vm3477_vm1 = vcmp.eq.f32.partialorder %v9445_v27, inf  ;;  %vm3479_vm2 = vcmp.eq.f32.partialorder %v9445_v27, 0.0  ;;  %vm3470_vm3 = vcmp.eq.f32.partialorder %v9447_v1, inf }
 0x384   : > { %v3762_v2 = vmul.f32 1.442695, %v9442_v44  ;;  %v3443_v21 = vsel %vm3442_vm10, %v9424_v9, %v3441_v30  ;;  %6627 = vrsqrt.f32 %v9447_v1  ;;  %v3889_v25 = vmul.f32 %v9442_v44, %v9442_v44 }
 0x385   : > { %v6622_v46 = vpop.eup %6621  ;;  %v3446_v17 = vsel %vm3444_vm11, %v3445_v58, %v3443_v21  ;;  %v9483_v21 = vstv %s4799_s20  ;;  %vm3472_vm4 = vcmp.eq.f32.partialorder %v9447_v1, 0.0  ;;  %v3473_v47 = vand.u32 2147483648, %v9447_v1 }
 0x386   : > { %v6624_v4 = vpop.eup %6623  ;;  %6629 = vpow2.f32 %v3762_v2  ;;  %v9456_v62 = vpop.xlane.xlu1 %4384  ;;  %v9458_v6 = vmax.f32 %v3446_v17, 1e-15  ;;  %v3462_v33 = vmul.f32 %v6622_v46, %v9427_v0  ;;  %v9481_v46 = vand.u32 127, %v4337_v60 }
 0x387   : > { %v3455_v5 = vmul.f32 %v6624_v4, %v9429_v34  ;;  %v4145_v57 = vmul.f32 0.5, %v3889_v25  ;;  %vm3921_vm5 = vcmp.lt.f32.partialorder %v9442_v44, 0.1 }
 0x388   : > { %v3760_v29 = vmul.f32 1.442695, %v9458_v6  ;;  %v3464_v39 = vsel %vm3463_vm12, %v9427_v0, %v3462_v33  ;;  %v9488_v33 = vstv %s254_s14  ;;  %vm3920_vm7 = vcmp.lt.f32.partialorder %v9458_v6, 0.1 }
 0x389   : > { %v3457_v35 = vsel %vm3456_vm13, %v9429_v34, %v3455_v5  ;;  %v3467_v52 = vsel %vm3465_vm14, %v3466_v36, %v3464_v39  ;;  %v3888_v5 = vmul.f32 %v9458_v6, %v9458_v6  ;;  %v9499_v39 = vpop.xlane.xlu0 %4382  ;;  %vm5222_vm14 = vcmp.eq.s32.totalorder %v9481_v46, 0 }
 0x38a   : > { %6631 = vpow2.f32 %v3760_v29  ;;  %v9476_v30 = vmax.f32 %v3467_v52, 1e-15  ;;  %v3460_v2 = vsel %vm3458_vm15, %v3459_v32, %v3457_v35  ;;  %v9478_v58 = vpop.xlane.xlu1 %3390  ;;  %v3953_v32 = vmul.f32 0.16666667, %v3889_v25 }
 0x38b   : > { %6633 = vrcp.f32 %v9442_v44  ;;  %v9486_v4 = vmax.f32 %v3460_v2, 1e-15  ;;  %v3480_v52 = vand.u32 2147483648, %v9445_v27  ;;  %v3952_v24 = vmul.f32 0.16666667, %v3888_v5 }
 0x38c   : > { %6635 = vrcp.f32 %v9458_v6  ;;  %v3766_v29 = vmul.f32 1.442695, %v9476_v30  ;;  %v3891_v2 = vmul.f32 %v9476_v30, %v9476_v30  ;;  %v4144_v3 = vmul.f32 0.5, %v3888_v5 }
 0x38d   : > { %v6626_v17 = vpop.eup %6625  ;;  %v3764_v60 = vmul.f32 1.442695, %v9486_v4  ;;  %6637 = vrsqrt.f32 %v9478_v58  ;;  %vm3491_vm6 = vcmp.eq.f32.partialorder %v9478_v58, inf  ;;  %vm3493_vm8 = vcmp.eq.f32.partialorder %v9478_v58, 0.0 }
 0x38e   : > { %v6628_v36 = vpop.eup %6627  ;;  %6639 = vpow2.f32 %v3766_v29  ;;  %v3476_v10 = vmul.f32 %v6626_v17, %v9445_v27  ;;  %v3890_v29 = vmul.f32 %v9486_v4, %v9486_v4  ;;  %v3985_v17 = vadd.f32 1.0, %v3953_v32 }
 0x38f   : > { %v3469_v38 = vmul.f32 %v6628_v36, %v9447_v1  ;;  %v4147_v32 = vmul.f32 0.5, %v3891_v2  ;;  %v4176_v41 = vadd.f32 1.0, %v4144_v3  ;;  %vm3923_vm0 = vcmp.lt.f32.partialorder %v9476_v30, 0.1 }
 0x390   : > { %v9502_v35 = vpop.eup %6629  ;;  %v3478_v48 = vsel %vm3477_vm1, %v9445_v27, %v3476_v10  ;;  %v9528_v10 = vpop.xlane.xlu0 %3388  ;;  %v4146_v15 = vmul.f32 0.5, %v3890_v29  ;;  %vm3922_vm10 = vcmp.lt.f32.partialorder %v9486_v4, 0.1 }
 0x391   : > { %6641 = vrcp.f32 %v9502_v35  ;;  %v3471_v18 = vsel %vm3470_vm3, %v9447_v1, %v3469_v38  ;;  %v3481_v25 = vsel %vm3479_vm2, %v3480_v52, %v3478_v48  ;;  %v3984_v38 = vadd.f32 1.0, %v3952_v24 }
 0x392   : > { %6643 = vpow2.f32 %v3764_v60  ;;  %v3955_v60 = vmul.f32 0.16666667, %v3891_v2  ;;  %v9526_v31 = vmax.f32 %v3481_v25, 1e-15  ;;  %v3474_v51 = vsel %vm3472_vm4, %v3473_v47, %v3471_v18 }
 0x393   : > { %6645 = vrcp.f32 %v9476_v30  ;;  %v9531_v5 = vmax.f32 %v3474_v51, 1e-15  ;;  %v3954_v48 = vmul.f32 0.16666667, %v3890_v29  ;;  %v4177_v47 = vadd.f32 1.0, %v4145_v57 }
 0x394   : > { %v9523_v36 = vpop.eup %6631  ;;  %6647 = vrcp.f32 %v9486_v4  ;;  %v3770_v52 = vmul.f32 1.442695, %v9526_v31  ;;  %v3893_v24 = vmul.f32 %v9526_v31, %v9526_v31  ;;  %v4017_v2 = vmul.f32 %v3985_v17, %v9442_v44 }
 0x395   : > { %6649 = vrcp.f32 %v9523_v36  ;;  %v9533_v12 = vpop.eup %6633  ;;  %v3768_v18 = vmul.f32 1.442695, %v9531_v5  ;;  %v3987_v54 = vadd.f32 1.0, %v3955_v60  ;;  %v4016_v57 = vmul.f32 %v3984_v38, %v9458_v6 }
 0x396   : > { %v9539_v25 = vpop.eup %6635  ;;  %6651 = vrsqrt.f32 %v9528_v10  ;;  %v4439_v23 = vmul.f32 %v9533_v12, %v9417_v28  ;;  %v9552_v20 = vadd.f32 1.0, %v4147_v32  ;;  %v3986_v53 = vadd.f32 1.0, %v3954_v48 }
 0x397   : > { %v6638_v51 = vpop.eup %6637  ;;  %6653 = vpow2.f32 %v3770_v52  ;;  %v3892_v17 = vmul.f32 %v9531_v5, %v9531_v5  ;;  %v3957_v3 = vmul.f32 0.16666667, %v3893_v24  ;;  %v4438_v38 = vmul.f32 %v9539_v25, %v9422_v42 }
 0x398   : > { %v9547_v16 = vpop.eup %6639  ;;  %v9566_v29 = vmul.f32 %v3987_v54, %v9476_v30  ;;  %v3494_v32 = vand.u32 2147483648, %v9478_v58  ;;  %v9576_v13 = vmul.f32 %v3986_v53, %v9486_v4  ;;  %v9578_v37 = vadd.f32 1.0, %v4146_v15 }
 0x399   : > { %6655 = vrcp.f32 %v9547_v16  ;;  %v3956_v54 = vmul.f32 0.16666667, %v3892_v17  ;;  %vm3484_vm9 = vcmp.eq.f32.partialorder %v9528_v10, inf  ;;  %vm3486_vm11 = vcmp.eq.f32.partialorder %v9528_v10, 0.0 }
 0x39a   : > { %6657 = vpow2.f32 %v3768_v18  ;;  %v3490_v18 = vmul.f32 %v6638_v51, %v9478_v58  ;;  %vm3925_vm12 = vcmp.lt.f32.partialorder %v9526_v31, 0.1  ;;  %vm3924_vm13 = vcmp.lt.f32.partialorder %v9531_v5, 0.1 }
 0x39b   : > { %v6642_v56 = vpop.eup %6641  ;;  %v3988_v1 = vadd.f32 1.0, %v3956_v54 }
 0x39c   : > { %v9557_v60 = vpop.eup %6643  ;;  %v4049_v52 = vsub.f32 %v9502_v35, %v6642_v56  ;;  %v4209_v26 = vadd.f32 %v6642_v56, %v9502_v35  ;;  %v4149_v35 = vmul.f32 0.5, %v3893_v24  ;;  %v3989_v24 = vadd.f32 1.0, %v3957_v3 }
 0x39d   : > { %6659 = vrcp.f32 %v9557_v60  ;;  %v9570_v48 = vpop.eup %6645 }
 0x39e   : > { %v4081_v49 = vmul.f32 0.5, %v4049_v52  ;;  %v4241_v56 = vmul.f32 0.5, %v4209_v26  ;;  %v9573_v11 = vpop.eup %6647  ;;  %6661 = vrcp.f32 %v9526_v31  ;;  %v4148_v52 = vmul.f32 0.5, %v3892_v17 }
 0x39f   : > { %v6650_v50 = vpop.eup %6649  ;;  %6663 = vrcp.f32 %v9531_v5  ;;  %v9594_v44 = vmul.f32 %v9573_v11, %v9436_v55 }
 0x3a0   : > { %v4113_v19 = vsel %vm3921_vm5, %v4017_v2, %v4081_v49  ;;  %v4273_v26 = vsel %vm3921_vm5, %v4177_v47, %v4241_v56  ;;  %v4048_v8 = vsub.f32 %v9523_v36, %v6650_v50  ;;  %v4208_v53 = vadd.f32 %v6650_v50, %v9523_v36  ;;  %v6652_v15 = vpop.eup %6651 }
 0x3a1   : > { %v4471_v51 = vsub.f32 1.0, %v4273_v26  ;;  %v4441_v49 = vmul.f32 %v9570_v48, %v9434_v59  ;;  %v9596_v47 = vadd.f32 1.0, %v4149_v35  ;;  %v3492_v50 = vsel %vm3491_vm6, %v9478_v58, %v3490_v18  ;;  %v9601_v36 = vpop.eup %6653 }
 0x3a2   : > { %v4305_v2 = vmul.f32 %v9533_v12, %v4113_v19  ;;  %v4080_v3 = vmul.f32 0.5, %v4048_v8  ;;  %v4240_v56 = vmul.f32 0.5, %v4208_v53  ;;  %6665 = vrcp.f32 %v9601_v36 }
 0x3a3   : > { %v4503_v17 = vmul.f32 %v4471_v51, %v4439_v23  ;;  %v9606_v26 = vmul.f32 %v3989_v24, %v9526_v31  ;;  %v9608_v27 = vadd.f32 1.0, %v4148_v52  ;;  %v6656_v35 = vpop.eup %6655  ;;  %v3495_v8 = vsel %vm3493_vm8, %v3494_v32, %v3492_v50  ;;  %v9623_v51 = vpop.xlane.xlu1 %4388 }
 0x3a4   : > { %v4112_v18 = vsel %vm3920_vm7, %v4016_v57, %v4080_v3  ;;  %v4272_v19 = vsel %vm3920_vm7, %v4176_v41, %v4240_v56  ;;  %v9618_v23 = vpop.eup %6657  ;;  %v4051_v54 = vsub.f32 %v9547_v16, %v6656_v35  ;;  %v4211_v52 = vadd.f32 %v6656_v35, %v9547_v16 }
 0x3a5   : > { %v4535_v7 = vmul.f32 %v9533_v12, %v4503_v17  ;;  %v4470_v24 = vsub.f32 1.0, %v4272_v19  ;;  %v3483_v12 = vmul.f32 %v6652_v15, %v9528_v10  ;;  %v4568_v6 = vmul.f32 %v9488_v33, %v4305_v2 }
 0x3a6   : > { %v4304_v53 = vmul.f32 %v9539_v25, %v4112_v18  ;;  %v4083_v50 = vmul.f32 0.5, %v4051_v54  ;;  %v4243_v17 = vmul.f32 0.5, %v4211_v52  ;;  %v9629_v3 = vmax.f32 %v3495_v8, 1e-15 }
 0x3a7   : > { %v6660_v57 = vpop.eup %6659  ;;  %v4601_v41 = vmul.f32 %v9218_v40, %v4535_v7  ;;  %v4502_v32 = vmul.f32 %v4470_v24, %v4438_v38  ;;  %6667 = vrcp.f32 %v9618_v23  ;;  %v9643_v2 = vmul.f32 %v3988_v1, %v9531_v5 }
 0x3a8   : > { %v9631_v56 = vpop.eup %6661  ;;  %v4050_v15 = vsub.f32 %v9557_v60, %v6660_v57  ;;  %v4210_v35 = vadd.f32 %v6660_v57, %v9557_v60  ;;  %v4275_v38 = vsel %vm3923_vm0, %v9552_v20, %v4243_v17  ;;  %v3485_v18 = vsel %vm3484_vm9, %v9528_v10, %v3483_v12  ;;  %v9659_v12 = vpop.xlane.xlu1 %3394 }
 0x3a9   : > { %v9633_v16 = vsub.f32 %v4568_v6, %v4601_v41  ;;  %v4534_v7 = vmul.f32 %v9539_v25, %v4502_v32  ;;  %v9648_v19 = vpop.eup %6663  ;;  %v4567_v25 = vmul.f32 %v9488_v33, %v4304_v53  ;;  %v4115_v20 = vsel %vm3923_vm0, %v9566_v29, %v4083_v50 }
 0x3aa   : > { %v4473_v24 = vsub.f32 1.0, %v4275_v38  ;;  %v4082_v54 = vmul.f32 0.5, %v4050_v15  ;;  %v4242_v52 = vmul.f32 0.5, %v4210_v35  ;;  %v3774_v41 = vmul.f32 1.442695, %v9629_v3 }
 0x3ab   : > { %v4736_v60 = vmul.f32 %v9633_v16, %v9633_v16  ;;  %v4802_v8 = vmul.f32 %v9483_v21, %v9633_v16  ;;  %v4600_v1 = vmul.f32 %v9218_v40, %v4534_v7  ;;  %v3487_v32 = vand.u32 2147483648, %v9528_v10 }
 0x3ac   : > { %v6666_v53 = vpop.eup %6665  ;;  %v4307_v30 = vmul.f32 %v9570_v48, %v4115_v20  ;;  %v4505_v29 = vmul.f32 %v4473_v24, %v4441_v49  ;;  %v4274_v50 = vsel %vm3922_vm10, %v9578_v37, %v4242_v52  ;;  %6669 = vrsqrt.f32 %v9659_v12 }
 0x3ad   : > { %v4768_v57 = vmul.f32 %v4736_v60, %v9419_v43  ;;  %v4834_v6 = vmul.f32 %v4802_v8, %v9417_v28  ;;  %v9665_v17 = vsub.f32 %v4567_v25, %v4600_v1  ;;  %v4472_v35 = vsub.f32 1.0, %v4274_v50 }
 0x3ae   : > { %v3488_v43 = vsel %vm3486_vm11, %v3487_v32, %v3485_v18  ;;  %v4537_v38 = vmul.f32 %v9570_v48, %v4505_v29  ;;  %v4114_v49 = vsel %vm3922_vm10, %v9576_v13, %v4082_v54  ;;  %v4053_v60 = vsub.f32 %v9601_v36, %v6666_v53 }
 0x3af   : > { %v4866_v15 = vadd.f32 %v4834_v6, %v4768_v57  ;;  %v4735_v28 = vmul.f32 %v9665_v17, %v9665_v17  ;;  %v4801_v7 = vmul.f32 %v9483_v21, %v9665_v17  ;;  %v4504_v18 = vmul.f32 %v4472_v35, %v9594_v44 }
 0x3b0   : > { %6671 = vpow2.f32 %v3774_v41  ;;  %v4570_v20 = vmul.f32 %v9488_v33, %v4307_v30  ;;  %v4603_v48 = vmul.f32 %v9218_v40, %v4537_v38  ;;  %v4306_v13 = vmul.f32 %v9573_v11, %v4114_v49 }
 0x3b1   : > { %v4901_v37 = vadd.f32 %v9535_v63, %v4866_v15  ;;  %v4767_v8 = vmul.f32 %v4735_v28, %v9424_v9  ;;  %v4833_v25 = vmul.f32 %v4801_v7, %v9422_v42  ;;  %v6668_v1 = vpop.eup %6667  ;;  %v4536_v24 = vmul.f32 %v9573_v11, %v4504_v18 }
 0x3b2   : > { %v4213_v54 = vadd.f32 %v6666_v53, %v9601_v36  ;;  %v4635_v52 = vsub.f32 %v4570_v20, %v4603_v48  ;;  %v9693_v57 = vmax.f32 %v3488_v43, 1e-15  ;;  %6673 = vrcp.f32 %v9629_v3 }
 0x3b3   : > { %v4933_v4 = vadd.f32 1.0, %v4901_v37  ;;  %v4865_v44 = vadd.f32 %v4833_v25, %v4767_v8  ;;  %v4602_v42 = vmul.f32 %v9218_v40, %v4536_v24  ;;  %v4085_v6 = vmul.f32 0.5, %v4053_v60 }
 0x3b4   : > { %v4245_v41 = vmul.f32 0.5, %v4213_v54  ;;  %v4738_v30 = vmul.f32 %v4635_v52, %v4635_v52  ;;  %v4804_v11 = vmul.f32 %v9483_v21, %v4635_v52  ;;  %v4212_v36 = vadd.f32 %v6668_v1, %v9618_v23 }
 0x3b5   : > { %v9696_v9 = vmax.f32 %v4933_v4, 1e-07  ;;  %v4900_v32 = vadd.f32 %v9535_v63, %v4865_v44  ;;  %v4569_v53 = vmul.f32 %v9488_v33, %v4306_v13  ;;  %v4443_v29 = vmul.f32 %v9631_v56, %v9456_v62 }
 0x3b6   : > { %v9709_v50 = vmul.f32 %v9629_v3, %v9629_v3  ;;  %v4770_v35 = vmul.f32 %v4738_v30, %v9427_v0  ;;  %v4836_v43 = vmul.f32 %v4804_v11, %v9434_v59  ;;  %v4052_v28 = vsub.f32 %v9618_v23, %v6668_v1  ;;  %v9714_v7 = vpop.eup %6669 }
 0x3b7   : > { %6675 = vrsqrt.f32 %v9696_v9  ;;  %v4932_v15 = vadd.f32 1.0, %v4900_v32  ;;  %v4634_v38 = vsub.f32 %v4569_v53, %v4602_v42  ;;  %v4117_v49 = vsel %vm3925_vm12, %v9606_v26, %v4085_v6 }
 0x3b8   : > { %v4277_v37 = vsel %vm3925_vm12, %v9596_v47, %v4245_v41  ;;  %v3772_v18 = vmul.f32 1.442695, %v9693_v57  ;;  %v4868_v0 = vadd.f32 %v4836_v43, %v4770_v35  ;;  %v4244_v59 = vmul.f32 0.5, %v4212_v36 }
 0x3b9   : > { %v9723_v60 = vmax.f32 %v4932_v15, 1e-07  ;;  %v4475_v8 = vsub.f32 1.0, %v4277_v37  ;;  %v4737_v25 = vmul.f32 %v4634_v38, %v4634_v38  ;;  %v4803_v20 = vmul.f32 %v9483_v21, %v4634_v38 }
 0x3ba   : > { %v9725_v23 = vpop.eup %6671  ;;  %v4442_v26 = vmul.f32 %v9648_v19, %v9499_v39  ;;  %v3959_v31 = vmul.f32 0.16666667, %v9709_v50  ;;  %v4665_v47 = vmul.f32 %v9225_v14, %v9633_v16  ;;  %v4664_v48 = vmul.f32 %v9227_v45, %v9665_v17 }
 0x3bb   : > { %6677 = vrsqrt.f32 %v9723_v60  ;;  %v4084_v1 = vmul.f32 0.5, %v4052_v28  ;;  %v4903_v4 = vadd.f32 %v9535_v63, %v4868_v0  ;;  %v4769_v13 = vmul.f32 %v4737_v25, %v9429_v34 }
 0x3bc   : > { %v4835_v24 = vmul.f32 %v4803_v20, %v9436_v55  ;;  %v4309_v54 = vmul.f32 %v9631_v56, %v4117_v49  ;;  %v9741_v44 = vpop.eup %6673  ;;  %v4667_v14 = vmul.f32 %v9233_v61, %v4635_v52  ;;  %v4507_v16 = vmul.f32 %v4475_v8, %v4443_v29  ;;  %v11597_v49 = vld [vmem:[#allocation31_spill] sm:$0xff] }
 0x3bd   : > { %v4276_v45 = vsel %vm3924_vm13, %v9608_v27, %v4244_v59  ;;  %6679 = vpow2.f32 %v3772_v18  ;;  %v4935_v17 = vadd.f32 1.0, %v4903_v4  ;;  %v4704_v34 = vadd.f32 %v9221_v22, %v4665_v47 }
 0x3be   : > { %v4867_v42 = vadd.f32 %v4835_v24, %v4769_v13  ;;  %v4474_v6 = vsub.f32 1.0, %v4276_v45  ;;  %6681 = vrcp.f32 %v9725_v23  ;;  %v4703_v55 = vadd.f32 %v9221_v22, %v4664_v48  ;;  %v11598_v13 = vld [vmem:[#allocation29_spill] sm:$0xff] }
 0x3bf   : > { %v4539_v41 = vmul.f32 %v9631_v56, %v4507_v16  ;;  %v4116_v61 = vsel %vm3924_vm13, %v9643_v2, %v4084_v1  ;;  %vm5005_vm15 = vcmp.eq.f32.partialorder %v9696_v9, inf  ;;  %v9758_v27 = vmax.f32 %v4935_v17, 1e-07 }
 0x3c0   : > { %v4902_v32 = vadd.f32 %v9535_v63, %v4867_v42  ;;  %v4506_v30 = vmul.f32 %v4474_v6, %v4442_v26  ;;  %vm5007_vm1 = vcmp.eq.f32.partialorder %v9696_v9, 0.0  ;;  %v4572_v56 = vmul.f32 %v9488_v33, %v4309_v54 }
 0x3c1   : > { %v6676_v52 = vpop.eup %6675  ;;  %v4605_v36 = vmul.f32 %v9218_v40, %v4539_v41  ;;  %v5008_v5 = vand.u32 2147483648, %v9696_v9  ;;  %v9767_v2 = vadd.f32 %v9221_v22, %v4667_v14  ;;  %6683 = vrsqrt.f32 %v9758_v27 }
 0x3c2   : > { %v5004_v11 = vmul.f32 %v6676_v52, %v9696_v9  ;;  %v4308_v53 = vmul.f32 %v9648_v19, %v4116_v61  ;;  %v4934_v15 = vadd.f32 1.0, %v4902_v32  ;;  %v4538_v43 = vmul.f32 %v9648_v19, %v4506_v30 }
 0x3c3   : > { %v9772_v35 = vsub.f32 %v4572_v56, %v4605_v36  ;;  %vm4998_vm2 = vcmp.eq.f32.partialorder %v9723_v60, inf  ;;  %v4666_v37 = vmul.f32 %v11597_v49, %v4634_v38  ;;  %v3991_v18 = vadd.f32 1.0, %v3959_v31  ;;  %v11599_v56 = vld [vmem:[#allocation38_spill] sm:$0xff] }
 0x3c4   : > { %v5006_v29 = vsel %vm5005_vm15, %v9696_v9, %v5004_v11  ;;  %vm5000_vm3 = vcmp.eq.f32.partialorder %v9723_v60, 0.0  ;;  %v9780_v59 = vmax.f32 %v4934_v15, 1e-07  ;;  %vm3927_vm4 = vcmp.lt.f32.partialorder %v9629_v3, 0.1 }
 0x3c5   : > { %v5009_v28 = vsel %vm5007_vm1, %v5008_v5, %v5006_v29  ;;  %v6678_v0 = vpop.eup %6677  ;;  %v4740_v9 = vmul.f32 %v9772_v35, %v9772_v35  ;;  %v5001_v38 = vand.u32 2147483648, %v9723_v60  ;;  %v4806_v25 = vmul.f32 %v9483_v21, %v9772_v35 }
 0x3c6   : > { %v5226_v8 = vsel %vm5222_vm14, %v5009_v28, %v4704_v34  ;;  %v4997_v19 = vmul.f32 %v6678_v0, %v9723_v60  ;;  %v4604_v20 = vmul.f32 %v9218_v40, %v4538_v43  ;;  %6685 = vrsqrt.f32 %v9780_v59  ;;  %v9817_v34 = vpop.xlane.xlu0 %4386 }
 0x3c7   : > { %5258 = vst [vmem:[%s9785_s30 + $0x8] sm:$0xff] %v5226_v8  ;;  %v9793_v26 = vpop.eup %6679  ;;  %v4571_v31 = vmul.f32 %v9488_v33, %v4308_v53  ;;  %v4151_v47 = vmul.f32 0.5, %v9709_v50  ;;  %v4445_v48 = vmul.f32 %v9741_v44, %v9623_v51  ;;  %v4772_v24 = vmul.f32 %v4740_v9, %v11598_v13 }
 0x3c8   : > { %v6682_v1 = vpop.eup %6681  ;;  %v4999_v4 = vsel %vm4998_vm2, %v9723_v60, %v4997_v19  ;;  %v4838_v54 = vmul.f32 %v4806_v25, %v9456_v62  ;;  %v4023_v14 = vmul.f32 %v3991_v18, %v9629_v3  ;;  %6687 = vrcp.f32 %v9793_v26 }
 0x3c9   : > { %v5002_v16 = vsel %vm5000_vm3, %v5001_v38, %v4999_v4  ;;  %v9808_v45 = vsub.f32 %v4571_v31, %v4604_v20  ;;  %v4055_v50 = vsub.f32 %v9725_v23, %v6682_v1  ;;  %v4215_v17 = vadd.f32 %v6682_v1, %v9725_v23 }
 0x3ca   : > { %v5225_v42 = vsel %vm5222_vm14, %v5002_v16, %v4703_v55  ;;  %v4870_v6 = vadd.f32 %v4838_v54, %v4772_v24  ;;  %v3894_v62 = vmul.f32 %v9693_v57, %v9693_v57  ;;  %v4183_v23 = vadd.f32 1.0, %v4151_v47  ;;  %v9858_v24 = vpop.xlane.xlu1 %3398 }
 0x3cb   : > { %5257 = vst [vmem:[%s9785_s30] sm:$0xff] %v5225_v42  ;;  %v4739_v60 = vmul.f32 %v9808_v45, %v9808_v45  ;;  %v4805_v41 = vmul.f32 %v9483_v21, %v9808_v45  ;;  %v4087_v61 = vmul.f32 0.5, %v4055_v50  ;;  %v6684_v52 = vpop.eup %6683  ;;  %vm5019_vm5 = vcmp.eq.f32.partialorder %v9758_v27, inf }
 0x3cc   : > { %vm5021_vm6 = vcmp.eq.f32.partialorder %v9758_v27, 0.0  ;;  %v4905_v55 = vadd.f32 %v9535_v63, %v4870_v6  ;;  %v4247_v32 = vmul.f32 0.5, %v4215_v17  ;;  %v5018_v30 = vmul.f32 %v6684_v52, %v9758_v27 }
 0x3cd   : > { %v5022_v11 = vand.u32 2147483648, %v9758_v27  ;;  %v4771_v36 = vmul.f32 %v4739_v60, %v11599_v56  ;;  %v4837_v5 = vmul.f32 %v4805_v41, %v9499_v39  ;;  %6689 = vrcp.f32 %v9693_v57  ;;  %v9840_v39 = vpop.xlane.xlu0 %3392 }
 0x3ce   : > { %v4937_v53 = vadd.f32 1.0, %v4905_v55  ;;  %v4279_v29 = vsel %vm3927_vm4, %v4183_v23, %v4247_v32  ;;  %v3958_v15 = vmul.f32 0.16666667, %v3894_v62  ;;  %v5020_v43 = vsel %vm5019_vm5, %v9758_v27, %v5018_v30  ;;  %v9883_v56 = vpop.xlane.xlu1 %3402 }
 0x3cf   : > { %v4869_v28 = vadd.f32 %v4837_v5, %v4771_v36  ;;  %v4119_v49 = vsel %vm3927_vm4, %v4023_v14, %v4087_v61  ;;  %v4477_v18 = vsub.f32 1.0, %v4279_v29  ;;  %v5023_v0 = vsel %vm5021_vm6, %v5022_v11, %v5020_v43  ;;  %v11600_v61 = vld [vmem:[#allocation32_spill] sm:$0xff]  ;;  %v11601_v36 = vld [vmem:[#allocation33_spill] sm:$0xff] }
 0x3d0   : > { %v4705_v8 = vadd.f32 %v9221_v22, %v4666_v37  ;;  %v9838_v9 = vmax.f32 %v4937_v53, 1e-07  ;;  %v6686_v19 = vpop.eup %6685  ;;  %v5228_v38 = vsel %vm5222_vm14, %v5023_v0, %v9767_v2  ;;  %vm5012_vm7 = vcmp.eq.f32.partialorder %v9780_v59, inf }
 0x3d1   : > { %v4904_v27 = vadd.f32 %v9535_v63, %v4869_v28  ;;  %v4509_v25 = vmul.f32 %v4477_v18, %v4445_v48  ;;  %5260 = vst [vmem:[%s9785_s30 + $0x18] sm:$0xff] %v5228_v38  ;;  %v5011_v3 = vmul.f32 %v6686_v19, %v9780_v59  ;;  %vm5014_vm8 = vcmp.eq.f32.partialorder %v9780_v59, 0.0  ;;  %v9868_v42 = vpop.xlane.xlu0 %3396 }
 0x3d2   : > { %6691 = vrsqrt.f32 %v9838_v9  ;;  %v4311_v37 = vmul.f32 %v9741_v44, %v4119_v49  ;;  %v5015_v20 = vand.u32 2147483648, %v9780_v59  ;;  %v3990_v2 = vadd.f32 1.0, %v3958_v15  ;;  %v6688_v1 = vpop.eup %6687 }
 0x3d3   : > { %v4936_v31 = vadd.f32 1.0, %v4904_v27  ;;  %v4541_v47 = vmul.f32 %v9741_v44, %v4509_v25  ;;  %v5013_v4 = vsel %vm5012_vm7, %v9780_v59, %v5011_v3  ;;  %v4150_v48 = vmul.f32 0.5, %v3894_v62 }
 0x3d4   : > { %v3504_v13 = vmul.f32 %v9714_v7, %v9659_v12  ;;  %6693 = vrsqrt.f32 %v9840_v39  ;;  %v5016_v54 = vsel %vm5014_vm8, %v5015_v20, %v5013_v4  ;;  %v4054_v44 = vsub.f32 %v9793_v26, %v6688_v1 }
 0x3d5   : > { %v9860_v14 = vmax.f32 %v4936_v31, 1e-07  ;;  %v4607_v16 = vmul.f32 %v9218_v40, %v4541_v47  ;;  %v5227_v50 = vsel %vm5222_vm14, %v5016_v54, %v4705_v8  ;;  %v4574_v59 = vmul.f32 %v9488_v33, %v4311_v37  ;;  %v9893_v18 = vpop.xlane.xlu0 %3400  ;;  %v9907_v31 = vpop.xlane.xlu1 %3406 }
 0x3d6   : > { %v4214_v17 = vadd.f32 %v6688_v1, %v9793_v26  ;;  %5259 = vst [vmem:[%s9785_s30 + $0x10] sm:$0xff] %v5227_v50  ;;  %vm3926_vm0 = vcmp.lt.f32.partialorder %v9693_v57, 0.1  ;;  %vm3505_vm9 = vcmp.eq.f32.partialorder %v9659_v12, inf  ;;  %v4022_v62 = vmul.f32 %v3990_v2, %v9693_v57  ;;  %11602 = vst [vmem:[#allocation31_spill] sm:$0xff] %v9907_v31  ;;  %v11604_v50 = vld [vmem:[#allocation34_spill] sm:$0xff] }
 0x3d7   : > { %6695 = vrsqrt.f32 %v9860_v14  ;;  %v6690_v7 = vpop.eup %6689  ;;  %v4639_v6 = vsub.f32 %v4574_v59, %v4607_v16  ;;  %v4086_v60 = vmul.f32 0.5, %v4054_v44  ;;  %v4669_v23 = vmul.f32 %v11600_v61, %v9772_v35 }
 0x3d8   : > { %v4246_v41 = vmul.f32 0.5, %v4214_v17  ;;  %v4182_v52 = vadd.f32 1.0, %v4150_v48  ;;  %v3506_v26 = vsel %vm3505_vm9, %v9659_v12, %v3504_v13  ;;  %6697 = vrsqrt.f32 %v9858_v24 }
 0x3d9   : > { %v4742_v55 = vmul.f32 %v4639_v6, %v4639_v6  ;;  %v4808_v32 = vmul.f32 %v9483_v21, %v4639_v6  ;;  %v4118_v30 = vsel %vm3926_vm0, %v4022_v62, %v4086_v60  ;;  %v3508_v11 = vand.u32 2147483648, %v9659_v12  ;;  %v9918_v54 = vpop.xlane.xlu0 %3404 }
 0x3da   : > { %v4668_v5 = vmul.f32 %v11601_v36, %v9808_v45  ;;  %v4278_v35 = vsel %vm3926_vm0, %v4182_v52, %v4246_v41  ;;  %v4444_v53 = vmul.f32 %v6690_v7, %v9817_v34  ;;  %vm3507_vm10 = vcmp.eq.f32.partialorder %v9659_v12, 0.0  ;;  %11603 = vst [vmem:[#allocation29_spill] sm:$0xff] %v9918_v54 }
 0x3db   : > { %v4774_v15 = vmul.f32 %v4742_v55, %v9478_v58  ;;  %v4840_v43 = vmul.f32 %v4808_v32, %v9623_v51  ;;  %v4476_v28 = vsub.f32 1.0, %v4278_v35  ;;  %v3509_v49 = vsel %vm3507_vm10, %v3508_v11, %v3506_v26  ;;  %v9940_v26 = vpop.xlane.xlu1 %3410 }
 0x3dc   : > { %v6692_v29 = vpop.eup %6691  ;;  %v4708_v0 = vadd.f32 %v9221_v22, %v4669_v23  ;;  %vm5033_vm11 = vcmp.eq.f32.partialorder %v9838_v9, inf  ;;  %v4310_v57 = vmul.f32 %v6690_v7, %v4118_v30  ;;  %v5036_v19 = vand.u32 2147483648, %v9838_v9  ;;  %11605 = vst [vmem:[#allocation38_spill] sm:$0xff] %v9940_v26 }
 0x3dd   : > { %v5032_v45 = vmul.f32 %v6692_v29, %v9838_v9  ;;  %v4872_v38 = vadd.f32 %v4840_v43, %v4774_v15  ;;  %v4508_v27 = vmul.f32 %v4476_v28, %v4444_v53  ;;  %6699 = vrsqrt.f32 %v9868_v42 }
 0x3de   : > { %v6694_v8 = vpop.eup %6693  ;;  %vm5035_vm12 = vcmp.eq.f32.partialorder %v9838_v9, 0.0  ;;  %v9902_v51 = vmax.f32 %v3509_v49, 1e-15  ;;  %6701 = vrsqrt.f32 %v9883_v56  ;;  %v4707_v3 = vadd.f32 %v9221_v22, %v4668_v5  ;;  %v9954_v5 = vpop.xlane.xlu0 %3408 }
 0x3df   : > { %v5034_v58 = vsel %vm5033_vm11, %v9838_v9, %v5032_v45  ;;  %v4907_v37 = vadd.f32 %v9535_v63, %v4872_v38  ;;  %v4540_v20 = vmul.f32 %v6690_v7, %v4508_v27  ;;  %vm5026_vm13 = vcmp.eq.f32.partialorder %v9860_v14, inf  ;;  %11606 = vst [vmem:[#allocation32_spill] sm:$0xff] %v9954_v5 }
 0x3e0   : > { %v5037_v25 = vsel %vm5035_vm12, %v5036_v19, %v5034_v58  ;;  %vm5028_vm15 = vcmp.eq.f32.partialorder %v9860_v14, 0.0  ;;  %v4573_v9 = vmul.f32 %v9488_v33, %v4310_v57  ;;  %v3497_v13 = vmul.f32 %v6694_v8, %v9840_v39  ;;  %v9973_v19 = vpop.xlane.xlu1 %3414 }
 0x3e1   : > { %v6696_v47 = vpop.eup %6695  ;;  %v5230_v2 = vsel %vm5222_vm14, %v5037_v25, %v4708_v0  ;;  %v4939_v4 = vadd.f32 1.0, %v4907_v37  ;;  %v4606_v48 = vmul.f32 %v9218_v40, %v4540_v20  ;;  %v5029_v44 = vand.u32 2147483648, %v9860_v14  ;;  %11607 = vst [vmem:[#allocation33_spill] sm:$0xff] %v9973_v19 }
 0x3e2   : > { %5262 = vst [vmem:[%s9785_s30 + $0x28] sm:$0xff] %v5230_v2  ;;  %v5025_v1 = vmul.f32 %v6696_v47, %v9860_v14  ;;  %v6698_v16 = vpop.eup %6697  ;;  %v4671_v59 = vmul.f32 %v11604_v50, %v4639_v6  ;;  %v3778_v17 = vmul.f32 1.442695, %v9902_v51  ;;  %6703 = vrsqrt.f32 %v9893_v18  ;;  %v9983_v20 = vpop.xlane.xlu0 %3412 }
 0x3e3   : > { %v9925_v62 = vmax.f32 %v4939_v4, 1e-07  ;;  %v9927_v60 = vsub.f32 %v4573_v9, %v4606_v48  ;;  %v3518_v41 = vmul.f32 %v6698_v16, %v9858_v24  ;;  %vm3498_vm1 = vcmp.eq.f32.partialorder %v9840_v39, inf  ;;  %11608 = vst [vmem:[#allocation34_spill] sm:$0xff] %v9983_v20 }
 0x3e4   : > { %v5027_v7 = vsel %vm5026_vm13, %v9860_v14, %v5025_v1  ;;  %vm3500_vm2 = vcmp.eq.f32.partialorder %v9840_v39, 0.0  ;;  %6705 = vrsqrt.f32 %v9907_v31  ;;  %v3499_v23 = vsel %vm3498_vm1, %v9840_v39, %v3497_v13 }
 0x3e5   : > { %v5030_v61 = vsel %vm5028_vm15, %v5029_v44, %v5027_v7  ;;  %6707 = vrsqrt.f32 %v9925_v62  ;;  %v3501_v52 = vand.u32 2147483648, %v9840_v39  ;;  %v4741_v14 = vmul.f32 %v9927_v60, %v9927_v60 }
 0x3e6   : > { %v5229_v6 = vsel %vm5222_vm14, %v5030_v61, %v4707_v3  ;;  %v4807_v55 = vmul.f32 %v9483_v21, %v9927_v60  ;;  %vm3519_vm3 = vcmp.eq.f32.partialorder %v9858_v24, inf  ;;  %v3522_v32 = vand.u32 2147483648, %v9858_v24 }
 0x3e7   : > { %5261 = vst [vmem:[%s9785_s30 + $0x20] sm:$0xff] %v5229_v6  ;;  %v6700_v30 = vpop.eup %6699  ;;  %v9950_v11 = vadd.f32 %v9221_v22, %v4671_v59  ;;  %6709 = vpow2.f32 %v3778_v17  ;;  %v3520_v36 = vsel %vm3519_vm3, %v9858_v24, %v3518_v41  ;;  %vm3521_vm4 = vcmp.eq.f32.partialorder %v9858_v24, 0.0 }
 0x3e8   : > { %v6702_v35 = vpop.eup %6701  ;;  %v4773_v53 = vmul.f32 %v4741_v14, %v9528_v10  ;;  %v4839_v29 = vmul.f32 %v4807_v55, %v9817_v34  ;;  %v3502_v15 = vsel %vm3500_vm2, %v3501_v52, %v3499_v23  ;;  %v3523_v43 = vsel %vm3521_vm4, %v3522_v32, %v3520_v36  ;;  %v10002_v23 = vpop.xlane.xlu1 %3418 }
 0x3e9   : > { %v3511_v28 = vmul.f32 %v6700_v30, %v9868_v42  ;;  %vm3512_vm5 = vcmp.eq.f32.partialorder %v9868_v42, inf  ;;  %vm3514_vm6 = vcmp.eq.f32.partialorder %v9868_v42, 0.0  ;;  %v3532_v49 = vmul.f32 %v6702_v35, %v9883_v56  ;;  %11609 = vst [vmem:[#allocation39_spill] sm:$0xff] %v10002_v23  ;;  %v10011_v30 = vpop.xlane.xlu0 %3416 }
 0x3ea   : > { %v4871_v0 = vadd.f32 %v4839_v29, %v4773_v53  ;;  %v3515_v45 = vand.u32 2147483648, %v9868_v42  ;;  %vm3533_vm7 = vcmp.eq.f32.partialorder %v9883_v56, inf  ;;  %6711 = vrsqrt.f32 %v9918_v54  ;;  %11610 = vst [vmem:[#allocation40_spill] sm:$0xff] %v10011_v30  ;;  %v11611_v53 = vld [vmem:[#allocation35_spill] sm:$0xff] }
 0x3eb   : > { %v9967_v10 = vmax.f32 %v3502_v15, 1e-15  ;;  %v9969_v34 = vmax.f32 %v3523_v43, 1e-15  ;;  %v3513_v57 = vsel %vm3512_vm5, %v9868_v42, %v3511_v28  ;;  %v3534_v8 = vsel %vm3533_vm7, %v9883_v56, %v3532_v49 }
 0x3ec   : > { %v6704_v38 = vpop.eup %6703  ;;  %v4906_v27 = vadd.f32 %v9535_v63, %v4871_v0  ;;  %v3516_v58 = vsel %vm3514_vm6, %v3515_v45, %v3513_v57  ;;  %v3536_v25 = vand.u32 2147483648, %v9883_v56  ;;  %6713 = vrsqrt.f32 %v9940_v26  ;;  %v10028_v0 = vpop.xlane.xlu1 %3422 }
 0x3ed   : > { %v9978_v3 = vmax.f32 %v3516_v58, 1e-15  ;;  %vm3535_vm8 = vcmp.eq.f32.partialorder %v9883_v56, 0.0  ;;  %v3525_v37 = vmul.f32 %v6704_v38, %v9893_v18  ;;  %vm3526_vm0 = vcmp.eq.f32.partialorder %v9893_v18, inf  ;;  %11612 = vst [vmem:[#allocation35_spill] sm:$0xff] %v10028_v0 }
 0x3ee   : > { %v6706_v47 = vpop.eup %6705  ;;  %v4938_v2 = vadd.f32 1.0, %v4906_v27  ;;  %v3537_v9 = vsel %vm3535_vm8, %v3536_v25, %v3534_v8  ;;  %vm3528_vm9 = vcmp.eq.f32.partialorder %v9893_v18, 0.0  ;;  %v3529_v1 = vand.u32 2147483648, %v9893_v18  ;;  %v10038_v27 = vpop.xlane.xlu0 %3420 }
 0x3ef   : > { %v6708_v4 = vpop.eup %6707  ;;  %v3776_v48 = vmul.f32 1.442695, %v9967_v10  ;;  %v3782_v13 = vmul.f32 1.442695, %v9969_v34  ;;  %v3527_v16 = vsel %vm3526_vm0, %v9893_v18, %v3525_v37  ;;  %v3546_v44 = vmul.f32 %v6706_v47, %v9907_v31  ;;  %11613 = vst [vmem:[#allocation41_spill] sm:$0xff] %v10038_v27 }
 0x3f0   : > { %v5046_v50 = vmul.f32 %v6708_v4, %v9925_v62  ;;  %v9992_v59 = vmax.f32 %v4938_v2, 1e-07  ;;  %v3530_v17 = vsel %vm3528_vm9, %v3529_v1, %v3527_v16  ;;  %6715 = vrsqrt.f32 %v9954_v5 }
 0x3f1   : > { %v9995_v7 = vpop.eup %6709  ;;  %vm5047_vm10 = vcmp.eq.f32.partialorder %v9925_v62, inf  ;;  %v5050_v41 = vand.u32 2147483648, %v9925_v62  ;;  %v3780_v61 = vmul.f32 1.442695, %v9978_v3  ;;  %v10000_v6 = vmax.f32 %v3537_v9, 1e-15 }
 0x3f2   : > { %v5048_v52 = vsel %vm5047_vm10, %v9925_v62, %v5046_v50  ;;  %vm5049_vm11 = vcmp.eq.f32.partialorder %v9925_v62, 0.0  ;;  %6717 = vrsqrt.f32 %v9992_v59  ;;  %vm3547_vm12 = vcmp.eq.f32.partialorder %v9907_v31, inf }
 0x3f3   : > { %v5051_v14 = vsel %vm5049_vm11, %v5050_v41, %v5048_v52  ;;  %6719 = vpow2.f32 %v3776_v48  ;;  %v10008_v55 = vmax.f32 %v3530_v17, 1e-15  ;;  %v3548_v32 = vsel %vm3547_vm12, %v9907_v31, %v3546_v44  ;;  %v10059_v44 = vpop.xlane.xlu1 %3426 }
 0x3f4   : > { %v6712_v36 = vpop.eup %6711  ;;  %v5232_v35 = vsel %vm5222_vm14, %v5051_v14, %v9950_v11  ;;  %v4670_v62 = vmul.f32 %v11611_v53, %v9927_v60  ;;  %6721 = vpow2.f32 %v3782_v13  ;;  %v3550_v29 = vand.u32 2147483648, %v9907_v31  ;;  %11614 = vst [vmem:[#allocation42_spill] sm:$0xff] %v10059_v44  ;;  %v10075_v14 = vpop.xlane.xlu0 %3424 }
 0x3f5   : > { %5264 = vst [vmem:[%s9785_s30 + $0x38] sm:$0xff] %v5232_v35  ;;  %6723 = vpow2.f32 %v3780_v61  ;;  %v3786_v15 = vmul.f32 1.442695, %v10000_v6  ;;  %vm3549_vm13 = vcmp.eq.f32.partialorder %v9907_v31, 0.0  ;;  %v3539_v43 = vmul.f32 %v6712_v36, %v9918_v54  ;;  %11615 = vst [vmem:[#allocation43_spill] sm:$0xff] %v10075_v14 }
 0x3f6   : > { %v6714_v28 = vpop.eup %6713  ;;  %v3551_v49 = vsel %vm3549_vm13, %v3550_v29, %v3548_v32  ;;  %vm3540_vm15 = vcmp.eq.f32.partialorder %v9918_v54, inf  ;;  %6725 = vrsqrt.f32 %v9973_v19  ;;  %v3784_v11 = vmul.f32 1.442695, %v10008_v55 }
 0x3f7   : > { %v3541_v60 = vsel %vm3540_vm15, %v9918_v54, %v3539_v43  ;;  %6727 = vrsqrt.f32 %v9983_v20  ;;  %v4709_v45 = vadd.f32 %v9221_v22, %v4670_v62  ;;  %vm3542_vm1 = vcmp.eq.f32.partialorder %v9918_v54, 0.0 }
 0x3f8   : > { %v3543_v57 = vand.u32 2147483648, %v9918_v54  ;;  %6729 = vrsqrt.f32 %v10002_v23  ;;  %v10034_v8 = vmax.f32 %v3551_v49, 1e-15  ;;  %v3560_v38 = vmul.f32 %v6714_v28, %v9940_v26 }
 0x3f9   : > { %6731 = vpow2.f32 %v3786_v15  ;;  %vm3561_vm2 = vcmp.eq.f32.partialorder %v9940_v26, inf  ;;  %vm3563_vm3 = vcmp.eq.f32.partialorder %v9940_v26, 0.0  ;;  %v3564_v37 = vand.u32 2147483648, %v9940_v26 }
 0x3fa   : > { %v6716_v58 = vpop.eup %6715  ;;  %v3544_v25 = vsel %vm3542_vm1, %v3543_v57, %v3541_v60  ;;  %6733 = vrsqrt.f32 %v10011_v30  ;;  %vm5040_vm4 = vcmp.eq.f32.partialorder %v9992_v59, inf  ;;  %vm5042_vm5 = vcmp.eq.f32.partialorder %v9992_v59, 0.0 }
 0x3fb   : > { %6735 = vpow2.f32 %v3784_v11  ;;  %vm3554_vm6 = vcmp.eq.f32.partialorder %v9954_v5, inf  ;;  %v5043_v2 = vand.u32 2147483648, %v9992_v59  ;;  %v3553_v9 = vmul.f32 %v6716_v58, %v9954_v5 }
 0x3fc   : > { %v6718_v47 = vpop.eup %6717  ;;  %vm3556_vm7 = vcmp.eq.f32.partialorder %v9954_v5, 0.0  ;;  %6737 = vrsqrt.f32 %v10028_v0  ;;  %v3790_v48 = vmul.f32 1.442695, %v10034_v8  ;;  %v10054_v13 = vmax.f32 %v3544_v25, 1e-15 }
 0x3fd   : > { %v10050_v1 = vpop.eup %6719  ;;  %v5039_v4 = vmul.f32 %v6718_v47, %v9992_v59  ;;  %v3562_v16 = vsel %vm3561_vm2, %v9940_v26, %v3560_v38  ;;  %v3557_v17 = vand.u32 2147483648, %v9954_v5  ;;  %vm3575_vm8 = vcmp.eq.f32.partialorder %v9973_v19, inf  ;;  %v10102_v38 = vpop.xlane.xlu1 %3430 }
 0x3fe   : > { %v10061_v50 = vpop.eup %6721  ;;  %vm3577_vm0 = vcmp.eq.f32.partialorder %v9973_v19, 0.0  ;;  %6739 = vrsqrt.f32 %v10038_v27  ;;  %v3578_v52 = vand.u32 2147483648, %v9973_v19  ;;  %vm3568_vm9 = vcmp.eq.f32.partialorder %v9983_v20, inf  ;;  %11616 = vst [vmem:[#allocation44_spill] sm:$0xff] %v10102_v38 }
 0x3ff   : > { %v10067_v41 = vpop.eup %6723  ;;  %v5041_v61 = vsel %vm5040_vm4, %v9992_v59, %v5039_v4  ;;  %vm3570_vm10 = vcmp.eq.f32.partialorder %v9983_v20, 0.0  ;;  %v3565_v35 = vsel %vm3563_vm3, %v3564_v37, %v3562_v16  ;;  %v3555_v53 = vsel %vm3554_vm6, %v9954_v5, %v3553_v9 }
 0x400   : > { %v6726_v32 = vpop.eup %6725  ;;  %v5044_v36 = vsel %vm5042_vm5, %v5043_v2, %v5041_v61  ;;  %6741 = vrsqrt.f32 %v10059_v44  ;;  %v3788_v15 = vmul.f32 1.442695, %v10054_v13  ;;  %v3571_v49 = vand.u32 2147483648, %v9983_v20 }
 0x401   : > { %v6728_v62 = vpop.eup %6727  ;;  %v5231_v29 = vsel %vm5222_vm14, %v5044_v36, %v4709_v45  ;;  %6743 = vpow2.f32 %v3790_v48  ;;  %v3574_v43 = vmul.f32 %v6726_v32, %v9973_v19  ;;  %vm3589_vm11 = vcmp.eq.f32.partialorder %v10002_v23, inf }
 0x402   : > { %v6730_v59 = vpop.eup %6729  ;;  %5263 = vst [vmem:[%s9785_s30 + $0x30] sm:$0xff] %v5231_v29  ;;  %v3567_v28 = vmul.f32 %v6728_v62, %v9983_v20  ;;  %6745 = vrsqrt.f32 %v10075_v14  ;;  %v10096_v60 = vmax.f32 %v3565_v35, 1e-15  ;;  %v3558_v45 = vsel %vm3556_vm7, %v3557_v17, %v3555_v53  ;;  %v10129_v53 = vpop.xlane.xlu0 %3428 }
 0x403   : > { %v10094_v11 = vpop.eup %6731  ;;  %v3588_v57 = vmul.f32 %v6730_v59, %v10002_v23  ;;  %vm3591_vm12 = vcmp.eq.f32.partialorder %v10002_v23, 0.0  ;;  %v3576_v25 = vsel %vm3575_vm8, %v9973_v19, %v3574_v43  ;;  %v3592_v37 = vand.u32 2147483648, %v10002_v23  ;;  %11617 = vst [vmem:[#allocation45_spill] sm:$0xff] %v10129_v53 }
 0x404   : > { %v6734_v58 = vpop.eup %6733  ;;  %vm3582_vm13 = vcmp.eq.f32.partialorder %v10011_v30, inf  ;;  %vm3584_vm15 = vcmp.eq.f32.partialorder %v10011_v30, 0.0  ;;  %6747 = vpow2.f32 %v3788_v15  ;;  %v3569_v2 = vsel %vm3568_vm9, %v9983_v20, %v3567_v28 }
 0x405   : > { %v10110_v47 = vpop.eup %6735  ;;  %v3581_v9 = vmul.f32 %v6734_v58, %v10011_v30  ;;  %v3585_v4 = vand.u32 2147483648, %v10011_v30  ;;  %v10117_v16 = vmax.f32 %v3558_v45, 1e-15  ;;  %v3590_v17 = vsel %vm3589_vm11, %v10002_v23, %v3588_v57 }
 0x406   : > { %v6738_v48 = vpop.eup %6737  ;;  %vm3603_vm1 = vcmp.eq.f32.partialorder %v10028_v0, inf  ;;  %6749 = vrsqrt.f32 %v10102_v38  ;;  %v3794_v61 = vmul.f32 1.442695, %v10096_v60  ;;  %v3579_v32 = vsel %vm3577_vm0, %v3578_v52, %v3576_v25 }
 0x407   : > { %v3583_v36 = vsel %vm3582_vm13, %v10011_v30, %v3581_v9  ;;  %v3602_v35 = vmul.f32 %v6738_v48, %v10028_v0  ;;  %v3572_v29 = vsel %vm3570_vm10, %v3571_v49, %v3569_v2  ;;  %vm3605_vm2 = vcmp.eq.f32.partialorder %v10028_v0, 0.0  ;;  %v10153_v48 = vpop.xlane.xlu1 %3434 }
 0x408   : > { %v6740_v62 = vpop.eup %6739  ;;  %v3606_v15 = vand.u32 2147483648, %v10028_v0  ;;  %vm3596_vm3 = vcmp.eq.f32.partialorder %v10038_v27, inf  ;;  %v3593_v43 = vsel %vm3591_vm12, %v3592_v37, %v3590_v17  ;;  %vm3598_vm4 = vcmp.eq.f32.partialorder %v10038_v27, 0.0  ;;  %11620 = vst [vmem:[#allocation48_spill] sm:$0xff] %v10153_v48 }
 0x409   : > { %v3604_v52 = vsel %vm3603_vm1, %v10028_v0, %v3602_v35  ;;  %v3599_v59 = vand.u32 2147483648, %v10038_v27  ;;  %v3792_v45 = vmul.f32 1.442695, %v10117_v16  ;;  %v10142_v57 = vmax.f32 %v3579_v32, 1e-15 }
 0x40a   : > { %v6742_v28 = vpop.eup %6741  ;;  %v3586_v49 = vsel %vm3584_vm15, %v3585_v4, %v3583_v36  ;;  %v3595_v58 = vmul.f32 %v6740_v62, %v10038_v27  ;;  %v10149_v2 = vmax.f32 %v3572_v29, 1e-15  ;;  %v3607_v37 = vsel %vm3605_vm2, %v3606_v15, %v3604_v52  ;;  %v10168_v15 = vpop.xlane.xlu0 %3432 }
 0x40b   : > { %11618 = vst [vmem:[#allocation46_spill] sm:$0xff] %v10142_v57  ;;  %v10147_v25 = vpop.eup %6743  ;;  %v3616_v9 = vmul.f32 %v6742_v28, %v10059_v44  ;;  %vm3617_vm5 = vcmp.eq.f32.partialorder %v10059_v44, inf  ;;  %v10155_v35 = vmax.f32 %v3593_v43, 1e-15  ;;  %v3620_v32 = vand.u32 2147483648, %v10059_v44  ;;  %11623 = vst [vmem:[#allocation51_spill] sm:$0xff] %v10168_v15 }
 0x40c   : > { %11619 = vst [vmem:[#allocation47_spill] sm:$0xff] %v10149_v2  ;;  %v6746_v17 = vpop.eup %6745  ;;  %v3597_v4 = vsel %vm3596_vm3, %v10038_v27, %v3595_v58  ;;  %6751 = vrsqrt.f32 %v10129_v53  ;;  %v10162_v36 = vmax.f32 %v3586_v49, 1e-15  ;;  %vm3619_vm6 = vcmp.eq.f32.partialorder %v10059_v44, 0.0 }
 0x40d   : > { %11621 = vst [vmem:[#allocation49_spill] sm:$0xff] %v10155_v35  ;;  %v3600_v62 = vsel %vm3598_vm4, %v3599_v59, %v3597_v4  ;;  %v3618_v29 = vsel %vm3617_vm5, %v10059_v44, %v3616_v9  ;;  %v3798_v43 = vmul.f32 1.442695, %v10142_v57  ;;  %v10171_v52 = vmax.f32 %v3607_v37, 1e-15 }
 0x40e   : > { %11622 = vst [vmem:[#allocation50_spill] sm:$0xff] %v10162_v36  ;;  %v3621_v28 = vsel %vm3619_vm6, %v3620_v32, %v3618_v29  ;;  %6753 = vrsqrt.f32 %v10153_v48  ;;  %v10174_v58 = vpop.eup %6747  ;;  %v3796_v49 = vmul.f32 1.442695, %v10149_v2  ;;  %v10177_v27 = vmax.f32 %v3600_v62, 1e-15 }
 0x40f   : > { %11624 = vst [vmem:[#allocation52_spill] sm:$0xff] %v10171_v52  ;;  %6755 = vpow2.f32 %v3794_v61  ;;  %v3609_v59 = vmul.f32 %v6746_v17, %v10075_v14  ;;  %v3802_v4 = vmul.f32 1.442695, %v10155_v35  ;;  %v3800_v37 = vmul.f32 1.442695, %v10162_v36 }
 0x410   : > { %11625 = vst [vmem:[#allocation53_spill] sm:$0xff] %v10177_v27  ;;  %v6750_v9 = vpop.eup %6749  ;;  %6757 = vrsqrt.f32 %v10168_v15  ;;  %v10183_v32 = vmax.f32 %v3621_v28, 1e-15  ;;  %v3806_v61 = vmul.f32 1.442695, %v10171_v52  ;;  %vm3610_vm7 = vcmp.eq.f32.partialorder %v10075_v14, inf }
 0x411   : > { %6759 = vpow2.f32 %v3792_v45  ;;  %v3630_v29 = vmul.f32 %v6750_v9, %v10102_v38  ;;  %vm3612_vm8 = vcmp.eq.f32.partialorder %v10075_v14, 0.0  ;;  %v3804_v17 = vmul.f32 1.442695, %v10177_v27 }
 0x412   : > { %11626 = vst [vmem:[#allocation54_spill] sm:$0xff] %v10183_v32  ;;  %6761 = vpow2.f32 %v3798_v43  ;;  %v3611_v62 = vsel %vm3610_vm7, %v10075_v14, %v3609_v59  ;;  %vm3631_vm0 = vcmp.eq.f32.partialorder %v10102_v38, inf  ;;  %v3613_v45 = vand.u32 2147483648, %v10075_v14  ;;  %v10201_v14 = vpop.xlane.xlu1 %3438 }
 0x413   : > { %6763 = vpow2.f32 %v3796_v49  ;;  %v3632_v28 = vsel %vm3631_vm0, %v10102_v38, %v3630_v29  ;;  %vm3633_vm9 = vcmp.eq.f32.partialorder %v10102_v38, 0.0  ;;  %v3810_v43 = vmul.f32 1.442695, %v10183_v32  ;;  %v10224_v32 = vpop.xlane.xlu0 %3436 }
 0x414   : > { %6765 = vpow2.f32 %v3802_v4  ;;  %v3634_v9 = vand.u32 2147483648, %v10102_v38  ;;  %vm3624_vm10 = vcmp.eq.f32.partialorder %v10129_v53, inf  ;;  %v3614_v44 = vsel %vm3612_vm8, %v3613_v45, %v3611_v62 }
 0x415   : > { %6767 = vpow2.f32 %v3800_v37  ;;  %vm3626_vm11 = vcmp.eq.f32.partialorder %v10129_v53, 0.0  ;;  %v3627_v59 = vand.u32 2147483648, %v10129_v53  ;;  %v3897_v37 = vmul.f32 %v9902_v51, %v9902_v51 }
 0x416   : > { %v6752_v49 = vpop.eup %6751  ;;  %6769 = vpow2.f32 %v3806_v61  ;;  %v3635_v4 = vsel %vm3633_vm9, %v3634_v9, %v3632_v28  ;;  %vm3645_vm12 = vcmp.eq.f32.partialorder %v10153_v48, inf  ;;  %vm3647_vm13 = vcmp.eq.f32.partialorder %v10153_v48, 0.0 }
 0x417   : > { %6771 = vpow2.f32 %v3804_v17  ;;  %v3623_v29 = vmul.f32 %v6752_v49, %v10129_v53  ;;  %v3896_v61 = vmul.f32 %v9967_v10, %v9967_v10  ;;  %v10212_v17 = vmax.f32 %v3614_v44, 1e-15 }
 0x418   : > { %v6754_v0 = vpop.eup %6753  ;;  %6773 = vrcp.f32 %v9995_v7  ;;  %v10218_v49 = vmax.f32 %v3635_v4, 1e-15  ;;  %v3648_v30 = vand.u32 2147483648, %v10153_v48  ;;  %vm3638_vm15 = vcmp.eq.f32.partialorder %v10168_v15, inf }
 0x419   : > { %v10210_v62 = vpop.eup %6755  ;;  %6775 = vpow2.f32 %v3810_v43  ;;  %11627 = vst [vmem:[#allocation55_spill] sm:$0xff] %v10212_v17  ;;  %v3625_v45 = vsel %vm3624_vm10, %v10129_v53, %v3623_v29  ;;  %v3644_v28 = vmul.f32 %v6754_v0, %v10153_v48  ;;  %v3961_v29 = vmul.f32 0.16666667, %v3897_v37 }
 0x41a   : > { %v6758_v9 = vpop.eup %6757  ;;  %11628 = vst [vmem:[#allocation56_spill] sm:$0xff] %v10218_v49  ;;  %v3628_v38 = vsel %vm3626_vm11, %v3627_v59, %v3625_v45  ;;  %6777 = vrsqrt.f32 %v10201_v14  ;;  %v3960_v45 = vmul.f32 0.16666667, %v3896_v61  ;;  %v3808_v23 = vmul.f32 1.442695, %v10212_v17 }
 0x41b   : > { %v10226_v44 = vpop.eup %6759  ;;  %v3646_v43 = vsel %vm3645_vm12, %v10153_v48, %v3644_v28  ;;  %v3637_v0 = vmul.f32 %v6758_v9, %v10168_v15  ;;  %6779 = vrcp.f32 %v10050_v1  ;;  %v10235_v59 = vmax.f32 %v3628_v38, 1e-15 }
 0x41c   : > { %v10233_v4 = vpop.eup %6761  ;;  %6781 = vrcp.f32 %v9902_v51  ;;  %vm3640_vm1 = vcmp.eq.f32.partialorder %v10168_v15, 0.0  ;;  %v3641_v28 = vand.u32 2147483648, %v10168_v15  ;;  %v3814_v38 = vmul.f32 1.442695, %v10218_v49 }
 0x41d   : > { %11629 = vst [vmem:[#allocation57_spill] sm:$0xff] %v10233_v4  ;;  %11630 = vst [vmem:[#allocation58_spill] sm:$0xff] %v10235_v59  ;;  %v10239_v53 = vpop.eup %6763  ;;  %6783 = vrsqrt.f32 %v10224_v32  ;;  %v3649_v27 = vsel %vm3647_vm13, %v3648_v30, %v3646_v43  ;;  %v3639_v17 = vsel %vm3638_vm15, %v10168_v15, %v3637_v0  ;;  %v3993_v36 = vadd.f32 1.0, %v3961_v29 }
 0x41e   : > { %11631 = vst [vmem:[#allocation59_spill] sm:$0xff] %v10239_v53  ;;  %v10245_v9 = vpop.eup %6765  ;;  %6785 = vrcp.f32 %v10061_v50  ;;  %v4153_v19 = vmul.f32 0.5, %v3897_v37  ;;  %v3992_v49 = vadd.f32 1.0, %v3960_v45  ;;  %v4152_v35 = vmul.f32 0.5, %v3896_v61 }
 0x41f   : > { %11632 = vst [vmem:[#allocation60_spill] sm:$0xff] %v10245_v9  ;;  %v10252_v52 = vpop.eup %6767  ;;  %6787 = vrcp.f32 %v9967_v10  ;;  %v3812_v9 = vmul.f32 1.442695, %v10235_v59  ;;  %v3899_v30 = vmul.f32 %v9969_v34, %v9969_v34  ;;  %v10263_v20 = vmax.f32 %v3649_v27, 1e-15 }
 0x420   : > { %11633 = vst [vmem:[#allocation61_spill] sm:$0xff] %v10252_v52  ;;  %v10256_v5 = vpop.eup %6769  ;;  %6789 = vpow2.f32 %v3808_v23  ;;  %vm3929_vm2 = vcmp.lt.f32.partialorder %v9902_v51, 0.1  ;;  %v3642_v29 = vsel %vm3640_vm1, %v3641_v28, %v3639_v17  ;;  %vm3928_vm3 = vcmp.lt.f32.partialorder %v9967_v10, 0.1 }
 0x421   : > { %11634 = vst [vmem:[#allocation62_spill] sm:$0xff] %v10256_v5  ;;  %v10261_v43 = vpop.eup %6771  ;;  %11636 = vst [vmem:[#allocation64_spill] sm:$0xff] %v10263_v20  ;;  %6791 = vrcp.f32 %v9969_v34  ;;  %v3963_v61 = vmul.f32 0.16666667, %v3899_v30  ;;  %v4025_v23 = vmul.f32 %v3993_v36, %v9902_v51  ;;  %v4185_v48 = vadd.f32 1.0, %v4153_v19 }
 0x422   : > { %11635 = vst [vmem:[#allocation63_spill] sm:$0xff] %v10261_v43  ;;  %v6774_v37 = vpop.eup %6773  ;;  %6793 = vpow2.f32 %v3814_v38  ;;  %v10276_v43 = vpop.xlane.xlu1 %4392  ;;  %v4024_v17 = vmul.f32 %v3992_v49, %v9967_v10  ;;  %v4184_v28 = vadd.f32 1.0, %v4152_v35  ;;  %v3818_v5 = vmul.f32 1.442695, %v10263_v20 }
 0x423   : > { %v10271_v45 = vpop.eup %6775  ;;  %v4057_v27 = vsub.f32 %v9995_v7, %v6774_v37  ;;  %6795 = vpow2.f32 %v3812_v9  ;;  %v4217_v59 = vadd.f32 %v6774_v37, %v9995_v7  ;;  %v10280_v52 = vmax.f32 %v3642_v29, 1e-15 }
 0x424   : > { %11637 = vst [vmem:[#allocation65_spill] sm:$0xff] %v10271_v45  ;;  %v6778_v0 = vpop.eup %6777  ;;  %6797 = vrcp.f32 %v10067_v41  ;;  %v3995_v7 = vadd.f32 1.0, %v3963_v61  ;;  %v3898_v61 = vmul.f32 %v9978_v3, %v9978_v3  ;;  %vm3931_vm4 = vcmp.lt.f32.partialorder %v9969_v34, 0.1 }
 0x425   : > { %v6780_v15 = vpop.eup %6779  ;;  %v4089_v38 = vmul.f32 0.5, %v4057_v27  ;;  %v4249_v45 = vmul.f32 0.5, %v4217_v59  ;;  %v10288_v49 = vmul.f32 %v6778_v0, %v10201_v14  ;;  %v10293_v27 = vpop.xlane.xlu0 %4390  ;;  %6799 = vrcp.f32 %v9978_v3 }
 0x426   : > { %v6782_v36 = vpop.eup %6781  ;;  %v4056_v19 = vsub.f32 %v10050_v1, %v6780_v15  ;;  %v4216_v9 = vadd.f32 %v6780_v15, %v10050_v1  ;;  %v4155_v15 = vmul.f32 0.5, %v3899_v30  ;;  %v4027_v51 = vmul.f32 %v3995_v7, %v9969_v34 }
 0x427   : > { %v10285_v37 = vpop.eup %6783  ;;  %v4121_v35 = vsel %vm3929_vm2, %v4025_v23, %v4089_v38  ;;  %v4447_v29 = vmul.f32 %v6782_v36, %v10276_v43  ;;  %v4281_v20 = vsel %vm3929_vm2, %v4185_v48, %v4249_v45  ;;  %v10305_v48 = vpop.xlane.xlu1 %4396  ;;  %v3962_v54 = vmul.f32 0.16666667, %v3898_v61 }
 0x428   : > { %v6786_v59 = vpop.eup %6785  ;;  %v4088_v1 = vmul.f32 0.5, %v4056_v19  ;;  %v4479_v26 = vsub.f32 1.0, %v4281_v20  ;;  %v4248_v2 = vmul.f32 0.5, %v4216_v9  ;;  %v4313_v53 = vmul.f32 %v6782_v36, %v4121_v35 }
 0x429   : > { %v6788_v0 = vpop.eup %6787  ;;  %v4059_v23 = vsub.f32 %v10061_v50, %v6786_v59  ;;  %v4219_v38 = vadd.f32 %v6786_v59, %v10061_v50  ;;  %v4187_v59 = vadd.f32 1.0, %v4155_v15  ;;  %6801 = vpow2.f32 %v3818_v5 }
 0x42a   : > { %v4446_v4 = vmul.f32 %v6788_v0, %v10293_v27  ;;  %v10307_v30 = vpop.eup %6789  ;;  %v4511_v45 = vmul.f32 %v4479_v26, %v4447_v29  ;;  %v4120_v20 = vsel %vm3928_vm3, %v4024_v17, %v4088_v1  ;;  %v4280_v19 = vsel %vm3928_vm3, %v4184_v28, %v4248_v2 }
 0x42b   : > { %11638 = vst [vmem:[#allocation66_spill] sm:$0xff] %v10307_v30  ;;  %v4091_v9 = vmul.f32 0.5, %v4059_v23  ;;  %v6792_v50 = vpop.eup %6791  ;;  %v4478_v35 = vsub.f32 1.0, %v4280_v19  ;;  %v4251_v57 = vmul.f32 0.5, %v4219_v38  ;;  %v4576_v10 = vmul.f32 %v9488_v33, %v4313_v53 }
 0x42c   : > { %v10313_v31 = vpop.eup %6793  ;;  %v4543_v7 = vmul.f32 %v6782_v36, %v4511_v45  ;;  %v4449_v26 = vmul.f32 %v6792_v50, %v10305_v48  ;;  %v4312_v2 = vmul.f32 %v6788_v0, %v4120_v20  ;;  %vm3930_vm5 = vcmp.lt.f32.partialorder %v9978_v3, 0.1  ;;  %v10325_v36 = vpop.xlane.xlu0 %4394 }
 0x42d   : > { %v4123_v30 = vsel %vm3931_vm4, %v4027_v51, %v4091_v9  ;;  %v10318_v29 = vpop.eup %6795  ;;  %v4510_v17 = vmul.f32 %v4478_v35, %v4446_v4  ;;  %v4283_v28 = vsel %vm3931_vm4, %v4187_v59, %v4251_v57  ;;  %v4154_v5 = vmul.f32 0.5, %v3898_v61 }
 0x42e   : > { %v6798_v1 = vpop.eup %6797  ;;  %v4609_v15 = vmul.f32 %v9218_v40, %v4543_v7  ;;  %v4481_v23 = vsub.f32 1.0, %v4283_v28  ;;  %v4315_v51 = vmul.f32 %v6792_v50, %v4123_v30  ;;  %v3994_v45 = vadd.f32 1.0, %v3962_v54 }
 0x42f   : > { %v4542_v38 = vmul.f32 %v6788_v0, %v4510_v17  ;;  %v4058_v19 = vsub.f32 %v10067_v41, %v6798_v1  ;;  %v6800_v53 = vpop.eup %6799  ;;  %vm3659_vm6 = vcmp.eq.f32.partialorder %v10201_v14, inf  ;;  %v4218_v57 = vadd.f32 %v6798_v1, %v10067_v41 }
 0x430   : > { %v4641_v4 = vsub.f32 %v4576_v10, %v4609_v15  ;;  %v4513_v34 = vmul.f32 %v4481_v23, %v4449_v26  ;;  %6803 = vrcp.f32 %v10094_v11  ;;  %v4575_v20 = vmul.f32 %v9488_v33, %v4312_v2 }
 0x431   : > { %v4608_v61 = vmul.f32 %v9218_v40, %v4542_v38  ;;  %v4090_v9 = vmul.f32 0.5, %v4058_v19  ;;  %v4448_v0 = vmul.f32 %v6800_v53, %v10325_v36  ;;  %v4186_v59 = vadd.f32 1.0, %v4154_v5 }
 0x432   : > { %v4744_v30 = vmul.f32 %v4641_v4, %v4641_v4  ;;  %v4810_v54 = vmul.f32 %v9483_v21, %v4641_v4  ;;  %v4545_v35 = vmul.f32 %v6792_v50, %v4513_v34  ;;  %v4026_v10 = vmul.f32 %v3994_v45, %v9978_v3 }
 0x433   : > { %v4640_v7 = vsub.f32 %v4575_v20, %v4608_v61  ;;  %v4250_v26 = vmul.f32 0.5, %v4218_v57  ;;  %v3901_v41 = vmul.f32 %v10000_v6, %v10000_v6  ;;  %v4578_v28 = vmul.f32 %v9488_v33, %v4315_v51  ;;  %v10348_v38 = vpop.eup %6801 }
 0x434   : > { %v4776_v17 = vmul.f32 %v4744_v30, %v9659_v12  ;;  %v4842_v2 = vmul.f32 %v4810_v54, %v10276_v43  ;;  %v4611_v1 = vmul.f32 %v9218_v40, %v4545_v35  ;;  %vm3661_vm7 = vcmp.eq.f32.partialorder %v10201_v14, 0.0  ;;  %v11639_v30 = vld [vmem:[#allocation36_spill] sm:$0xff] }
 0x435   : > { %v4743_v15 = vmul.f32 %v4640_v7, %v4640_v7  ;;  %v4809_v50 = vmul.f32 %v9483_v21, %v4640_v7  ;;  %v4122_v23 = vsel %vm3930_vm5, %v4026_v10, %v4090_v9  ;;  %v4282_v5 = vsel %vm3930_vm5, %v4186_v59, %v4250_v26 }
 0x436   : > { %v3651_v12 = vmul.f32 %v10285_v37, %v10224_v32  ;;  %v4874_v43 = vadd.f32 %v4842_v2, %v4776_v17  ;;  %v4643_v51 = vsub.f32 %v4578_v28, %v4611_v1  ;;  %6805 = vrcp.f32 %v10000_v6 }
 0x437   : > { %vm3652_vm8 = vcmp.eq.f32.partialorder %v10224_v32, inf  ;;  %v4775_v45 = vmul.f32 %v4743_v15, %v9840_v39  ;;  %v4841_v19 = vmul.f32 %v4809_v50, %v10293_v27  ;;  %v4480_v34 = vsub.f32 1.0, %v4282_v5  ;;  %v11640_v27 = vld [vmem:[#allocation37_spill] sm:$0xff] }
 0x438   : > { %v3965_v57 = vmul.f32 0.16666667, %v3901_v41  ;;  %v4909_v3 = vadd.f32 %v9535_v63, %v4874_v43  ;;  %v4746_v20 = vmul.f32 %v4643_v51, %v4643_v51  ;;  %v4812_v61 = vmul.f32 %v9483_v21, %v4643_v51 }
 0x439   : > { %v4314_v9 = vmul.f32 %v6800_v53, %v4122_v23  ;;  %v3660_v37 = vsel %vm3659_vm6, %v10201_v14, %v10288_v49  ;;  %v4673_v54 = vmul.f32 %v11639_v30, %v4641_v4  ;;  %v4873_v35 = vadd.f32 %v4841_v19, %v4775_v45  ;;  %v11642_v19 = vld [vmem:[#allocation8_spill] sm:$0xff]  ;;  %v10395_v30 = vpop.xlane.xlu1 %4400 }
 0x43a   : > { %v4512_v59 = vmul.f32 %v4480_v34, %v4448_v0  ;;  %v6804_v39 = vpop.eup %6803  ;;  %v4941_v10 = vadd.f32 1.0, %v4909_v3  ;;  %v4672_v26 = vmul.f32 %v11640_v27, %v4640_v7  ;;  %v4778_v17 = vmul.f32 %v4746_v20, %v9858_v24 }
 0x43b   : > { %v4844_v2 = vmul.f32 %v4812_v61, %v10305_v48  ;;  %v4908_v28 = vadd.f32 %v9535_v63, %v4873_v35  ;;  %v3997_v15 = vadd.f32 1.0, %v3965_v57  ;;  %v4061_v50 = vsub.f32 %v10094_v11, %v6804_v39 }
 0x43c   : > { %v4544_v1 = vmul.f32 %v6800_v53, %v4512_v59  ;;  %v10368_v23 = vmax.f32 %v4941_v10, 1e-07  ;;  %v4577_v4 = vmul.f32 %v9488_v33, %v4314_v9  ;;  %v4221_v0 = vadd.f32 %v6804_v39, %v10094_v11 }
 0x43d   : > { %v4876_v49 = vadd.f32 %v4844_v2, %v4778_v17  ;;  %v4940_v5 = vadd.f32 1.0, %v4908_v28  ;;  %v4093_v43 = vmul.f32 0.5, %v4061_v50  ;;  %v4157_v24 = vmul.f32 0.5, %v3901_v41 }
 0x43e   : > { %v4610_v7 = vmul.f32 %v9218_v40, %v4544_v1  ;;  %v10374_v48 = vmul.f32 1.442695, %v10280_v52  ;;  %v11641_v53 = vand.u32 2147483648, %v10201_v14  ;;  %6807 = vrsqrt.f32 %v10368_v23 }
 0x43f   : > { %v4675_v34 = vmul.f32 %v11642_v19, %v4643_v51  ;;  %v10384_v57 = vmax.f32 %v4940_v5, 1e-07  ;;  %v4911_v11 = vadd.f32 %v9535_v63, %v4876_v49  ;;  %v4029_v41 = vmul.f32 %v3997_v15, %v10000_v6  ;;  %v11643_v15 = vld [vmem:[#allocation9_spill] sm:$0xff] }
 0x440   : > { %v10380_v45 = vsel %vm3661_vm7, %v11641_v53, %v3660_v37  ;;  %v4642_v3 = vsub.f32 %v4577_v4, %v4610_v7  ;;  %v6806_v20 = vpop.eup %6805  ;;  %v10391_v61 = vsel %vm3652_vm8, %v10224_v32, %v3651_v12  ;;  %v4712_v9 = vadd.f32 %v9221_v22, %v4673_v54 }
 0x441   : > { %vm3933_vm0 = vcmp.lt.f32.partialorder %v10000_v6, 0.1  ;;  %v4253_v37 = vmul.f32 0.5, %v4221_v0  ;;  %v10398_v51 = vadd.f32 %v9221_v22, %v4672_v26  ;;  %6809 = vrsqrt.f32 %v10384_v57 }
 0x442   : > { %v4125_v35 = vsel %vm3933_vm0, %v4029_v41, %v4093_v43  ;;  %v4189_v59 = vadd.f32 1.0, %v4157_v24  ;;  %v10402_v39 = vadd.f32 %v9221_v22, %v4675_v34  ;;  %v4943_v10 = vadd.f32 1.0, %v4911_v11 }
 0x443   : > { %v4745_v12 = vmul.f32 %v4642_v3, %v4642_v3  ;;  %v4811_v27 = vmul.f32 %v9483_v21, %v4642_v3  ;;  %v4451_v6 = vmul.f32 %v6806_v20, %v10395_v30  ;;  %6811 = vrcp.f32 %v10110_v47 }
 0x444   : > { %v4285_v54 = vsel %vm3933_vm0, %v4189_v59, %v4253_v37  ;;  %v3900_v26 = vmul.f32 %v10008_v55, %v10008_v55  ;;  %v10409_v17 = vmax.f32 %v4943_v10, 1e-07  ;;  %v4317_v1 = vmul.f32 %v6806_v20, %v4125_v35 }
 0x445   : > { %v4777_v2 = vmul.f32 %v4745_v12, %v9868_v42  ;;  %v4843_v28 = vmul.f32 %v4811_v27, %v10325_v36  ;;  %vm5061_vm9 = vcmp.eq.f32.partialorder %v10368_v23, inf  ;;  %v4674_v50 = vmul.f32 %v11643_v15, %v4642_v3 }
 0x446   : > { %v4483_v49 = vsub.f32 1.0, %v4285_v54  ;;  %6813 = vrcp.f32 %v10008_v55  ;;  %vm5063_vm10 = vcmp.eq.f32.partialorder %v10368_v23, 0.0  ;;  %v5064_v4 = vand.u32 2147483648, %v10368_v23 }
 0x447   : > { %vm5054_vm11 = vcmp.eq.f32.partialorder %v10384_v57, inf  ;;  %6815 = vrsqrt.f32 %v10409_v17  ;;  %vm5056_vm12 = vcmp.eq.f32.partialorder %v10384_v57, 0.0  ;;  %v4875_v42 = vadd.f32 %v4843_v28, %v4777_v2 }
 0x448   : > { %v4515_v36 = vmul.f32 %v4483_v49, %v4451_v6  ;;  %v3964_v0 = vmul.f32 0.16666667, %v3900_v26  ;;  %v6808_v5 = vpop.eup %6807  ;;  %v5057_v7 = vand.u32 2147483648, %v10384_v57  ;;  %v4580_v43 = vmul.f32 %v9488_v33, %v4317_v1 }
 0x449   : > { %6817 = vrcp.f32 %v10147_v25  ;;  %v3903_v24 = vmul.f32 %v10034_v8, %v10034_v8  ;;  %v5060_v53 = vmul.f32 %v6808_v5, %v10368_v23  ;;  %v10428_v19 = vadd.f32 %v9221_v22, %v4674_v50 }
 0x44a   : > { %v4910_v34 = vadd.f32 %v9535_v63, %v4875_v42  ;;  %v4547_v11 = vmul.f32 %v6806_v20, %v4515_v36  ;;  %vm5075_vm13 = vcmp.eq.f32.partialorder %v10409_v17, inf  ;;  %v5078_v3 = vand.u32 2147483648, %v10409_v17 }
 0x44b   : > { %vm3932_vm15 = vcmp.lt.f32.partialorder %v10008_v55, 0.1  ;;  %v4156_v41 = vmul.f32 0.5, %v3900_v26  ;;  %6819 = vrcp.f32 %v10034_v8  ;;  %v6810_v37 = vpop.eup %6809  ;;  %v5062_v35 = vsel %vm5061_vm9, %v10368_v23, %v5060_v53 }
 0x44c   : > { %vm5077_vm1 = vcmp.eq.f32.partialorder %v10409_v17, 0.0  ;;  %v4942_v59 = vadd.f32 1.0, %v4910_v34  ;;  %v4613_v20 = vmul.f32 %v9218_v40, %v4547_v11  ;;  %v3996_v10 = vadd.f32 1.0, %v3964_v0  ;;  %v10464_v0 = vpop.xlane.xlu0 %4398 }
 0x44d   : > { %v5065_v12 = vsel %vm5063_vm10, %v5064_v4, %v5062_v35  ;;  %v5053_v27 = vmul.f32 %v6810_v37, %v10384_v57  ;;  %v3967_v54 = vmul.f32 0.16666667, %v3903_v24  ;;  %v10445_v6 = vmul.f32 %v10054_v13, %v10054_v13  ;;  %v6812_v26 = vpop.eup %6811 }
 0x44e   : > { %v5234_v2 = vsel %vm5222_vm14, %v5065_v12, %v4712_v9  ;;  %v10449_v28 = vmax.f32 %v4942_v59, 1e-07  ;;  %v10451_v1 = vsub.f32 %v4580_v43, %v4613_v20  ;;  %6821 = vrcp.f32 %v10174_v58 }
 0x44f   : > { %5266 = vst [vmem:[%s9785_s30 + $0x48] sm:$0xff] %v5234_v2  ;;  %v5055_v23 = vsel %vm5054_vm11, %v10384_v57, %v5053_v27  ;;  %v4060_v15 = vsub.f32 %v10110_v47, %v6812_v26  ;;  %v4220_v50 = vadd.f32 %v6812_v26, %v10110_v47  ;;  %v4159_v49 = vmul.f32 0.5, %v3903_v24 }
 0x450   : > { %v6814_v4 = vpop.eup %6813  ;;  %v5058_v9 = vsel %vm5056_vm12, %v5057_v7, %v5055_v23  ;;  %6823 = vrsqrt.f32 %v10449_v28  ;;  %v4028_v42 = vmul.f32 %v3996_v10, %v10008_v55  ;;  %v4188_v36 = vadd.f32 1.0, %v4156_v41  ;;  %v10491_v23 = vpop.xlane.xlu1 %4404 }
 0x451   : > { %v6816_v5 = vpop.eup %6815  ;;  %v5233_v43 = vsel %vm5222_vm14, %v5058_v9, %v10398_v51  ;;  %v4748_v47 = vmul.f32 %v10451_v1, %v10451_v1  ;;  %vm3935_vm2 = vcmp.lt.f32.partialorder %v10034_v8, 0.1  ;;  %v3999_v24 = vadd.f32 1.0, %v3967_v54 }
 0x452   : > { %6825 = vrcp.f32 %v10054_v13  ;;  %5265 = vst [vmem:[%s9785_s30 + $0x40] sm:$0xff] %v5233_v43  ;;  %v5074_v57 = vmul.f32 %v6816_v5, %v10409_v17  ;;  %v4814_v7 = vmul.f32 %v9483_v21, %v10451_v1  ;;  %v4092_v53 = vmul.f32 0.5, %v4060_v15 }
 0x453   : > { %v4252_v34 = vmul.f32 0.5, %v4220_v50  ;;  %v6818_v11 = vpop.eup %6817  ;;  %v4780_v41 = vmul.f32 %v4748_v47, %v9883_v56  ;;  %v4450_v51 = vmul.f32 %v6814_v4, %v10464_v0  ;;  %v4191_v37 = vadd.f32 1.0, %v4159_v49 }
 0x454   : > { %v3966_v35 = vmul.f32 0.16666667, %v10445_v6  ;;  %v5076_v59 = vsel %vm5075_vm13, %v10409_v17, %v5074_v57  ;;  %v4846_v20 = vmul.f32 %v4814_v7, %v10395_v30  ;;  %v4124_v10 = vsel %vm3932_vm15, %v4028_v42, %v4092_v53 }
 0x455   : > { %v4284_v12 = vsel %vm3932_vm15, %v4188_v36, %v4252_v34  ;;  %v6820_v27 = vpop.eup %6819  ;;  %v5079_v56 = vsel %vm5077_vm1, %v5078_v3, %v5076_v59  ;;  %v4316_v54 = vmul.f32 %v6814_v4, %v4124_v10  ;;  %v4063_v2 = vsub.f32 %v10147_v25, %v6818_v11  ;;  %v11644_v59 = vld [vmem:[#allocation10_spill] sm:$0xff] }
 0x456   : > { %v4482_v26 = vsub.f32 1.0, %v4284_v12  ;;  %v5236_v30 = vsel %vm5222_vm14, %v5079_v56, %v10402_v39  ;;  %v4878_v15 = vadd.f32 %v4846_v20, %v4780_v41  ;;  %v4031_v50 = vmul.f32 %v3999_v24, %v10034_v8 }
 0x457   : > { %v4223_v55 = vadd.f32 %v6818_v11, %v10147_v25  ;;  %5268 = vst [vmem:[%s9785_s30 + $0x58] sm:$0xff] %v5236_v30  ;;  %vm5068_vm3 = vcmp.eq.f32.partialorder %v10449_v28, inf  ;;  %vm5070_vm4 = vcmp.eq.f32.partialorder %v10449_v28, 0.0  ;;  %v4095_v3 = vmul.f32 0.5, %v4063_v2 }
 0x458   : > { %v4514_v17 = vmul.f32 %v4482_v26, %v4450_v51  ;;  %vm3934_vm5 = vcmp.lt.f32.partialorder %v10054_v13, 0.1  ;;  %v6822_v49 = vpop.eup %6821  ;;  %v5071_v9 = vand.u32 2147483648, %v10449_v28  ;;  %v4913_v42 = vadd.f32 %v9535_v63, %v4878_v15 }
 0x459   : > { %v4255_v39 = vmul.f32 0.5, %v4223_v55  ;;  %v4453_v36 = vmul.f32 %v6820_v27, %v10491_v23  ;;  %v4579_v5 = vmul.f32 %v9488_v33, %v4316_v54  ;;  %v3998_v43 = vadd.f32 1.0, %v3966_v35 }
 0x45a   : > { %v4546_v25 = vmul.f32 %v6814_v4, %v4514_v17  ;;  %v4062_v47 = vsub.f32 %v10174_v58, %v6822_v49  ;;  %v6824_v24 = vpop.eup %6823  ;;  %vm3654_vm6 = vcmp.eq.f32.partialorder %v10224_v32, 0.0  ;;  %v4945_v57 = vadd.f32 1.0, %v4913_v42 }
 0x45b   : > { %v4287_v7 = vsel %vm3935_vm2, %v4191_v37, %v4255_v39  ;;  %v4158_v53 = vmul.f32 0.5, %v10445_v6  ;;  %v4222_v34 = vadd.f32 %v6822_v49, %v10174_v58  ;;  %v5067_v41 = vmul.f32 %v6824_v24, %v10449_v28  ;;  %v10520_v6 = vpop.xlane.xlu0 %4402 }
 0x45c   : > { %v6826_v11 = vpop.eup %6825  ;;  %v4612_v51 = vmul.f32 %v9218_v40, %v4546_v25  ;;  %v4127_v4 = vsel %vm3935_vm2, %v4031_v50, %v4095_v3  ;;  %v4485_v35 = vsub.f32 1.0, %v4287_v7  ;;  %v4677_v20 = vmul.f32 %v11644_v59, %v10451_v1 }
 0x45d   : > { %v10518_v10 = vmax.f32 %v4945_v57, 1e-07  ;;  %v4094_v37 = vmul.f32 0.5, %v4062_v47  ;;  %v4254_v12 = vmul.f32 0.5, %v4222_v34  ;;  %v5069_v58 = vsel %vm5068_vm3, %v10449_v28, %v5067_v41 }
 0x45e   : > { %v4644_v56 = vsub.f32 %v4579_v5, %v4612_v51  ;;  %v4517_v54 = vmul.f32 %v4485_v35, %v4453_v36  ;;  %v4030_v8 = vmul.f32 %v3998_v43, %v10054_v13  ;;  %v5072_v26 = vsel %vm5070_vm4, %v5071_v9, %v5069_v58 }
 0x45f   : > { %6827 = vrsqrt.f32 %v10518_v10  ;;  %v4319_v1 = vmul.f32 %v6820_v27, %v4127_v4  ;;  %v4190_v2 = vadd.f32 1.0, %v4158_v53  ;;  %v5235_v30 = vsel %vm5222_vm14, %v5072_v26, %v10428_v19  ;;  %v11648_v26 = vld [vmem:[#allocation14_spill] sm:$0xff] }
 0x460   : > { %v4747_v15 = vmul.f32 %v4644_v56, %v4644_v56  ;;  %v4452_v50 = vmul.f32 %v6826_v11, %v10520_v6  ;;  %6829 = vrcp.f32 %v10096_v60  ;;  %5267 = vst [vmem:[%s9785_s30 + $0x50] sm:$0xff] %v5235_v30  ;;  %v4813_v55 = vmul.f32 %v9483_v21, %v4644_v56 }
 0x461   : > { %v4549_v17 = vmul.f32 %v6820_v27, %v4517_v54  ;;  %v4126_v28 = vsel %vm3934_vm5, %v4030_v8, %v4094_v37  ;;  %v4286_v3 = vsel %vm3934_vm5, %v4190_v2, %v4254_v12  ;;  %v10541_v49 = vmax.f32 %v10380_v45, 1e-15  ;;  %v11647_v37 = vld [vmem:[#allocation31_spill] sm:$0xff] }
 0x462   : > { %v4779_v19 = vmul.f32 %v4747_v15, %v9893_v18  ;;  %v4484_v9 = vsub.f32 1.0, %v4286_v3  ;;  %6831 = vrcp.f32 %v10210_v62  ;;  %v4845_v42 = vmul.f32 %v4813_v55, %v10464_v0  ;;  %v11646_v18 = vld [vmem:[#allocation12_spill] sm:$0xff]  ;;  %v10578_v15 = vpop.xlane.xlu1 %4408 }
 0x463   : > { %v4582_v39 = vmul.f32 %v9488_v33, %v4319_v1  ;;  %v4615_v27 = vmul.f32 %v9218_v40, %v4549_v17  ;;  %v3905_v36 = vmul.f32 %v10096_v60, %v10096_v60  ;;  %v11645_v13 = vand.u32 2147483648, %v10224_v32 }
 0x464   : > { %v4676_v5 = vmul.f32 %v11646_v18, %v4644_v56  ;;  %v4318_v25 = vmul.f32 %v6826_v11, %v4126_v28  ;;  %v4516_v43 = vmul.f32 %v4484_v9, %v4452_v50  ;;  %v4716_v0 = vadd.f32 %v9221_v22, %v4677_v20 }
 0x465   : > { %v10555_v45 = vsel %vm3654_vm6, %v11645_v13, %v10391_v61  ;;  %vm5089_vm7 = vcmp.eq.f32.partialorder %v10518_v10, inf  ;;  %v4877_v47 = vadd.f32 %v4845_v42, %v4779_v19  ;;  %v4647_v24 = vsub.f32 %v4582_v39, %v4615_v27 }
 0x466   : > { %vm5091_vm8 = vcmp.eq.f32.partialorder %v10518_v10, 0.0  ;;  %v4548_v57 = vmul.f32 %v6826_v11, %v4516_v43  ;;  %v3969_v7 = vmul.f32 0.16666667, %v3905_v36  ;;  %6833 = vrcp.f32 %v10226_v44 }
 0x467   : > { %v5092_v53 = vand.u32 2147483648, %v10518_v10  ;;  %v4912_v61 = vadd.f32 %v9535_v63, %v4877_v47  ;;  %v4750_v34 = vmul.f32 %v4647_v24, %v4647_v24  ;;  %v4816_v41 = vmul.f32 %v9483_v21, %v4647_v24 }
 0x468   : > { %v10566_v51 = vadd.f32 %v9221_v22, %v4676_v5  ;;  %v4581_v4 = vmul.f32 %v9488_v33, %v4318_v25  ;;  %v4614_v35 = vmul.f32 %v9218_v40, %v4548_v57  ;;  %v3904_v11 = vmul.f32 %v10117_v16, %v10117_v16 }
 0x469   : > { %v6828_v59 = vpop.eup %6827  ;;  %v4944_v20 = vadd.f32 1.0, %v4912_v61  ;;  %v4782_v12 = vmul.f32 %v4750_v34, %v11647_v37  ;;  %v4848_v58 = vmul.f32 %v4816_v41, %v10491_v23  ;;  %v4161_v56 = vmul.f32 0.5, %v3905_v36  ;;  %v11652_v37 = vld [vmem:[#allocation57_spill] sm:$0xff] }
 0x46a   : > { %v10574_v54 = vpop.eup %6829  ;;  %v5088_v8 = vmul.f32 %v6828_v59, %v10518_v10  ;;  %v4679_v1 = vmul.f32 %v11648_v26, %v4647_v24  ;;  %v4646_v2 = vsub.f32 %v4581_v4, %v4614_v35  ;;  %v4001_v30 = vadd.f32 1.0, %v3969_v7  ;;  %v11651_v59 = vld [vmem:[#allocation11_spill] sm:$0xff] }
 0x46b   : > { %v10580_v50 = vmax.f32 %v4944_v20, 1e-07  ;;  %v4880_v55 = vadd.f32 %v4848_v58, %v4782_v12  ;;  %vm3937_vm0 = vcmp.lt.f32.partialorder %v10096_v60, 0.1  ;;  %6835 = vrcp.f32 %v10117_v16 }
 0x46c   : > { %v6832_v23 = vpop.eup %6831  ;;  %v5090_v17 = vsel %vm5089_vm7, %v10518_v10, %v5088_v8  ;;  %v4749_v28 = vmul.f32 %v4646_v2, %v4646_v2  ;;  %v4815_v3 = vmul.f32 %v9483_v21, %v4646_v2  ;;  %v3968_v19 = vmul.f32 0.16666667, %v3904_v11  ;;  %v11649_v10 = vld [vmem:[#allocation29_spill] sm:$0xff] }
 0x46d   : > { %v5093_v9 = vsel %vm5091_vm8, %v5092_v53, %v5090_v17  ;;  %6837 = vrsqrt.f32 %v10580_v50  ;;  %v4193_v42 = vadd.f32 1.0, %v4161_v56  ;;  %v4455_v39 = vmul.f32 %v10574_v54, %v10578_v15  ;;  %v11650_v53 = vld [vmem:[#allocation46_spill] sm:$0xff] }
 0x46e   : > { %vm3936_vm9 = vcmp.lt.f32.partialorder %v10117_v16, 0.1  ;;  %v5238_v27 = vsel %vm5222_vm14, %v5093_v9, %v4716_v0  ;;  %v10597_v36 = vadd.f32 %v9221_v22, %v4679_v1  ;;  %v4915_v13 = vadd.f32 %v9535_v63, %v4880_v55 }
 0x46f   : > { %v4033_v18 = vmul.f32 %v4001_v30, %v10096_v60  ;;  %5270 = vst [vmem:[%s9785_s30 + $0x68] sm:$0xff] %v5238_v27  ;;  %v4781_v5 = vmul.f32 %v4749_v28, %v11649_v10  ;;  %v4847_v25 = vmul.f32 %v4815_v3, %v10520_v6  ;;  %v4065_v43 = vsub.f32 %v10210_v62, %v6832_v23  ;;  %v10625_v30 = vpop.xlane.xlu0 %4406 }
 0x470   : > { %v4225_v47 = vadd.f32 %v6832_v23, %v10210_v62  ;;  %v6834_v24 = vpop.eup %6833  ;;  %v4947_v57 = vadd.f32 1.0, %v4915_v13  ;;  %v4000_v7 = vadd.f32 1.0, %v3968_v19  ;;  %v4160_v0 = vmul.f32 0.5, %v3904_v11 }
 0x471   : > { %6839 = vrcp.f32 %v11650_v53  ;;  %v4879_v61 = vadd.f32 %v4847_v25, %v4781_v5  ;;  %v4097_v34 = vmul.f32 0.5, %v4065_v43  ;;  %v4064_v4 = vsub.f32 %v10226_v44, %v6834_v24 }
 0x472   : > { %v4257_v41 = vmul.f32 0.5, %v4225_v47  ;;  %v10608_v35 = vmax.f32 %v4947_v57, 1e-07  ;;  %v4678_v20 = vmul.f32 %v11651_v59, %v4646_v2  ;;  %v4224_v6 = vadd.f32 %v6834_v24, %v10226_v44 }
 0x473   : > { %6841 = vrcp.f32 %v11652_v37  ;;  %v4914_v62 = vadd.f32 %v9535_v63, %v4879_v61  ;;  %v4096_v12 = vmul.f32 0.5, %v4064_v4  ;;  %v3907_v58 = vmul.f32 %v11650_v53, %v11650_v53  ;;  %v11653_v4 = vld [vmem:[#allocation59_spill] sm:$0xff] }
 0x474   : > { %v4289_v11 = vsel %vm3937_vm0, %v4193_v42, %v4257_v41  ;;  %vm5082_vm10 = vcmp.eq.f32.partialorder %v10580_v50, inf  ;;  %6843 = vrsqrt.f32 %v10608_v35  ;;  %v4129_v56 = vsel %vm3937_vm0, %v4033_v18, %v4097_v34 }
 0x475   : > { %v4032_v44 = vmul.f32 %v4000_v7, %v10117_v16  ;;  %v6836_v8 = vpop.eup %6835  ;;  %vm5084_vm11 = vcmp.eq.f32.partialorder %v10580_v50, 0.0  ;;  %v5085_v26 = vand.u32 2147483648, %v10580_v50  ;;  %v4946_v1 = vadd.f32 1.0, %v4914_v62 }
 0x476   : > { %v4487_v2 = vsub.f32 1.0, %v4289_v11  ;;  %v10628_v55 = vadd.f32 %v9221_v22, %v4678_v20  ;;  %v4192_v17 = vadd.f32 1.0, %v4160_v0  ;;  %v4256_v60 = vmul.f32 0.5, %v4224_v6  ;;  %v11654_v20 = vld [vmem:[#allocation47_spill] sm:$0xff] }
 0x477   : > { %v4128_v23 = vsel %vm3936_vm9, %v4032_v44, %v4096_v12  ;;  %v6838_v28 = vpop.eup %6837  ;;  %v10632_v3 = vmax.f32 %v4946_v1, 1e-07  ;;  %v4321_v19 = vmul.f32 %v10574_v54, %v4129_v56  ;;  %v3971_v42 = vmul.f32 0.16666667, %v3907_v58 }
 0x478   : > { %v4519_v9 = vmul.f32 %v4487_v2, %v4455_v39  ;;  %v5081_v27 = vmul.f32 %v6838_v28, %v10580_v50  ;;  %vm5103_vm12 = vcmp.eq.f32.partialorder %v10608_v35, inf  ;;  %v4288_v13 = vsel %vm3936_vm9, %v4192_v17, %v4256_v60 }
 0x479   : > { %v4454_v18 = vmul.f32 %v6836_v8, %v10625_v30  ;;  %vm5105_vm13 = vcmp.eq.f32.partialorder %v10608_v35, 0.0  ;;  %v5106_v10 = vand.u32 2147483648, %v10608_v35  ;;  %6845 = vrsqrt.f32 %v10632_v3 }
 0x47a   : > { %v4320_v5 = vmul.f32 %v6836_v8, %v4128_v23  ;;  %v5083_v39 = vsel %vm5082_vm10, %v10580_v50, %v5081_v27  ;;  %v4551_v43 = vmul.f32 %v10574_v54, %v4519_v9  ;;  %v4486_v16 = vsub.f32 1.0, %v4288_v13 }
 0x47b   : > { %v10643_v25 = vpop.eup %6839  ;;  %vm3939_vm15 = vcmp.lt.f32.partialorder %v11650_v53, 0.1  ;;  %v5086_v47 = vsel %vm5084_vm11, %v5085_v26, %v5083_v39  ;;  %v4584_v24 = vmul.f32 %v9488_v33, %v4321_v19  ;;  %v4003_v57 = vadd.f32 1.0, %v3971_v42  ;;  %v10667_v26 = vpop.xlane.xlu1 %4412  ;;  %v11655_v19 = vld [vmem:[#allocation38_spill] sm:$0xff] }
 0x47c   : > { %v4163_v7 = vmul.f32 0.5, %v3907_v58  ;;  %v5237_v61 = vsel %vm5222_vm14, %v5086_v47, %v10566_v51  ;;  %v4617_v34 = vmul.f32 %v9218_v40, %v4551_v43  ;;  %v4518_v41 = vmul.f32 %v4486_v16, %v4454_v18 }
 0x47d   : > { %v6842_v0 = vpop.eup %6841  ;;  %6847 = vrcp.f32 %v11653_v4  ;;  %5269 = vst [vmem:[%s9785_s30 + $0x60] sm:$0xff] %v5237_v61  ;;  %v4583_v54 = vmul.f32 %v9488_v33, %v4320_v5  ;;  %v3906_v6 = vmul.f32 %v11654_v20, %v11654_v20  ;;  %vm5096_vm1 = vcmp.eq.f32.partialorder %v10632_v3, inf }
 0x47e   : > { %v4067_v50 = vsub.f32 %v11652_v37, %v6842_v0  ;;  %v4227_v59 = vadd.f32 %v6842_v0, %v11652_v37  ;;  %v6844_v62 = vpop.eup %6843  ;;  %vm5098_vm2 = vcmp.eq.f32.partialorder %v10632_v3, 0.0  ;;  %v4649_v51 = vsub.f32 %v4584_v24, %v4617_v34 }
 0x47f   : > { %v4550_v11 = vmul.f32 %v6836_v8, %v4518_v41  ;;  %v5102_v12 = vmul.f32 %v6844_v62, %v10608_v35  ;;  %v4195_v56 = vadd.f32 1.0, %v4163_v7  ;;  %v4035_v23 = vmul.f32 %v4003_v57, %v11650_v53 }
 0x480   : > { %v4099_v58 = vmul.f32 0.5, %v4067_v50  ;;  %v4259_v44 = vmul.f32 0.5, %v4227_v59  ;;  %v4752_v1 = vmul.f32 %v4649_v51, %v4649_v51  ;;  %v4818_v37 = vmul.f32 %v9483_v21, %v4649_v51 }
 0x481   : > { %v4616_v2 = vmul.f32 %v9218_v40, %v4550_v11  ;;  %v5104_v17 = vsel %vm5103_vm12, %v10608_v35, %v5102_v12  ;;  %6849 = vrcp.f32 %v11654_v20  ;;  %v3970_v60 = vmul.f32 0.16666667, %v3906_v6 }
 0x482   : > { %v4291_v8 = vsel %vm3939_vm15, %v4195_v56, %v4259_v44  ;;  %v5107_v28 = vsel %vm5105_vm13, %v5106_v10, %v5104_v17  ;;  %v4784_v9 = vmul.f32 %v4752_v1, %v11655_v19  ;;  %v4850_v42 = vmul.f32 %v4818_v37, %v10578_v15  ;;  %v11656_v15 = vld [vmem:[#allocation49_spill] sm:$0xff]  ;;  %v11658_v44 = vld [vmem:[#allocation16_spill] sm:$0xff] }
 0x483   : > { %v4457_v27 = vmul.f32 %v10643_v25, %v10667_v26  ;;  %v6846_v13 = vpop.eup %6845  ;;  %v5240_v18 = vsel %vm5222_vm14, %v5107_v28, %v10597_v36  ;;  %v5099_v5 = vand.u32 2147483648, %v10632_v3  ;;  %v4648_v39 = vsub.f32 %v4583_v54, %v4616_v2  ;;  %v11657_v54 = vld [vmem:[#allocation32_spill] sm:$0xff]  ;;  %v10714_v2 = vpop.xlane.xlu0 %4410 }
 0x484   : > { %v4131_v43 = vsel %vm3939_vm15, %v4035_v23, %v4099_v58  ;;  %5272 = vst [vmem:[%s9785_s30 + $0x78] sm:$0xff] %v5240_v18  ;;  %v5095_v35 = vmul.f32 %v6846_v13, %v10632_v3  ;;  %v4882_v10 = vadd.f32 %v4850_v42, %v4784_v9  ;;  %v4489_v16 = vsub.f32 1.0, %v4291_v8  ;;  %v11659_v23 = vld [vmem:[#allocation60_spill] sm:$0xff] }
 0x485   : > { %vm3938_vm3 = vcmp.lt.f32.partialorder %v11654_v20, 0.1  ;;  %6851 = vrcp.f32 %v11656_v15  ;;  %v4751_v47 = vmul.f32 %v4648_v39, %v4648_v39  ;;  %v4817_v24 = vmul.f32 %v9483_v21, %v4648_v39 }
 0x486   : > { %v4002_v36 = vadd.f32 1.0, %v3970_v60  ;;  %v3909_v57 = vmul.f32 %v11656_v15, %v11656_v15  ;;  %v5097_v53 = vsel %vm5096_vm1, %v10632_v3, %v5095_v35  ;;  %v4917_v0 = vadd.f32 %v9535_v63, %v4882_v10 }
 0x487   : > { %v6848_v7 = vpop.eup %6847  ;;  %v4323_v61 = vmul.f32 %v10643_v25, %v4131_v43  ;;  %v4521_v34 = vmul.f32 %v4489_v16, %v4457_v27  ;;  %v5100_v41 = vsel %vm5098_vm2, %v5099_v5, %v5097_v53  ;;  %v4783_v50 = vmul.f32 %v4751_v47, %v11657_v54 }
 0x488   : > { %v4849_v59 = vmul.f32 %v4817_v24, %v10625_v30  ;;  %v4162_v62 = vmul.f32 0.5, %v3906_v6  ;;  %v5239_v11 = vsel %vm5222_vm14, %v5100_v41, %v10628_v55  ;;  %v4949_v12 = vadd.f32 1.0, %v4917_v0  ;;  %v10752_v41 = vpop.xlane.xlu1 %4416 }
 0x489   : > { %v4553_v58 = vmul.f32 %v10643_v25, %v4521_v34  ;;  %v4066_v56 = vsub.f32 %v11653_v4, %v6848_v7  ;;  %5271 = vst [vmem:[%s9785_s30 + $0x70] sm:$0xff] %v5239_v11  ;;  %v4681_v1 = vmul.f32 %v11658_v44, %v4649_v51  ;;  %v4226_v3 = vadd.f32 %v6848_v7, %v11653_v4  ;;  %v11660_v4 = vld [vmem:[#allocation13_spill] sm:$0xff] }
 0x48a   : > { %v4881_v37 = vadd.f32 %v4849_v59, %v4783_v50  ;;  %6853 = vrcp.f32 %v11659_v23  ;;  %v10717_v30 = vmax.f32 %v4949_v12, 1e-07  ;;  %v4034_v55 = vmul.f32 %v4002_v36, %v11654_v20  ;;  %v11662_v59 = vld [vmem:[#allocation18_spill] sm:$0xff] }
 0x48b   : > { %v4619_v6 = vmul.f32 %v9218_v40, %v4553_v58  ;;  %v4098_v17 = vmul.f32 0.5, %v4066_v56  ;;  %v6850_v25 = vpop.eup %6849  ;;  %v4586_v60 = vmul.f32 %v9488_v33, %v4323_v61  ;;  %v4194_v51 = vadd.f32 1.0, %v4162_v62 }
 0x48c   : > { %v4916_v8 = vadd.f32 %v9535_v63, %v4881_v37  ;;  %v4258_v28 = vmul.f32 0.5, %v4226_v3  ;;  %6855 = vrsqrt.f32 %v10717_v30  ;;  %v4680_v19 = vmul.f32 %v11660_v4, %v4648_v39  ;;  %v11663_v3 = vld [vmem:[#allocation61_spill] sm:$0xff] }
 0x48d   : > { %v4456_v9 = vmul.f32 %v6850_v25, %v10714_v2  ;;  %v3973_v42 = vmul.f32 0.16666667, %v3909_v57  ;;  %v4651_v13 = vsub.f32 %v4586_v60, %v4619_v6  ;;  %v4130_v18 = vsel %vm3938_vm3, %v4034_v55, %v4098_v17  ;;  %v11664_v6 = vld [vmem:[#allocation50_spill] sm:$0xff] }
 0x48e   : > { %v4948_v27 = vadd.f32 1.0, %v4916_v8  ;;  %v4290_v5 = vsel %vm3938_vm3, %v4194_v51, %v4258_v28  ;;  %6857 = vpow2.f32 %v10374_v48  ;;  %v10734_v35 = vmax.f32 %v10555_v45, 1e-15 }
 0x48f   : > { %v10730_v43 = vpop.eup %6851  ;;  %v4488_v10 = vsub.f32 1.0, %v4290_v5  ;;  %v4165_v39 = vmul.f32 0.5, %v3909_v57  ;;  %v4754_v47 = vmul.f32 %v4651_v13, %v4651_v13  ;;  %v4820_v24 = vmul.f32 %v9483_v21, %v4651_v13  ;;  %v11661_v57 = vld [vmem:[#allocation33_spill] sm:$0xff]  ;;  %v11665_v5 = vld [vmem:[#allocation52_spill] sm:$0xff] }
 0x490   : > { %v10736_v16 = vmax.f32 %v4948_v27, 1e-07  ;;  %v4322_v36 = vmul.f32 %v6850_v25, %v4130_v18  ;;  %v10740_v7 = vmul.f32 1.442695, %v10541_v49  ;;  %v4720_v20 = vadd.f32 %v9221_v22, %v4681_v1 }
 0x491   : > { %v10744_v53 = vadd.f32 %v9221_v22, %v4680_v19  ;;  %v4520_v48 = vmul.f32 %v4488_v10, %v4456_v9  ;;  %vm5117_vm4 = vcmp.eq.f32.partialorder %v10717_v30, inf  ;;  %vm3941_vm5 = vcmp.lt.f32.partialorder %v11656_v15, 0.1 }
 0x492   : > { %6859 = vrsqrt.f32 %v10736_v16  ;;  %v4005_v45 = vadd.f32 1.0, %v3973_v42  ;;  %vm5119_vm6 = vcmp.eq.f32.partialorder %v10717_v30, 0.0  ;;  %v4786_v0 = vmul.f32 %v4754_v47, %v11661_v57 }
 0x493   : > { %v4852_v61 = vmul.f32 %v4820_v24, %v10667_v26  ;;  %v4552_v34 = vmul.f32 %v6850_v25, %v4520_v48  ;;  %v5120_v50 = vand.u32 2147483648, %v10717_v30  ;;  %v4683_v62 = vmul.f32 %v11662_v59, %v4651_v13  ;;  %v11666_v24 = vld [vmem:[#allocation34_spill] sm:$0xff] }
 0x494   : > { %v6854_v54 = vpop.eup %6853  ;;  %v4585_v11 = vmul.f32 %v9488_v33, %v4322_v36  ;;  %v4197_v12 = vadd.f32 1.0, %v4165_v39  ;;  %v4037_v26 = vmul.f32 %v4005_v45, %v11656_v15  ;;  %v4459_v37 = vmul.f32 %v10730_v43, %v10752_v41 }
 0x495   : > { %v4884_v58 = vadd.f32 %v4852_v61, %v4786_v0  ;;  %v4618_v56 = vmul.f32 %v9218_v40, %v4552_v34  ;;  %v4069_v44 = vsub.f32 %v11659_v23, %v6854_v54  ;;  %v4229_v1 = vadd.f32 %v6854_v54, %v11659_v23 }
 0x496   : > { %6861 = vrcp.f32 %v11663_v3  ;;  %v3908_v55 = vmul.f32 %v11664_v6, %v11664_v6  ;;  %v6856_v17 = vpop.eup %6855  ;;  %vm5110_vm7 = vcmp.eq.f32.partialorder %v10736_v16, inf  ;;  %vm5112_vm8 = vcmp.eq.f32.partialorder %v10736_v16, 0.0 }
 0x497   : > { %v4919_v25 = vadd.f32 %v9535_v63, %v4884_v58  ;;  %v4650_v8 = vsub.f32 %v4585_v11, %v4618_v56  ;;  %v4101_v60 = vmul.f32 0.5, %v4069_v44  ;;  %v4261_v51 = vmul.f32 0.5, %v4229_v1  ;;  %v11668_v58 = vld [vmem:[#allocation62_spill] sm:$0xff] }
 0x498   : > { %v5116_v28 = vmul.f32 %v6856_v17, %v10717_v30  ;;  %v5113_v23 = vand.u32 2147483648, %v10736_v16  ;;  %v10771_v4 = vpop.eup %6857  ;;  %6863 = vrcp.f32 %v11664_v6  ;;  %v3972_v18 = vmul.f32 0.16666667, %v3908_v55 }
 0x499   : > { %v4951_v19 = vadd.f32 1.0, %v4919_v25  ;;  %v4753_v9 = vmul.f32 %v4650_v8, %v4650_v8  ;;  %v4819_v42 = vmul.f32 %v9483_v21, %v4650_v8  ;;  %v4293_v13 = vsel %vm3941_vm5, %v4197_v12, %v4261_v51 }
 0x49a   : > { %v5118_v27 = vsel %vm5117_vm4, %v10717_v30, %v5116_v28  ;;  %v3911_v10 = vmul.f32 %v11665_v5, %v11665_v5  ;;  %v4133_v48 = vsel %vm3941_vm5, %v4037_v26, %v4101_v60  ;;  %v4491_v61 = vsub.f32 1.0, %v4293_v13  ;;  %v11669_v13 = vld [vmem:[#allocation63_spill] sm:$0xff] }
 0x49b   : > { %v5121_v39 = vsel %vm5119_vm6, %v5120_v50, %v5118_v27  ;;  %v10784_v47 = vmax.f32 %v4951_v19, 1e-07  ;;  %v4785_v36 = vmul.f32 %v4753_v9, %v11666_v24  ;;  %v4851_v0 = vmul.f32 %v4819_v42, %v10714_v2  ;;  %v10822_v9 = vpop.xlane.xlu0 %4414 }
 0x49c   : > { %v6860_v45 = vpop.eup %6859  ;;  %v5242_v57 = vsel %vm5222_vm14, %v5121_v39, %v4720_v20  ;;  %6865 = vrcp.f32 %v11665_v5  ;;  %v10796_v34 = vadd.f32 %v9221_v22, %v4683_v62  ;;  %v4164_v54 = vmul.f32 0.5, %v3908_v55  ;;  %v11667_v20 = vld [vmem:[#allocation15_spill] sm:$0xff]  ;;  %v10833_v39 = vpop.xlane.xlu1 %4420 }
 0x49d   : > { %5274 = vst [vmem:[%s9785_s30 + $0x88] sm:$0xff] %v5242_v57  ;;  %v5109_v30 = vmul.f32 %v6860_v45, %v10736_v16  ;;  %6867 = vrsqrt.f32 %v10784_v47  ;;  %v4883_v15 = vadd.f32 %v4851_v0, %v4785_v36  ;;  %v4325_v50 = vmul.f32 %v10730_v43, %v4133_v48 }
 0x49e   : > { %v4523_v59 = vmul.f32 %v4491_v61, %v4459_v37  ;;  %vm3940_vm0 = vcmp.lt.f32.partialorder %v11664_v6, 0.1  ;;  %v4682_v11 = vmul.f32 %v11667_v20, %v4650_v8  ;;  %v4004_v12 = vadd.f32 1.0, %v3972_v18  ;;  %v11671_v20 = vld [vmem:[#allocation39_spill] sm:$0xff] }
 0x49f   : > { %v5111_v2 = vsel %vm5110_vm7, %v10736_v16, %v5109_v30  ;;  %6869 = vrcp.f32 %v11668_v58  ;;  %v4918_v44 = vadd.f32 %v9535_v63, %v4883_v15  ;;  %v3975_v26 = vmul.f32 0.16666667, %v3911_v10  ;;  %v11670_v30 = vld [vmem:[#allocation53_spill] sm:$0xff] }
 0x4a0   : > { %v6862_v62 = vpop.eup %6861  ;;  %v5114_v56 = vsel %vm5112_vm8, %v5113_v23, %v5111_v2  ;;  %v4555_v1 = vmul.f32 %v10730_v43, %v4523_v59  ;;  %v4196_v17 = vadd.f32 1.0, %v4164_v54  ;;  %v4588_v60 = vmul.f32 %v9488_v33, %v4325_v50 }
 0x4a1   : > { %v5241_v37 = vsel %vm5222_vm14, %v5114_v56, %v10744_v53  ;;  %v4068_v55 = vsub.f32 %v11663_v3, %v6862_v62  ;;  %v4228_v25 = vadd.f32 %v6862_v62, %v11663_v3  ;;  %v4950_v8 = vadd.f32 1.0, %v4918_v44  ;;  %v11672_v56 = vld [vmem:[#allocation54_spill] sm:$0xff] }
 0x4a2   : > { %5273 = vst [vmem:[%s9785_s30 + $0x80] sm:$0xff] %v5241_v37  ;;  %v4621_v16 = vmul.f32 %v9218_v40, %v4555_v1  ;;  %v4167_v51 = vmul.f32 0.5, %v3911_v10  ;;  %v6864_v28 = vpop.eup %6863  ;;  %v10819_v43 = vadd.f32 %v9221_v22, %v4682_v11  ;;  %v4036_v23 = vmul.f32 %v4004_v12, %v11664_v6 }
 0x4a3   : > { %v4100_v19 = vmul.f32 0.5, %v4068_v55  ;;  %v4260_v53 = vmul.f32 0.5, %v4228_v25  ;;  %v10824_v42 = vmax.f32 %v4950_v8, 1e-07  ;;  %v4007_v27 = vadd.f32 1.0, %v3975_v26 }
 0x4a4   : > { %v4653_v3 = vsub.f32 %v4588_v60, %v4621_v16  ;;  %6871 = vrcp.f32 %v11669_v13  ;;  %vm5131_vm9 = vcmp.eq.f32.partialorder %v10784_v47, inf  ;;  %vm5133_vm10 = vcmp.eq.f32.partialorder %v10784_v47, 0.0 }
 0x4a5   : > { %v5134_v18 = vand.u32 2147483648, %v10784_v47  ;;  %v4292_v10 = vsel %vm3940_vm0, %v4196_v17, %v4260_v53  ;;  %vm3943_vm11 = vcmp.lt.f32.partialorder %v11665_v5, 0.1  ;;  %6873 = vrsqrt.f32 %v10824_v42 }
 0x4a6   : > { %v10835_v24 = vpop.eup %6865  ;;  %v4132_v36 = vsel %vm3940_vm0, %v4036_v23, %v4100_v19  ;;  %v4458_v48 = vmul.f32 %v6864_v28, %v10822_v9  ;;  %v4199_v45 = vadd.f32 1.0, %v4167_v51  ;;  %v4756_v0 = vmul.f32 %v4653_v3, %v4653_v3  ;;  %v11673_v51 = vld [vmem:[#allocation20_spill] sm:$0xff] }
 0x4a7   : > { %v6868_v57 = vpop.eup %6867  ;;  %v4822_v61 = vmul.f32 %v9483_v21, %v4653_v3  ;;  %6875 = vrcp.f32 %v11670_v30  ;;  %v3910_v54 = vmul.f32 %v11670_v30, %v11670_v30  ;;  %v4490_v50 = vsub.f32 1.0, %v4292_v10 }
 0x4a8   : > { %v5130_v15 = vmul.f32 %v6868_v57, %v10784_v47  ;;  %v4039_v59 = vmul.f32 %v4007_v27, %v11665_v5  ;;  %v4461_v6 = vmul.f32 %v10835_v24, %v10833_v39  ;;  %v4788_v11 = vmul.f32 %v4756_v0, %v11671_v20 }
 0x4a9   : > { %v6870_v2 = vpop.eup %6869  ;;  %v4854_v12 = vmul.f32 %v4822_v61, %v10752_v41  ;;  %v4324_v62 = vmul.f32 %v6864_v28, %v4132_v36  ;;  %6877 = vrcp.f32 %v11672_v56  ;;  %vm5124_vm12 = vcmp.eq.f32.partialorder %v10824_v42, inf }
 0x4aa   : > { %v5132_v44 = vsel %vm5131_vm9, %v10784_v47, %v5130_v15  ;;  %v4522_v1 = vmul.f32 %v4490_v50, %v4458_v48  ;;  %v4071_v26 = vsub.f32 %v11668_v58, %v6870_v2  ;;  %v4231_v37 = vadd.f32 %v6870_v2, %v11668_v58  ;;  %v11674_v47 = vld [vmem:[#allocation65_spill] sm:$0xff] }
 0x4ab   : > { %v5135_v55 = vsel %vm5133_vm10, %v5134_v18, %v5132_v44  ;;  %vm5126_vm13 = vcmp.eq.f32.partialorder %v10824_v42, 0.0  ;;  %v4886_v41 = vadd.f32 %v4854_v12, %v4788_v11  ;;  %v3974_v17 = vmul.f32 0.16666667, %v3910_v54  ;;  %v10884_v11 = vpop.xlane.xlu0 %4418 }
 0x4ac   : > { %v5244_v25 = vsel %vm5222_vm14, %v5135_v55, %v10796_v34  ;;  %v4554_v8 = vmul.f32 %v6864_v28, %v4522_v1  ;;  %v4103_v60 = vmul.f32 0.5, %v4071_v26  ;;  %v4263_v16 = vmul.f32 0.5, %v4231_v37  ;;  %v11675_v55 = vld [vmem:[#allocation40_spill] sm:$0xff] }
 0x4ad   : > { %5276 = vst [vmem:[%s9785_s30 + $0x98] sm:$0xff] %v5244_v25  ;;  %v4685_v23 = vmul.f32 %v11673_v51, %v4653_v3  ;;  %v4921_v19 = vadd.f32 %v9535_v63, %v4886_v41  ;;  %v4587_v58 = vmul.f32 %v9488_v33, %v4324_v62  ;;  %vm3942_vm15 = vcmp.lt.f32.partialorder %v11670_v30, 0.1 }
 0x4ae   : > { %6879 = vrcp.f32 %v11674_v47  ;;  %v6872_v53 = vpop.eup %6871  ;;  %v4620_v27 = vmul.f32 %v9218_v40, %v4554_v8  ;;  %v4135_v34 = vsel %vm3943_vm11, %v4039_v59, %v4103_v60  ;;  %v4295_v28 = vsel %vm3943_vm11, %v4199_v45, %v4263_v16 }
 0x4af   : > { %v3913_v3 = vmul.f32 %v11672_v56, %v11672_v56  ;;  %v4953_v18 = vadd.f32 1.0, %v4921_v19  ;;  %v4493_v10 = vsub.f32 1.0, %v4295_v28  ;;  %v4070_v36 = vsub.f32 %v11669_v13, %v6872_v53  ;;  %v6874_v57 = vpop.eup %6873 }
 0x4b0   : > { %v4166_v48 = vmul.f32 0.5, %v3910_v54  ;;  %v5127_v0 = vand.u32 2147483648, %v10824_v42  ;;  %v4652_v61 = vsub.f32 %v4587_v58, %v4620_v27  ;;  %v4327_v15 = vmul.f32 %v10835_v24, %v4135_v34 }
 0x4b1   : > { %v4006_v50 = vadd.f32 1.0, %v3974_v17  ;;  %v6876_v2 = vpop.eup %6875  ;;  %v5123_v59 = vmul.f32 %v6874_v57, %v10824_v42  ;;  %v10881_v5 = vmax.f32 %v4953_v18, 1e-07  ;;  %v4525_v45 = vmul.f32 %v4493_v10, %v4461_v6 }
 0x4b2   : > { %v4230_v20 = vadd.f32 %v6872_v53, %v11669_v13  ;;  %v4755_v12 = vmul.f32 %v4652_v61, %v4652_v61  ;;  %v4821_v54 = vmul.f32 %v9483_v21, %v4652_v61  ;;  %v4102_v62 = vmul.f32 0.5, %v4070_v36  ;;  %v11676_v53 = vld [vmem:[#allocation17_spill] sm:$0xff] }
 0x4b3   : > { %v3977_v44 = vmul.f32 0.16666667, %v3913_v3  ;;  %v10887_v1 = vpop.eup %6877  ;;  %v5125_v26 = vsel %vm5124_vm12, %v10824_v42, %v5123_v59  ;;  %v10893_v37 = vadd.f32 %v9221_v22, %v4685_v23  ;;  %6881 = vrsqrt.f32 %v10881_v5 }
 0x4b4   : > { %v4198_v13 = vadd.f32 1.0, %v4166_v48  ;;  %v5128_v6 = vsel %vm5126_vm13, %v5127_v0, %v5125_v26  ;;  %v4787_v41 = vmul.f32 %v4755_v12, %v11675_v55  ;;  %v4038_v17 = vmul.f32 %v4006_v50, %v11670_v30 }
 0x4b5   : > { %v4460_v25 = vmul.f32 %v6876_v2, %v10884_v11  ;;  %v5243_v8 = vsel %vm5222_vm14, %v5128_v6, %v10819_v43  ;;  %v4853_v60 = vmul.f32 %v4821_v54, %v10822_v9  ;;  %v4557_v16 = vmul.f32 %v10835_v24, %v4525_v45  ;;  %v10923_v45 = vpop.xlane.xlu1 %4424 }
 0x4b6   : > { %vm3945_vm1 = vcmp.lt.f32.partialorder %v11672_v56, 0.1  ;;  %5275 = vst [vmem:[%s9785_s30 + $0x90] sm:$0xff] %v5243_v8  ;;  %v4590_v42 = vmul.f32 %v9488_v33, %v4327_v15  ;;  %v4134_v51 = vsel %vm3942_vm15, %v4038_v17, %v4102_v62  ;;  %v4262_v23 = vmul.f32 0.5, %v4230_v20  ;;  %v11677_v15 = vld [vmem:[#allocation66_spill] sm:$0xff]  ;;  %v11678_v20 = vld [vmem:[#allocation55_spill] sm:$0xff] }
 0x4b7   : > { %v4009_v19 = vadd.f32 1.0, %v3977_v44  ;;  %vm5145_vm2 = vcmp.eq.f32.partialorder %v10881_v5, inf  ;;  %v4684_v27 = vmul.f32 %v11676_v53, %v4652_v61  ;;  %v4885_v43 = vadd.f32 %v4853_v60, %v4787_v41 }
 0x4b8   : > { %v6880_v58 = vpop.eup %6879  ;;  %v4623_v9 = vmul.f32 %v9218_v40, %v4557_v16  ;;  %vm5147_vm3 = vcmp.eq.f32.partialorder %v10881_v5, 0.0  ;;  %v4294_v24 = vsel %vm3942_vm15, %v4198_v13, %v4262_v23  ;;  %v4169_v28 = vmul.f32 0.5, %v3913_v3 }
 0x4b9   : > { %v4073_v34 = vsub.f32 %v11674_v47, %v6880_v58  ;;  %v4920_v18 = vadd.f32 %v9535_v63, %v4885_v43  ;;  %v4326_v36 = vmul.f32 %v6876_v2, %v4134_v51  ;;  %v4041_v48 = vmul.f32 %v4009_v19, %v11672_v56 }
 0x4ba   : > { %v4655_v10 = vsub.f32 %v4590_v42, %v4623_v9  ;;  %v4492_v57 = vsub.f32 1.0, %v4294_v24  ;;  %v4233_v61 = vadd.f32 %v6880_v58, %v11674_v47  ;;  %6883 = vrcp.f32 %v11677_v15  ;;  %v11679_v47 = vld [vmem:[#allocation35_spill] sm:$0xff] }
 0x4bb   : > { %v4105_v0 = vmul.f32 0.5, %v4073_v34  ;;  %v4952_v50 = vadd.f32 1.0, %v4920_v18  ;;  %6885 = vrcp.f32 %v11678_v20  ;;  %v4201_v54 = vadd.f32 1.0, %v4169_v28  ;;  %v11680_v18 = vld [vmem:[#allocation22_spill] sm:$0xff] }
 0x4bc   : > { %v4758_v59 = vmul.f32 %v4655_v10, %v4655_v10  ;;  %v4824_v30 = vmul.f32 %v9483_v21, %v4655_v10  ;;  %v4524_v3 = vmul.f32 %v4492_v57, %v4460_v25  ;;  %v4265_v62 = vmul.f32 0.5, %v4233_v61 }
 0x4bd   : > { %v4137_v12 = vsel %vm3945_vm1, %v4041_v48, %v4105_v0  ;;  %v6882_v44 = vpop.eup %6881  ;;  %v10928_v26 = vmax.f32 %v4952_v50, 1e-07  ;;  %v3912_v55 = vmul.f32 %v11678_v20, %v11678_v20  ;;  %v4463_v8 = vmul.f32 %v10887_v1, %v10923_v45 }
 0x4be   : > { %v4790_v13 = vmul.f32 %v4758_v59, %v11679_v47  ;;  %v4856_v6 = vmul.f32 %v4824_v30, %v10833_v39  ;;  %v5144_v41 = vmul.f32 %v6882_v44, %v10881_v5  ;;  %v4556_v17 = vmul.f32 %v6876_v2, %v4524_v3 }
 0x4bf   : > { %v4297_v25 = vsel %vm3945_vm1, %v4201_v54, %v4265_v62  ;;  %v5148_v60 = vand.u32 2147483648, %v10881_v5  ;;  %6887 = vrsqrt.f32 %v10928_v26  ;;  %v4589_v16 = vmul.f32 %v9488_v33, %v4326_v36 }
 0x4c0   : > { %v4329_v39 = vmul.f32 %v10887_v1, %v4137_v12  ;;  %v5146_v42 = vsel %vm5145_vm2, %v10881_v5, %v5144_v41  ;;  %v4888_v2 = vadd.f32 %v4856_v6, %v4790_v13  ;;  %v4622_v56 = vmul.f32 %v9218_v40, %v4556_v17  ;;  %v10963_v12 = vpop.xlane.xlu0 %4422 }
 0x4c1   : > { %v4495_v51 = vsub.f32 1.0, %v4297_v25  ;;  %v3820_v23 = vmul.f32 1.442695, %v10734_v35  ;;  %v5149_v19 = vsel %vm5147_vm3, %v5148_v60, %v5146_v42  ;;  %v3976_v58 = vmul.f32 0.16666667, %v3912_v55 }
 0x4c2   : > { %v4168_v53 = vmul.f32 0.5, %v3912_v55  ;;  %v5246_v43 = vsel %vm5222_vm14, %v5149_v19, %v10893_v37  ;;  %v4923_v9 = vadd.f32 %v9535_v63, %v4888_v2  ;;  %v4654_v24 = vsub.f32 %v4589_v16, %v4622_v56  ;;  %v11682_v16 = vld [vmem:[#allocation56_spill] sm:$0xff] }
 0x4c3   : > { %v4527_v34 = vmul.f32 %v4495_v51, %v4463_v8  ;;  %6889 = vpow2.f32 %v10740_v7  ;;  %5278 = vst [vmem:[%s9785_s30 + $0xa8] sm:$0xff] %v5246_v43  ;;  %v4723_v28 = vadd.f32 %v9221_v22, %v4684_v27  ;;  %v4687_v36 = vmul.f32 %v11680_v18, %v4655_v10  ;;  %v11681_v10 = vld [vmem:[#allocation41_spill] sm:$0xff] }
 0x4c4   : > { %v4008_v48 = vadd.f32 1.0, %v3976_v58  ;;  %v6884_v5 = vpop.eup %6883  ;;  %v4955_v57 = vadd.f32 1.0, %v4923_v9  ;;  %v4757_v0 = vmul.f32 %v4654_v24, %v4654_v24  ;;  %v4823_v61 = vmul.f32 %v9483_v21, %v4654_v24  ;;  %v11683_v9 = vld [vmem:[#allocation42_spill] sm:$0xff] }
 0x4c5   : > { %v4592_v50 = vmul.f32 %v9488_v33, %v4329_v39  ;;  %v6886_v37 = vpop.eup %6885  ;;  %v4559_v59 = vmul.f32 %v10887_v1, %v4527_v34  ;;  %v4072_v30 = vsub.f32 %v11677_v15, %v6884_v5  ;;  %v4200_v3 = vadd.f32 1.0, %v4168_v53 }
 0x4c6   : > { %v4232_v7 = vadd.f32 %v6884_v5, %v11677_v15  ;;  %v10965_v27 = vmax.f32 %v4955_v57, 1e-07  ;;  %v4789_v54 = vmul.f32 %v4757_v0, %v11681_v10  ;;  %v4855_v62 = vmul.f32 %v4823_v61, %v10884_v11  ;;  %v11684_v0 = vld [vmem:[#allocation19_spill] sm:$0xff] }
 0x4c7   : > { %v4040_v44 = vmul.f32 %v4008_v48, %v11678_v20  ;;  %v4625_v47 = vmul.f32 %v9218_v40, %v4559_v59  ;;  %v4104_v13 = vmul.f32 0.5, %v4072_v30  ;;  %6891 = vrcp.f32 %v10313_v31 }
 0x4c8   : > { %v4264_v6 = vmul.f32 0.5, %v4232_v7  ;;  %vm5138_vm4 = vcmp.eq.f32.partialorder %v10928_v26, inf  ;;  %6893 = vrsqrt.f32 %v10965_v27  ;;  %vm3944_vm5 = vcmp.lt.f32.partialorder %v11678_v20, 0.1 }
 0x4c9   : > { %v4462_v1 = vmul.f32 %v6886_v37, %v10963_v12  ;;  %v6888_v15 = vpop.eup %6887  ;;  %v4887_v55 = vadd.f32 %v4855_v62, %v4789_v54  ;;  %v10976_v41 = vsub.f32 %v4592_v50, %v4625_v47  ;;  %v4136_v11 = vsel %vm3944_vm5, %v4040_v44, %v4104_v13  ;;  %v11685_v44 = vld [vmem:[#allocation58_spill] sm:$0xff] }
 0x4ca   : > { %v4296_v17 = vsel %vm3944_vm5, %v4200_v3, %v4264_v6  ;;  %v5137_v25 = vmul.f32 %v6888_v15, %v10928_v26  ;;  %v5141_v8 = vand.u32 2147483648, %v10928_v26  ;;  %v3915_v39 = vmul.f32 %v11682_v16, %v11682_v16  ;;  %v11017_v15 = vpop.xlane.xlu1 %4428 }
 0x4cb   : > { %v4494_v60 = vsub.f32 1.0, %v4296_v17  ;;  %v4922_v42 = vadd.f32 %v9535_v63, %v4887_v55  ;;  %v4760_v20 = vmul.f32 %v10976_v41, %v10976_v41  ;;  %v4826_v2 = vmul.f32 %v9483_v21, %v10976_v41 }
 0x4cc   : > { %v4328_v56 = vmul.f32 %v6886_v37, %v4136_v11  ;;  %v5139_v51 = vsel %vm5138_vm4, %v10928_v26, %v5137_v25  ;;  %vm5140_vm6 = vcmp.eq.f32.partialorder %v10928_v26, 0.0  ;;  %6895 = vrcp.f32 %v11682_v16 }
 0x4cd   : > { %v4526_v19 = vmul.f32 %v4494_v60, %v4462_v1  ;;  %v10992_v58 = vpop.eup %6889  ;;  %6897 = vpow2.f32 %v3820_v23  ;;  %v5142_v53 = vsel %vm5140_vm6, %v5141_v8, %v5139_v51  ;;  %v4954_v43 = vadd.f32 1.0, %v4922_v42 }
 0x4ce   : > { %v4792_v34 = vmul.f32 %v4760_v20, %v11683_v9  ;;  %v5245_v18 = vsel %vm5222_vm14, %v5142_v53, %v4723_v28  ;;  %v4858_v48 = vmul.f32 %v4826_v2, %v10923_v45  ;;  %v3979_v57 = vmul.f32 0.16666667, %v3915_v39 }
 0x4cf   : > { %v4558_v5 = vmul.f32 %v6886_v37, %v4526_v19  ;;  %5277 = vst [vmem:[%s9785_s30 + $0xa0] sm:$0xff] %v5245_v18  ;;  %v4726_v26 = vadd.f32 %v9221_v22, %v4687_v36  ;;  %v4686_v61 = vmul.f32 %v11684_v0, %v4654_v24  ;;  %v11001_v50 = vmax.f32 %v4954_v43, 1e-07  ;;  %v11687_v43 = vld [vmem:[#allocation23_spill] sm:$0xff] }
 0x4d0   : > { %v4591_v23 = vmul.f32 %v9488_v33, %v4328_v56  ;;  %v4890_v59 = vadd.f32 %v4858_v48, %v4792_v34  ;;  %v4171_v3 = vmul.f32 0.5, %v3915_v39  ;;  %6899 = vrcp.f32 %v10318_v29  ;;  %v11686_v39 = vld [vmem:[#allocation43_spill] sm:$0xff] }
 0x4d1   : > { %v4624_v30 = vmul.f32 %v9218_v40, %v4558_v5  ;;  %v6892_v28 = vpop.eup %6891  ;;  %vm5159_vm7 = vcmp.eq.f32.partialorder %v10965_v27, inf  ;;  %vm5161_vm8 = vcmp.eq.f32.partialorder %v10965_v27, 0.0  ;;  %v5162_v45 = vand.u32 2147483648, %v10965_v27 }
 0x4d2   : > { %6901 = vrsqrt.f32 %v11001_v50  ;;  %v6894_v24 = vpop.eup %6893  ;;  %v4925_v36 = vadd.f32 %v9535_v63, %v4890_v59  ;;  %v4011_v7 = vadd.f32 1.0, %v3979_v57  ;;  %v4075_v10 = vsub.f32 %v10313_v31, %v6892_v28 }
 0x4d3   : > { %v4656_v37 = vsub.f32 %v4591_v23, %v4624_v30  ;;  %v5158_v54 = vmul.f32 %v6894_v24, %v10965_v27  ;;  %vm3947_vm0 = vcmp.lt.f32.partialorder %v11682_v16, 0.1  ;;  %v4235_v62 = vadd.f32 %v6892_v28, %v10313_v31 }
 0x4d4   : > { %6903 = vrcp.f32 %v11685_v44  ;;  %v4957_v47 = vadd.f32 1.0, %v4925_v36  ;;  %v4203_v1 = vadd.f32 1.0, %v4171_v3  ;;  %v4107_v11 = vmul.f32 0.5, %v4075_v10 }
 0x4d5   : > { %v4759_v13 = vmul.f32 %v4656_v37, %v4656_v37  ;;  %v4825_v6 = vmul.f32 %v9483_v21, %v4656_v37  ;;  %v5160_v55 = vsel %vm5159_vm7, %v10965_v27, %v5158_v54  ;;  %v4267_v17 = vmul.f32 0.5, %v4235_v62 }
 0x4d6   : > { %v3914_v25 = vmul.f32 %v11685_v44, %v11685_v44  ;;  %v6896_v31 = vpop.eup %6895  ;;  %v5163_v8 = vsel %vm5161_vm8, %v5162_v45, %v5160_v55  ;;  %v11026_v60 = vmax.f32 %v4957_v47, 1e-07  ;;  %v4043_v20 = vmul.f32 %v4011_v7, %v11682_v16  ;;  %v11689_v16 = vld [vmem:[#allocation64_spill] sm:$0xff] }
 0x4d7   : > { %v4791_v42 = vmul.f32 %v4759_v13, %v11686_v39  ;;  %v11030_v2 = vpop.eup %6897  ;;  %v5248_v56 = vsel %vm5222_vm14, %v5163_v8, %v4726_v26  ;;  %v4857_v51 = vmul.f32 %v4825_v6, %v10963_v12  ;;  %v4299_v19 = vsel %vm3947_vm0, %v4203_v1, %v4267_v17  ;;  %v11688_v26 = vld [vmem:[#allocation21_spill] sm:$0xff]  ;;  %v11059_v13 = vpop.xlane.xlu0 %4426 }
 0x4d8   : > { %v4465_v53 = vmul.f32 %v6896_v31, %v11017_v15  ;;  %5280 = vst [vmem:[%s9785_s30 + $0xb8] sm:$0xff] %v5248_v56  ;;  %v4725_v27 = vadd.f32 %v9221_v22, %v4686_v61  ;;  %v4689_v9 = vmul.f32 %v11687_v43, %v10976_v41  ;;  %6905 = vrsqrt.f32 %v11026_v60 }
 0x4d9   : > { %v4139_v34 = vsel %vm3947_vm0, %v4043_v20, %v4107_v11  ;;  %vm5152_vm9 = vcmp.eq.f32.partialorder %v11001_v50, inf  ;;  %v4889_v18 = vadd.f32 %v4857_v51, %v4791_v42  ;;  %v4497_v12 = vsub.f32 1.0, %v4299_v19 }
 0x4da   : > { %v3978_v48 = vmul.f32 0.16666667, %v3914_v25  ;;  %v6900_v5 = vpop.eup %6899  ;;  %vm5154_vm10 = vcmp.eq.f32.partialorder %v11001_v50, 0.0  ;;  %v5155_v57 = vand.u32 2147483648, %v11001_v50  ;;  %v4688_v0 = vmul.f32 %v11688_v26, %v4656_v37  ;;  %v11690_v26 = vld [vmem:[#allocation44_spill] sm:$0xff] }
 0x4db   : > { %v4170_v61 = vmul.f32 0.5, %v3914_v25  ;;  %v4924_v41 = vadd.f32 %v9535_v63, %v4889_v18  ;;  %v4331_v59 = vmul.f32 %v6896_v31, %v4139_v34  ;;  %v4529_v30 = vmul.f32 %v4497_v12, %v4465_v53 }
 0x4dc   : > { %v6902_v23 = vpop.eup %6901  ;;  %6907 = vrcp.f32 %v11689_v16  ;;  %v4010_v28 = vadd.f32 1.0, %v3978_v48  ;;  %v4074_v45 = vsub.f32 %v10318_v29, %v6900_v5  ;;  %v4234_v24 = vadd.f32 %v6900_v5, %v10318_v29 }
 0x4dd   : > { %v5151_v3 = vmul.f32 %v6902_v23, %v11001_v50  ;;  %v4956_v7 = vadd.f32 1.0, %v4924_v41  ;;  %v4561_v10 = vmul.f32 %v6896_v31, %v4529_v30  ;;  %vm3946_vm11 = vcmp.lt.f32.partialorder %v11685_v44, 0.1 }
 0x4de   : > { %v6904_v36 = vpop.eup %6903  ;;  %6909 = vrcp.f32 %v10348_v38  ;;  %v4106_v54 = vmul.f32 0.5, %v4074_v45  ;;  %v4202_v62 = vadd.f32 1.0, %v4170_v61  ;;  %v4266_v47 = vmul.f32 0.5, %v4234_v24 }
 0x4df   : > { %v5153_v37 = vsel %vm5152_vm9, %v11001_v50, %v5151_v3  ;;  %v11063_v6 = vmax.f32 %v4956_v7, 1e-07  ;;  %v4627_v1 = vmul.f32 %v9218_v40, %v4561_v10  ;;  %v3917_v55 = vmul.f32 %v11689_v16, %v11689_v16 }
 0x4e0   : > { %v5156_v29 = vsel %vm5154_vm10, %v5155_v57, %v5153_v37  ;;  %v4594_v17 = vmul.f32 %v9488_v33, %v4331_v59  ;;  %v4042_v25 = vmul.f32 %v4010_v28, %v11685_v44  ;;  %v4298_v31 = vsel %vm3946_vm11, %v4202_v62, %v4266_v47 }
 0x4e1   : > { %v5247_v11 = vsel %vm5222_vm14, %v5156_v29, %v4725_v27  ;;  %v4728_v50 = vadd.f32 %v9221_v22, %v4689_v9  ;;  %v11077_v8 = vadd.f32 %v9221_v22, %v4688_v0  ;;  %6911 = vrsqrt.f32 %v11063_v6 }
 0x4e2   : > { %5279 = vst [vmem:[%s9785_s30 + $0xb0] sm:$0xff] %v5247_v11  ;;  %v4464_v39 = vmul.f32 %v6904_v36, %v11059_v13  ;;  %v6906_v42 = vpop.eup %6905  ;;  %vm5173_vm12 = vcmp.eq.f32.partialorder %v11026_v60, inf  ;;  %vm5175_vm13 = vcmp.eq.f32.partialorder %v11026_v60, 0.0  ;;  %v4659_v20 = vsub.f32 %v4594_v17, %v4627_v1 }
 0x4e3   : > { %v4138_v56 = vsel %vm3946_vm11, %v4042_v25, %v4106_v54  ;;  %v5172_v51 = vmul.f32 %v6906_v42, %v11026_v60  ;;  %v5176_v19 = vand.u32 2147483648, %v11026_v60  ;;  %v4496_v53 = vsub.f32 1.0, %v4298_v31 }
 0x4e4   : > { %v3981_v27 = vmul.f32 0.16666667, %v3917_v55  ;;  %v4762_v43 = vmul.f32 %v4659_v20, %v4659_v20  ;;  %v4828_v9 = vmul.f32 %v9483_v21, %v4659_v20  ;;  %vm3949_vm15 = vcmp.lt.f32.partialorder %v11689_v16, 0.1 }
 0x4e5   : > { %v4173_v34 = vmul.f32 0.5, %v3917_v55  ;;  %v5174_v12 = vsel %vm5173_vm12, %v11026_v60, %v5172_v51  ;;  %vm5166_vm1 = vcmp.eq.f32.partialorder %v11063_v6, inf  ;;  %v5169_v44 = vand.u32 2147483648, %v11063_v6  ;;  %v11691_v60 = vld [vmem:[#allocation25_spill] sm:$0xff] }
 0x4e6   : > { %v11089_v18 = vpop.eup %6907  ;;  %v4330_v48 = vmul.f32 %v6904_v36, %v4138_v56  ;;  %v4528_v5 = vmul.f32 %v4496_v53, %v4464_v39  ;;  %v5177_v57 = vsel %vm5175_vm13, %v5176_v19, %v5174_v12  ;;  %vm5168_vm2 = vcmp.eq.f32.partialorder %v11063_v6, 0.0 }
 0x4e7   : > { %v4794_v0 = vmul.f32 %v4762_v43, %v11690_v26  ;;  %v4860_v61 = vmul.f32 %v4828_v9, %v11017_v15  ;;  %v3916_v23 = vmul.f32 %v10280_v52, %v10280_v52  ;;  %v5250_v59 = vsel %vm5222_vm14, %v5177_v57, %v4728_v50  ;;  %v11108_v15 = vpop.xlane.xlu1 %4432  ;;  %v11692_v9 = vld [vmem:[#allocation45_spill] sm:$0xff]  ;;  %v11693_v57 = vld [vmem:[#allocation24_spill] sm:$0xff] }
 0x4e8   : > { %v6910_v41 = vpop.eup %6909  ;;  %v4560_v30 = vmul.f32 %v6904_v36, %v4528_v5  ;;  %v4013_v3 = vadd.f32 1.0, %v3981_v27  ;;  %6913 = vrcp.f32 %v10771_v4  ;;  %5282 = vst [vmem:[%s9785_s30 + $0xc8] sm:$0xff] %v5250_v59  ;;  %v4691_v28 = vmul.f32 %v11691_v60, %v4659_v20  ;;  %v11152_v60 = vpop.xlane.xlu0 %4430 }
 0x4e9   : > { %v4892_v45 = vadd.f32 %v4860_v61, %v4794_v0  ;;  %v4077_v24 = vsub.f32 %v10348_v38, %v6910_v41  ;;  %v4237_v7 = vadd.f32 %v6910_v41, %v10348_v38  ;;  %v4593_v10 = vmul.f32 %v9488_v33, %v4330_v48 }
 0x4ea   : > { %v4626_v37 = vmul.f32 %v9218_v40, %v4560_v30  ;;  %v4205_v54 = vadd.f32 1.0, %v4173_v34  ;;  %6915 = vrcp.f32 %v10280_v52  ;;  %v3980_v29 = vmul.f32 0.16666667, %v3916_v23 }
 0x4eb   : > { %v4927_v36 = vadd.f32 %v9535_v63, %v4892_v45  ;;  %v4109_v62 = vmul.f32 0.5, %v4077_v24  ;;  %v4269_v47 = vmul.f32 0.5, %v4237_v7  ;;  %v6912_v1 = vpop.eup %6911  ;;  %v4045_v11 = vmul.f32 %v4013_v3, %v11689_v16 }
 0x4ec   : > { %v4658_v55 = vsub.f32 %v4593_v10, %v4626_v37  ;;  %v4467_v38 = vmul.f32 %v11089_v18, %v11108_v15  ;;  %6917 = vrcp.f32 %v10992_v58  ;;  %v5165_v17 = vmul.f32 %v6912_v1, %v11063_v6 }
 0x4ed   : > { %v11120_v25 = vadd.f32 %v9221_v22, %v4691_v28  ;;  %v4959_v31 = vadd.f32 1.0, %v4927_v36  ;;  %v4301_v50 = vsel %vm3949_vm15, %v4205_v54, %v4269_v47  ;;  %v4172_v20 = vmul.f32 0.5, %v3916_v23 }
 0x4ee   : > { %v4761_v39 = vmul.f32 %v4658_v55, %v4658_v55  ;;  %v4827_v42 = vmul.f32 %v9483_v21, %v4658_v55  ;;  %v3919_v56 = vmul.f32 %v10541_v49, %v10541_v49  ;;  %v5167_v51 = vsel %vm5166_vm1, %v11063_v6, %v5165_v17 }
 0x4ef   : > { %v11130_v19 = vmax.f32 %v4959_v31, 1e-07  ;;  %v4141_v53 = vsel %vm3949_vm15, %v4045_v11, %v4109_v62  ;;  %v4012_v27 = vadd.f32 1.0, %v3980_v29  ;;  %v5170_v43 = vsel %vm5168_vm2, %v5169_v44, %v5167_v51 }
 0x4f0   : > { %v4793_v34 = vmul.f32 %v4761_v39, %v11692_v9  ;;  %v4859_v12 = vmul.f32 %v4827_v42, %v11059_v13  ;;  %v4499_v48 = vsub.f32 1.0, %v4301_v50  ;;  %v5249_v5 = vsel %vm5222_vm14, %v5170_v43, %v11077_v8  ;;  %v11177_v50 = vpop.xlane.xlu1 %4436 }
 0x4f1   : > { %6919 = vrsqrt.f32 %v11130_v19  ;;  %v4690_v26 = vmul.f32 %v11693_v57, %v4658_v55  ;;  %vm3948_vm3 = vcmp.lt.f32.partialorder %v10280_v52, 0.1  ;;  %5281 = vst [vmem:[%s9785_s30 + $0xc0] sm:$0xff] %v5249_v5  ;;  %v4333_v6 = vmul.f32 %v11089_v18, %v4141_v53 }
 0x4f2   : > { %v6914_v16 = vpop.eup %6913  ;;  %v4891_v0 = vadd.f32 %v4859_v12, %v4793_v34  ;;  %v4531_v44 = vmul.f32 %v4499_v48, %v4467_v38  ;;  %6921 = vrcp.f32 %v10541_v49  ;;  %v4204_v61 = vadd.f32 1.0, %v4172_v20  ;;  %v11694_v34 = vld [vmem:[#allocation48_spill] sm:$0xff] }
 0x4f3   : > { %v4076_v13 = vsub.f32 %v10771_v4, %v6914_v16  ;;  %v4236_v23 = vadd.f32 %v6914_v16, %v10771_v4  ;;  %v3983_v8 = vmul.f32 0.16666667, %v3919_v56  ;;  %v4044_v3 = vmul.f32 %v4012_v27, %v10280_v52 }
 0x4f4   : > { %v6916_v41 = vpop.eup %6915  ;;  %v4926_v59 = vadd.f32 %v9535_v63, %v4891_v0  ;;  %v4563_v30 = vmul.f32 %v11089_v18, %v4531_v44  ;;  %vm3951_vm4 = vcmp.lt.f32.partialorder %v10541_v49, 0.1  ;;  %vm5187_vm5 = vcmp.eq.f32.partialorder %v11130_v19, inf }
 0x4f5   : > { %v11157_v28 = vadd.f32 %v9221_v22, %v4690_v26  ;;  %v4108_v45 = vmul.f32 0.5, %v4076_v13  ;;  %v4268_v24 = vmul.f32 0.5, %v4236_v23  ;;  %v4596_v10 = vmul.f32 %v9488_v33, %v4333_v6 }
 0x4f6   : > { %v6918_v4 = vpop.eup %6917  ;;  %v4958_v7 = vadd.f32 1.0, %v4926_v59  ;;  %v4629_v37 = vmul.f32 %v9218_v40, %v4563_v30  ;;  %6923 = vrcp.f32 %v11030_v2  ;;  %v4466_v54 = vmul.f32 %v6916_v41, %v11152_v60 }
 0x4f7   : > { %v4300_v18 = vsel %vm3948_vm3, %v4204_v61, %v4268_v24  ;;  %v4015_v36 = vadd.f32 1.0, %v3983_v8  ;;  %v4079_v62 = vsub.f32 %v10992_v58, %v6918_v4  ;;  %v4140_v1 = vsel %vm3948_vm3, %v4044_v3, %v4108_v45 }
 0x4f8   : > { %v11166_v47 = vmax.f32 %v4958_v7, 1e-07  ;;  %v11168_v29 = vsub.f32 %v4596_v10, %v4629_v37  ;;  %v4175_v55 = vmul.f32 0.5, %v3919_v56  ;;  %vm5189_vm6 = vcmp.eq.f32.partialorder %v11130_v19, 0.0 }
 0x4f9   : > { %v4111_v11 = vmul.f32 0.5, %v4079_v62  ;;  %v4239_v38 = vadd.f32 %v6918_v4, %v10992_v58  ;;  %6925 = vrcp.f32 %v10734_v35  ;;  %v5190_v17 = vand.u32 2147483648, %v11130_v19 }
 0x4fa   : > { %6927 = vrsqrt.f32 %v11166_v47  ;;  %v4498_v31 = vsub.f32 1.0, %v4300_v18  ;;  %v3918_v39 = vmul.f32 %v10734_v35, %v10734_v35  ;;  %v4764_v42 = vmul.f32 %v11168_v29, %v11168_v29 }
 0x4fb   : > { %v6920_v52 = vpop.eup %6919  ;;  %v4830_v20 = vmul.f32 %v9483_v21, %v11168_v29  ;;  %v4332_v58 = vmul.f32 %v6916_v41, %v4140_v1  ;;  %v4047_v56 = vmul.f32 %v4015_v36, %v10541_v49  ;;  %v4207_v43 = vadd.f32 1.0, %v4175_v55  ;;  %v4435_v55 = vpop.xlane.xlu0 %4434 }
 0x4fc   : > { %v6922_v51 = vpop.eup %6921  ;;  %v5186_v53 = vmul.f32 %v6920_v52, %v11130_v19  ;;  %v4530_v27 = vmul.f32 %v4498_v31, %v4466_v54  ;;  %v4271_v9 = vmul.f32 0.5, %v4239_v38  ;;  %v4796_v12 = vmul.f32 %v4764_v42, %v11694_v34 }
 0x4fd   : > { %v4862_v48 = vmul.f32 %v4830_v20, %v11108_v15  ;;  %v4143_v5 = vsel %vm3951_vm4, %v4047_v56, %v4111_v11  ;;  %v4469_v57 = vmul.f32 %v6922_v51, %v11177_v50  ;;  %v3982_v6 = vmul.f32 0.16666667, %v3918_v39 }
 0x4fe   : > { %v5188_v26 = vsel %vm5187_vm5, %v11130_v19, %v5186_v53  ;;  %v4562_v16 = vmul.f32 %v6916_v41, %v4530_v27  ;;  %v4303_v0 = vsel %vm3951_vm4, %v4207_v43, %v4271_v9  ;;  %v4595_v15 = vmul.f32 %v9488_v33, %v4332_v58 }
 0x4ff   : > { %v5191_v44 = vsel %vm5189_vm6, %v5190_v17, %v5188_v26  ;;  %v4894_v13 = vadd.f32 %v4862_v48, %v4796_v12  ;;  %v4501_v61 = vsub.f32 1.0, %v4303_v0  ;;  %v4335_v30 = vmul.f32 %v6922_v51, %v4143_v5 }
 0x500   : > { %v6924_v23 = vpop.eup %6923  ;;  %v5252_v8 = vsel %vm5222_vm14, %v5191_v44, %v11120_v25  ;;  %v4628_v59 = vmul.f32 %v9218_v40, %v4562_v16  ;;  %v4174_v41 = vmul.f32 0.5, %v3918_v39  ;;  %vm5180_vm7 = vcmp.eq.f32.partialorder %v11166_v47, inf  ;;  %v11695_v39 = vld [vmem:[#allocation51_spill] sm:$0xff] }
 0x501   : > { %5284 = vst [vmem:[%s9785_s30 + $0xd8] sm:$0xff] %v5252_v8  ;;  %v4929_v49 = vadd.f32 %v9535_v63, %v4894_v13  ;;  %v4533_v3 = vmul.f32 %v4501_v61, %v4469_v57  ;;  %v4078_v19 = vsub.f32 %v11030_v2, %v6924_v23  ;;  %v4238_v45 = vadd.f32 %v6924_v23, %v11030_v2 }
 0x502   : > { %v11209_v24 = vsub.f32 %v4595_v15, %v4628_v59  ;;  %vm3950_vm8 = vcmp.lt.f32.partialorder %v10734_v35, 0.1  ;;  %v4014_v4 = vadd.f32 1.0, %v3982_v6  ;;  %v5183_v7 = vand.u32 2147483648, %v11166_v47  ;;  %v11696_v15 = vld [vmem:[#allocation28_spill] sm:$0xff] }
 0x503   : > { %v6926_v25 = vpop.eup %6925  ;;  %v4961_v10 = vadd.f32 1.0, %v4929_v49  ;;  %v4565_v37 = vmul.f32 %v6922_v51, %v4533_v3  ;;  %v4270_v18 = vmul.f32 0.5, %v4238_v45  ;;  %v4110_v62 = vmul.f32 0.5, %v4078_v19 }
 0x504   : > { %v6928_v54 = vpop.eup %6927  ;;  %v4763_v36 = vmul.f32 %v11209_v24, %v11209_v24  ;;  %v4829_v2 = vmul.f32 %v9483_v21, %v11209_v24  ;;  %v4206_v1 = vadd.f32 1.0, %v4174_v41  ;;  %v4598_v17 = vmul.f32 %v9488_v33, %v4335_v30 }
 0x505   : > { %v5179_v11 = vmul.f32 %v6928_v54, %v11166_v47  ;;  %v4993_v38 = vmax.f32 %v4961_v10, 1e-07  ;;  %v4631_v31 = vmul.f32 %v9218_v40, %v4565_v37  ;;  %v4046_v20 = vmul.f32 %v4014_v4, %v10734_v35 }
 0x506   : > { %v4795_v52 = vmul.f32 %v4763_v36, %v11695_v39  ;;  %v4861_v42 = vmul.f32 %v4829_v2, %v11152_v60  ;;  %v4302_v58 = vsel %vm3950_vm8, %v4206_v1, %v4270_v18  ;;  %vm5182_vm0 = vcmp.eq.f32.partialorder %v11166_v47, 0.0 }
 0x507   : > { %v5181_v56 = vsel %vm5180_vm7, %v11166_v47, %v5179_v11  ;;  %6929 = vrsqrt.f32 %v4993_v38  ;;  %v4468_v51 = vmul.f32 %v6926_v25, %v4435_v55  ;;  %v4663_v43 = vsub.f32 %v4598_v17, %v4631_v31 }
 0x508   : > { %v5184_v53 = vsel %vm5182_vm0, %v5183_v7, %v5181_v56  ;;  %v4893_v27 = vadd.f32 %v4861_v42, %v4795_v52  ;;  %v4142_v9 = vsel %vm3950_vm8, %v4046_v20, %v4110_v62  ;;  %v4500_v34 = vsub.f32 1.0, %v4302_v58  ;;  %v11697_v7 = vld [vmem:[#allocation26_spill] sm:$0xff]  ;;  %v11699_v20 = vld [vmem:[#allocation27_spill] sm:$0xff] }
 0x509   : > { %v5251_v60 = vsel %vm5222_vm14, %v5184_v53, %v11157_v28  ;;  %v4766_v48 = vmul.f32 %v4663_v43, %v4663_v43  ;;  %v4832_v5 = vmul.f32 %v9483_v21, %v4663_v43  ;;  %v4334_v47 = vmul.f32 %v6926_v25, %v4142_v9 }
 0x50a   : > { %5283 = vst [vmem:[%s9785_s30 + $0xd0] sm:$0xff] %v5251_v60  ;;  %v4928_v12 = vadd.f32 %v9535_v63, %v4893_v27  ;;  %v4532_v57 = vmul.f32 %v4500_v34, %v4468_v51  ;;  %v4693_v61 = vmul.f32 %v11696_v15, %v11168_v29  ;;  %vm5201_vm9 = vcmp.eq.f32.partialorder %v4993_v38, inf }
 0x50b   : > { %v4798_v16 = vmul.f32 %v4766_v48, %v10201_v14  ;;  %v4864_v0 = vmul.f32 %v4832_v5, %v11177_v50  ;;  %v4597_v13 = vmul.f32 %v9488_v33, %v4334_v47  ;;  %v5204_v14 = vand.u32 2147483648, %v4993_v38 }
 0x50c   : > { %v4960_v26 = vadd.f32 1.0, %v4928_v12  ;;  %v4564_v35 = vmul.f32 %v6926_v25, %v4532_v57  ;;  %v4732_v33 = vadd.f32 %v9221_v22, %v4693_v61  ;;  %vm5203_vm10 = vcmp.eq.f32.partialorder %v4993_v38, 0.0 }
 0x50d   : > { %v4896_v44 = vadd.f32 %v4864_v0, %v4798_v16  ;;  %v4692_v10 = vmul.f32 %v11697_v7, %v11209_v24  ;;  %v11698_v24 = vld [vmem:[#allocation30_spill] sm:$0xff] }
 0x50e   : > { %v4992_v6 = vmax.f32 %v4960_v26, 1e-07  ;;  %v4630_v28 = vmul.f32 %v9218_v40, %v4564_v35  ;;  %v4695_v11 = vmul.f32 %v11698_v24, %v4663_v43 }
 0x50f   : > { %v4931_v8 = vadd.f32 %v9535_v63, %v4896_v44 }
 0x510   : > { %6931 = vrsqrt.f32 %v4992_v6  ;;  %v4662_v59 = vsub.f32 %v4597_v13, %v4630_v28  ;;  %vm5194_vm11 = vcmp.eq.f32.partialorder %v4992_v6, inf  ;;  %v5197_v54 = vand.u32 2147483648, %v4992_v6 }
 0x511   : > { %v6930_v23 = vpop.eup %6929  ;;  %v4963_v50 = vadd.f32 1.0, %v4931_v8  ;;  %vm5196_vm12 = vcmp.eq.f32.partialorder %v4992_v6, 0.0  ;;  %v4734_v31 = vadd.f32 %v9221_v22, %v4695_v11 }
 0x512   : > { %v5200_v30 = vmul.f32 %v6930_v23, %v4993_v38  ;;  %v4765_v41 = vmul.f32 %v4662_v59, %v4662_v59  ;;  %v4831_v49 = vmul.f32 %v9483_v21, %v4662_v59  ;;  %v4694_v58 = vmul.f32 %v11699_v20, %v4662_v59 }
 0x513   : > { %v4995_v19 = vmax.f32 %v4963_v50, 1e-07 }
 0x514   : > { %v5202_v3 = vsel %vm5201_vm9, %v4993_v38, %v5200_v30  ;;  %v4797_v29 = vmul.f32 %v4765_v41, %v10224_v32  ;;  %v4863_v4 = vmul.f32 %v4831_v49, %v4435_v55  ;;  %v4731_v32 = vadd.f32 %v9221_v22, %v4692_v10 }
 0x515   : > { %v5205_v40 = vsel %vm5203_vm10, %v5204_v14, %v5202_v3  ;;  %6933 = vrsqrt.f32 %v4995_v19  ;;  %vm5215_vm13 = vcmp.eq.f32.partialorder %v4995_v19, inf  ;;  %v5218_v17 = vand.u32 2147483648, %v4995_v19 }
 0x516   : > { %v5254_v45 = vsel %vm5222_vm14, %v5205_v40, %v4732_v33  ;;  %v4895_v25 = vadd.f32 %v4863_v4, %v4797_v29  ;;  %vm5217_vm15 = vcmp.eq.f32.partialorder %v4995_v19, 0.0  ;;  %v4733_v27 = vadd.f32 %v9221_v22, %v4694_v58 }
 0x517   : > { %5286 = vst [vmem:[%s9785_s30 + $0xe8] sm:$0xff] %v5254_v45 }
 0x518   : > { %v4930_v37 = vadd.f32 %v9535_v63, %v4895_v25 }
 0x51a   : > { %v6932_v21 = vpop.eup %6931  ;;  %v4962_v36 = vadd.f32 1.0, %v4930_v37 }
 0x51b   : > { %v5193_v18 = vmul.f32 %v6932_v21, %v4992_v6 }
 0x51c   : > { %v4994_v1 = vmax.f32 %v4962_v36, 1e-07 }
 0x51d   : > { %v5195_v2 = vsel %vm5194_vm11, %v4992_v6, %v5193_v18 }
 0x51e   : > { %v5198_v62 = vsel %vm5196_vm12, %v5197_v54, %v5195_v2  ;;  %6935 = vrsqrt.f32 %v4994_v1  ;;  %vm5208_vm1 = vcmp.eq.f32.partialorder %v4994_v1, inf  ;;  %v5211_v53 = vand.u32 2147483648, %v4994_v1 }
 0x51f   : > { %v5253_v55 = vsel %vm5222_vm14, %v5198_v62, %v4731_v32  ;;  %v6934_v63 = vpop.eup %6933  ;;  %vm5210_vm2 = vcmp.eq.f32.partialorder %v4994_v1, 0.0 }
 0x520   : > { %5285 = vst [vmem:[%s9785_s30 + $0xe0] sm:$0xff] %v5253_v55  ;;  %v5214_v38 = vmul.f32 %v6934_v63, %v4995_v19 }
 0x522   : > { %v5216_v39 = vsel %vm5215_vm13, %v4995_v19, %v5214_v38 }
 0x523   : > { %v5219_v52 = vsel %vm5217_vm15, %v5218_v17, %v5216_v39 }
 0x524   : > { %v5256_v42 = vsel %vm5222_vm14, %v5219_v52, %v4734_v31 }
 0x525   : > { %5288 = vst [vmem:[%s9785_s30 + $0xf8] sm:$0xff] %v5256_v42 }
 0x528   : > { %v6936_v56 = vpop.eup %6935 }
 0x529   : > { %v5207_v51 = vmul.f32 %v6936_v56, %v4994_v1 }
 0x52b   : > { %v5209_v43 = vsel %vm5208_vm1, %v4994_v1, %v5207_v51 }
 0x52c   : > { %v5212_v9 = vsel %vm5210_vm2, %v5211_v53, %v5209_v43 }
 0x52d   : > { %v5255_v60 = vsel %vm5222_vm14, %v5212_v9, %v4733_v27 }
 0x52e   : > { %5287 = vst [vmem:[%s9785_s30 + $0xf0] sm:$0xff] %v5255_v60 }
 0x52f   : > { %6997 = shalt.err (!%p6994_p2)
}
 0x530   : > { %s6998_s14 = scalar_lea.hbm %s11269_s9, 4096  ;;  %s7002_s23 = scalar_lea.hbm %s11323_s4, 8192 }
 0x531   : > { %p6999_p3 = scmp.ne.s32.totalorder %s11269_s9, %s6998_s14  ;;  %p7003_p8 = scmp.lt.u32.totalorder %s11269_s9, %s11323_s4 }
 0x532   : > { %p7004_p11 = scmp.lt.u32.totalorder %s7002_s23, %s6998_s14  ;;  %p7006_p10 = scmp.lt.u32.totalorder %s6998_s14, %s11269_s9 }
 0x533   : > { %p7000_p4 = pnand %p6999_p3, %p7120_p5 }
 0x534   : > { %p7005_p9 = por %p7004_p11, %p7003_p8 }
 0x535   : > { %p7001_p7 = pneg %p7000_p4 }
 0x536   : > { %p7007_p12 = por %p7006_p10, %p7005_p9 }
 0x538   : > { %p7008_p13 = pnand %p7007_p12, %p7001_p7 }
 0x53a   : > { %7011 = shalt.err (!%p7008_p13)
}
 0x53b   : > { %s7055_s29 = smov 128   ;;  %s7056_s30 = smov 8  }
 0x53c   : > { %6310 = dma.vmem_to_hbm [thread:$0]  (%p7120_p5), %s11271_s6, 4096, %s11269_s9, %s11278_s19, %s7055_s29, %s7055_s29, %s7056_s30  }
 0x53d PF: > { %p6322_p0 = scmp.ge.s32.totalorder %s7050_s18, 2  ;;  %s5318_s5 = sand.u32 1, %s7038_s15  }
 0x53e   : > { %s5319_s7 = scalar_lea.sflag [#allocation3], %s5318_s5 }
 0x53f   : > { %p6317_p1 = pnand %p6322_p0, %p7124_p6 }
 0x541   : > { %7033 = dma.done.wait (!%p6317_p1), %s5319_s7, 4096  }
 0x542   : > { %7035 = vsyncadd (!%p6317_p1), %s5319_s7, 4294963200  ;;  %p15_p2 = scmp.ge.s32.totalorder %s7107_s21, 4   ;;  %s11700_s15 = smov %s7042_s16 }
 0x543   : > { %s11701_s16 = smov %s7046_s17  ;;  %s11702_s17 = smov %s7118_s24 }
 0x544   : > { %s11703_s18 = smov %s7107_s21  ;;  %17 = sbr.rel (!%p15_p2) target bundleno = 4 (0x4), region = 76 }
 0x54b   :  { %5324 = vsyncpa [#allocation3], 1 }
 0x54c   :  { %5326 = vsyncpa [#allocation3 + $0x1], 1 }
 0x54d   :  { %5327 = vsyncpa [#allocation4], 1 }
 0x54e   :  { %5329 = vsyncpa [#allocation4 + $0x1], 1 }

</bundles_post_ra>
